<compile_context>
chip_gen: v5e
topology: v5e:2x2
jax: 0.10.0
libtpu: 0.0.40
codegen_flags: <defaults>
</compile_context>

<pallas_src>
import functools

import jax
import jax.numpy as jnp
from jax.experimental import pallas as pl
from jax.experimental.pallas import tpu as pltpu


# ----------------------------- activations ---------------------------------
def _kernel_swish(x):
    # x * sigmoid(x); exp + reciprocal go to the EUP slot (separate from VALU).
    return x * pl.reciprocal(1.0 + jnp.exp(-x), approx=False)


def _kernel_relu(x):
    return jnp.maximum(x, 0.0)


_KERNEL_ACTIVATIONS = {"swish": _kernel_swish, "relu": _kernel_relu}


def _ref_swish(x):
    return x * jax.nn.sigmoid(x)


def _ref_relu(x):
    return jnp.maximum(x, 0.0)


_REF_ACTIVATIONS = {"swish": _ref_swish, "relu": _ref_relu}


def _round_up(n, m):
    return -(-n // m) * m


# ------------------------------- kernel -------------------------------------
def _fused_sparse_kernel(*refs, n_hidden_minus_1, activation, mxu_dtype):
    """One grid step = TB batch rows through all O fused subnetworks.

    Refs (weights/biases VMEM-resident across grid steps):
      xT_ref  : (D, TB)           float32   - transposed input tile
      w1T_ref : (O*H, D)          mxu_dtype - first layers of all subnets
      whT_ref : (Lm1, O*H, O*H)   mxu_dtype - block-diag hidden weights (Lm1>0 only)
      woT_ref : (O, O*H)          mxu_dtype - block-sparse output projection
      b_ref   : (Lm1+1, O*H, 1)   float32   - packed biases (row 0 = first layer)
      bo_ref  : (O, 1)            float32   - output biases
      out_ref : (O, TB)           float32   - transposed output tile (lane-dense)
    """
    if n_hidden_minus_1 > 0:
        xT_ref, w1T_ref, whT_ref, woT_ref, b_ref, bo_ref, out_ref = refs
    else:
        xT_ref, w1T_ref, woT_ref, b_ref, bo_ref, out_ref = refs
        whT_ref = None

    act = _KERNEL_ACTIVATIONS[activation]

    # First layer, fused across all subnets: (OH, D) @ (D, TB) -> (OH, TB).
    xT = xT_ref[...].astype(mxu_dtype)
    h = jnp.dot(w1T_ref[...], xT, preferred_element_type=jnp.float32)
    h = act(h + b_ref[0])                       # f32 bias + activation (v5e-safe)

    # Hidden layers: one lane-dense block-diagonal matmul per layer.
    for l in range(n_hidden_minus_1):           # static unrolled loop
        h = jnp.dot(whT_ref[l], h.astype(mxu_dtype),
                    preferred_element_type=jnp.float32)
        h = act(h + b_ref[l + 1])

    # Output projection for all subnets -> lane-dense (O, TB) store.
    y = jnp.dot(woT_ref[...], h.astype(mxu_dtype),
                preferred_element_type=jnp.float32)
    out_ref[...] = (y + bo_ref[...]).astype(out_ref.dtype)


# --------------------------- parameter packing -------------------------------
def pack_sparse_model_params(params, *, mxu_dtype=jnp.bfloat16):
    """One-time packing of per-subnet weights into fused, transposed MXU blocks.

    params (stacked per-subnet, as produced by init_sparse_model_params):
       w1: (O, D, H)     b1: (O, 1, H)
       wh: (O, Lh, H, H) bh: (O, Lh, 1, H)
       wo: (O, H, 1)     bo: (O, 1, 1)
    """
    w1, b1 = params["w1"], params["b1"]
    wh, bh = params["wh"], params["bh"]
    wo, bo = params["wo"], params["bo"]
    Lm1 = int(params["n_hidden_minus_1"])

    O, D, H = w1.shape
    OH = O * H
    if OH > 128:
        # TODO(synk): split whT into <=128-wide (v5e) / <=256-wide (v6e/v7x)
        # block-diagonal tiles once OH exceeds the native MXU width.
        pass

    # First layers stacked along sublanes: w1T[o*H+h, d] = w1[o, d, h]
    w1T = jnp.transpose(w1, (0, 2, 1)).reshape(OH, D).astype(mxu_dtype)
    b1f = b1.reshape(OH)

    eye = jnp.eye(O, dtype=jnp.float32)

    # Output projection, block-sparse: woT[p, o*H+h] = wo[o, h, 0] * (o == p)
    woT = jnp.einsum("oh,op->poh", wo[:, :, 0], eye).reshape(O, OH)

    packed = {
        "w1T": w1T,
        "woT": woT.astype(mxu_dtype),
        "bo": bo.reshape(O, 1).astype(jnp.float32),
        "n_hidden_minus_1": Lm1,
        "mxu_dtype": mxu_dtype,
    }

    if Lm1 > 0:
        # Block-diag hidden weights (transposed): whT[l, o*H+j, p*H+i] = wh[o,l,i,j]*(o==p)
        wh_l = jnp.transpose(wh[:, :Lm1], (1, 0, 2, 3))          # (Lm1, O, H, H)
        whT = jnp.einsum("loij,op->lojpi", wh_l, eye).reshape(Lm1, OH, OH)
        packed["whT"] = whT.astype(mxu_dtype)
        bhf = jnp.transpose(bh[:, :Lm1, 0, :], (1, 0, 2)).reshape(Lm1, OH)
        ball = jnp.concatenate([b1f[None, :], bhf], axis=0)
    else:
        ball = b1f[None, :]
    packed["b"] = ball.astype(jnp.float32).reshape(Lm1 + 1, OH, 1)
    return packed


# ------------------------------ wrapper --------------------------------------
def sparse_model_forward(x, packed, *, activation="swish", block_b=256):
    """
    x:      (B, in_dim) float32
    packed: output of pack_sparse_model_params
    returns (B, out_dim) float32   == torch.cat(outputs, dim=1)
    """
    B, D = x.shape
    O, OH = packed["woT"].shape
    Lm1 = packed["n_hidden_minus_1"]

    # Batch tile: multiple of 128 lanes; cap at block_b (default 256, sized to
    # stay far below v7x's 64 MiB VMEM even with double-buffered x/out tiles).
    assert block_b % 128 == 0
    tb = min(block_b, _round_up(B, 128))
    Bp = _round_up(B, tb)
    grid = (Bp // tb,)

    # Layout plumbing outside the kernel: batch on the 128-lane axis.
    xT = jnp.transpose(x)                                   # (D, B)
    if Bp != B:
        xT = jnp.pad(xT, ((0, 0), (0, Bp - B)))

    kernel = functools.partial(
        _fused_sparse_kernel,
        n_hidden_minus_1=Lm1,
        activation=activation,
        mxu_dtype=packed["mxu_dtype"],
    )

    # x/out tiled over the batch grid; weights/biases resident (constant maps).
    in_specs = [pl.BlockSpec((D, tb), lambda i: (0, i)),
                pl.BlockSpec(packed["w1T"].shape, lambda i: (0, 0))]
    args = [xT, packed["w1T"]]
    if Lm1 > 0:
        in_specs.append(pl.BlockSpec(packed["whT"].shape, lambda i: (0, 0, 0)))
        args.append(packed["whT"])
    in_specs += [pl.BlockSpec(packed["woT"].shape, lambda i: (0, 0)),
                 pl.BlockSpec(packed["b"].shape, lambda i: (0, 0, 0)),
                 pl.BlockSpec(packed["bo"].shape, lambda i: (0, 0))]
    args += [packed["woT"], packed["b"], packed["bo"]]

    flops = 2 * Bp * (D * OH + Lm1 * OH * OH + OH * O)
    transcendentals = Bp * OH * (Lm1 + 1)                    # one exp per activation
    bytes_accessed = (int(xT.size) * 4 + Bp * O * 4 +
                      sum(int(a.size) * a.dtype.itemsize for a in args[1:]))

    yT = pl.pallas_call(
        kernel,
        out_shape=jax.ShapeDtypeStruct((O, Bp), jnp.float32),
        grid=grid,
        in_specs=in_specs,
        out_specs=pl.BlockSpec((O, tb), lambda i: (0, i)),
        compiler_params=pltpu.CompilerParams(
            dimension_semantics=("parallel",)),               # v7x: 2 TCs share B
        cost_estimate=pl.CostEstimate(flops=flops,
                                      transcendentals=transcendentals,
                                      bytes_accessed=bytes_accessed),
    )(*args)

    return jnp.transpose(yT)[:B]                             # (B, O)


# -------------------------- parameter init -----------------------------------
def init_sparse_model_params(key, in_dim, neurons, layers, out_dim):
    """he_normal (kaiming, fan_in, gain=sqrt(2)) weights, zero biases —
    matching SparseModel.__init__ with init='he_normal', bias_init='zeros'."""
    Lm1 = layers - 1
    Lh = max(Lm1, 1)  # keep at least one slot so shapes are non-empty

    k1, k2, k3 = jax.random.split(key, 3)
    gain = jnp.sqrt(2.0)

    w1 = jax.random.normal(k1, (out_dim, in_dim, neurons), jnp.float32) \
        * (gain / jnp.sqrt(in_dim))
    b1 = jnp.zeros((out_dim, 1, neurons), jnp.float32)

    wh = jax.random.normal(k2, (out_dim, Lh, neurons, neurons), jnp.float32) \
        * (gain / jnp.sqrt(neurons))
    bh = jnp.zeros((out_dim, Lh, 1, neurons), jnp.float32)

    # final Linear(neurons, 1): PyTorch default init is uniform; this is a
    # synthetic deterministic init, not a checkpoint load.
    wo = jax.random.normal(k3, (out_dim, neurons, 1), jnp.float32) \
        * (1.0 / jnp.sqrt(neurons))
    bo = jnp.zeros((out_dim, 1, 1), jnp.float32)

    return {"w1": w1, "b1": b1, "wh": wh, "bh": bh, "wo": wo, "bo": bo,
            "n_hidden_minus_1": Lm1}


# ------------------------- pure-JAX reference ---------------------------------
def sparse_model_reference(x, params, *, activation="swish"):
    act = _REF_ACTIVATIONS[activation]
    O = params["w1"].shape[0]
    Lm1 = params["n_hidden_minus_1"]
    cols = []
    for o in range(O):
        h = act(x @ params["w1"][o] + params["b1"][o])
        for l in range(Lm1):
            h = act(h @ params["wh"][o, l] + params["bh"][o, l])
        cols.append(h @ params["wo"][o] + params["bo"][o])
    return jnp.concatenate(cols, axis=1)


# --------------------------------- main ---------------------------------------
if __name__ == "__main__":
    # SparseModel(neurons_hyp=32, activation_hyp='swish', kernel_regularizer=None,
    #             in_dim=8, layers_hyp=3, out_dim=4, init='he_normal',
    #             bias_init='zeros');  O*H = 4*32 = 128 = one MXU/vreg width.
    batch, in_dim, neurons, layers, out_dim = 512, 8, 32, 3, 4

    key = jax.random.PRNGKey(0)
    kx, kp = jax.random.split(key)
    x = jax.random.normal(kx, (batch, in_dim), jnp.float32)
    params = init_sparse_model_params(kp, in_dim, neurons, layers, out_dim)

    y_ref = sparse_model_reference(x, params, activation="swish")

    # f32 MXU operands: tight correctness check vs the pure-JAX reference.
    packed_f32 = pack_sparse_model_params(params, mxu_dtype=jnp.float32)
    y_f32 = jax.block_until_ready(
        sparse_model_forward(x, packed_f32, activation="swish"))
    assert y_f32.shape == (batch, out_dim)
    assert jnp.allclose(y_f32, y_ref, atol=1e-4, rtol=1e-4), "f32 kernel mismatch"

    # Ragged batch (exercises the pad-to-128 path).
    y_small = jax.block_until_ready(
        sparse_model_forward(x[:48], packed_f32, activation="swish"))
    assert y_small.shape == (48, out_dim)
    assert jnp.allclose(y_small, y_ref[:48], atol=1e-4, rtol=1e-4), \
        "padded-batch kernel mismatch"

    # bf16 MXU operands (f32 accumulation + f32 bias/swish): fast path.
    # Note: x is cast to bf16 inside the kernel, so outputs are not f32-exact.
    packed_bf16 = pack_sparse_model_params(params, mxu_dtype=jnp.bfloat16)
    y_bf16 = jax.block_until_ready(
        sparse_model_forward(x, packed_bf16, activation="swish"))
    assert y_bf16.shape == (batch, out_dim)
    assert jnp.allclose(y_bf16, y_ref, atol=1e-1, rtol=1e-1), "bf16 kernel mismatch"

    print("KERNEL_OK")
</pallas_src>

<mosaic_0001>
module attributes {stable_mosaic.version = 11 : i64} {
  func.func @_fused_sparse_kernel(%arg0: i32, %arg1: memref<8x256xf32, #tpu.memory_space<vmem>>, %arg2: memref<128x8xf32, #tpu.memory_space<vmem>>, %arg3: memref<2x128x128xf32, #tpu.memory_space<vmem>>, %arg4: memref<4x128xf32, #tpu.memory_space<vmem>>, %arg5: memref<3x128x1xf32, #tpu.memory_space<vmem>>, %arg6: memref<4x1xf32, #tpu.memory_space<vmem>>, %arg7: memref<4x256xf32, #tpu.memory_space<vmem>>) attributes {dimension_semantics = [#tpu.dimension_semantics<parallel>], iteration_bounds = array<i64: 2>, scalar_prefetch = 0 : i64, scratch_operands = 0 : i64, tpu.core_type = #tpu.core_type<tc>, window_params = [{transform_indices = @transform_0, window_bounds = array<i64: 8, 256>}, {pipeline_mode = #tpu.pipeline_mode<synchronous>, transform_indices = @transform_1, window_bounds = array<i64: 128, 8>}, {pipeline_mode = #tpu.pipeline_mode<synchronous>, transform_indices = @transform_2, window_bounds = array<i64: 2, 128, 128>}, {pipeline_mode = #tpu.pipeline_mode<synchronous>, transform_indices = @transform_3, window_bounds = array<i64: 4, 128>}, {pipeline_mode = #tpu.pipeline_mode<synchronous>, transform_indices = @transform_4, window_bounds = array<i64: 3, 128, 1>}, {pipeline_mode = #tpu.pipeline_mode<synchronous>, transform_indices = @transform_5, window_bounds = array<i64: 4, 1>}, {transform_indices = @transform_6, window_bounds = array<i64: 4, 256>}]} {
    %c0 = arith.constant 0 : index
    %c0_0 = arith.constant 0 : index
    %0 = vector.load %arg1[%c0, %c0_0] : memref<8x256xf32, #tpu.memory_space<vmem>>, vector<8x256xf32>
    %c0_1 = arith.constant 0 : index
    %c0_2 = arith.constant 0 : index
    %1 = vector.load %arg2[%c0_1, %c0_2] : memref<128x8xf32, #tpu.memory_space<vmem>>, vector<128x8xf32>
    %cst = arith.constant dense<0.000000e+00> : vector<128x256xf32>
    %2 = tpu.matmul %1, %0, %cst {dimension_numbers = #tpu.dot_dimension_numbers<[1], [0], [0], [1], [0, 0, 1, 1], [], []>} : vector<128x8xf32>, vector<8x256xf32>, vector<128x256xf32> -> vector<128x256xf32>
    %c0_3 = arith.constant 0 : index
    %c0_4 = arith.constant 0 : index
    %c0_5 = arith.constant 0 : index
    %3 = vector.load %arg5[%c0_3, %c0_4, %c0_5] : memref<3x128x1xf32, #tpu.memory_space<vmem>>, vector<1x128x1xf32>
    %4 = vector.shape_cast %3 : vector<1x128x1xf32> to vector<128x1xf32>
    %5 = vector.broadcast %4 : vector<128x1xf32> to vector<128x256xf32>
    %6 = arith.addf %2, %5 : vector<128x256xf32>
    %cst_6 = arith.constant 0.000000e+00 : f32
    %7 = vector.broadcast %cst_6 : f32 to vector<128x256xf32>
    %8 = arith.subf %7, %6 : vector<128x256xf32>
    %9 = math.exp %8 : vector<128x256xf32>
    %cst_7 = arith.constant 1.000000e+00 : f32
    %10 = vector.broadcast %cst_7 : f32 to vector<128x256xf32>
    %11 = arith.addf %10, %9 : vector<128x256xf32>
    %12 = tpu.reciprocal %11 : vector<128x256xf32> -> vector<128x256xf32>
    %13 = arith.mulf %6, %12 : vector<128x256xf32>
    %c0_8 = arith.constant 0 : index
    %c0_9 = arith.constant 0 : index
    %c0_10 = arith.constant 0 : index
    %14 = vector.load %arg3[%c0_8, %c0_9, %c0_10] : memref<2x128x128xf32, #tpu.memory_space<vmem>>, vector<1x128x128xf32>
    %15 = vector.shape_cast %14 : vector<1x128x128xf32> to vector<128x128xf32>
    %cst_11 = arith.constant dense<0.000000e+00> : vector<128x256xf32>
    %16 = tpu.matmul %15, %13, %cst_11 {dimension_numbers = #tpu.dot_dimension_numbers<[1], [0], [0], [1], [0, 0, 1, 1], [], []>} : vector<128x128xf32>, vector<128x256xf32>, vector<128x256xf32> -> vector<128x256xf32>
    %c1 = arith.constant 1 : index
    %c0_12 = arith.constant 0 : index
    %c0_13 = arith.constant 0 : index
    %17 = vector.load %arg5[%c1, %c0_12, %c0_13] : memref<3x128x1xf32, #tpu.memory_space<vmem>>, vector<1x128x1xf32>
    %18 = vector.shape_cast %17 : vector<1x128x1xf32> to vector<128x1xf32>
    %19 = vector.broadcast %18 : vector<128x1xf32> to vector<128x256xf32>
    %20 = arith.addf %16, %19 : vector<128x256xf32>
    %cst_14 = arith.constant 0.000000e+00 : f32
    %21 = vector.broadcast %cst_14 : f32 to vector<128x256xf32>
    %22 = arith.subf %21, %20 : vector<128x256xf32>
    %23 = math.exp %22 : vector<128x256xf32>
    %cst_15 = arith.constant 1.000000e+00 : f32
    %24 = vector.broadcast %cst_15 : f32 to vector<128x256xf32>
    %25 = arith.addf %24, %23 : vector<128x256xf32>
    %26 = tpu.reciprocal %25 : vector<128x256xf32> -> vector<128x256xf32>
    %27 = arith.mulf %20, %26 : vector<128x256xf32>
    %c1_16 = arith.constant 1 : index
    %c0_17 = arith.constant 0 : index
    %c0_18 = arith.constant 0 : index
    %28 = vector.load %arg3[%c1_16, %c0_17, %c0_18] : memref<2x128x128xf32, #tpu.memory_space<vmem>>, vector<1x128x128xf32>
    %29 = vector.shape_cast %28 : vector<1x128x128xf32> to vector<128x128xf32>
    %cst_19 = arith.constant dense<0.000000e+00> : vector<128x256xf32>
    %30 = tpu.matmul %29, %27, %cst_19 {dimension_numbers = #tpu.dot_dimension_numbers<[1], [0], [0], [1], [0, 0, 1, 1], [], []>} : vector<128x128xf32>, vector<128x256xf32>, vector<128x256xf32> -> vector<128x256xf32>
    %c2 = arith.constant 2 : index
    %c0_20 = arith.constant 0 : index
    %c0_21 = arith.constant 0 : index
    %31 = vector.load %arg5[%c2, %c0_20, %c0_21] : memref<3x128x1xf32, #tpu.memory_space<vmem>>, vector<1x128x1xf32>
    %32 = vector.shape_cast %31 : vector<1x128x1xf32> to vector<128x1xf32>
    %33 = vector.broadcast %32 : vector<128x1xf32> to vector<128x256xf32>
    %34 = arith.addf %30, %33 : vector<128x256xf32>
    %cst_22 = arith.constant 0.000000e+00 : f32
    %35 = vector.broadcast %cst_22 : f32 to vector<128x256xf32>
    %36 = arith.subf %35, %34 : vector<128x256xf32>
    %37 = math.exp %36 : vector<128x256xf32>
    %cst_23 = arith.constant 1.000000e+00 : f32
    %38 = vector.broadcast %cst_23 : f32 to vector<128x256xf32>
    %39 = arith.addf %38, %37 : vector<128x256xf32>
    %40 = tpu.reciprocal %39 : vector<128x256xf32> -> vector<128x256xf32>
    %41 = arith.mulf %34, %40 : vector<128x256xf32>
    %c0_24 = arith.constant 0 : index
    %c0_25 = arith.constant 0 : index
    %42 = vector.load %arg4[%c0_24, %c0_25] : memref<4x128xf32, #tpu.memory_space<vmem>>, vector<4x128xf32>
    %cst_26 = arith.constant dense<0.000000e+00> : vector<4x256xf32>
    %43 = tpu.matmul %42, %41, %cst_26 {dimension_numbers = #tpu.dot_dimension_numbers<[1], [0], [0], [1], [0, 0, 1, 1], [], []>} : vector<4x128xf32>, vector<128x256xf32>, vector<4x256xf32> -> vector<4x256xf32>
    %c0_27 = arith.constant 0 : index
    %c0_28 = arith.constant 0 : index
    %44 = vector.load %arg6[%c0_27, %c0_28] : memref<4x1xf32, #tpu.memory_space<vmem>>, vector<4x1xf32>
    %45 = vector.broadcast %44 : vector<4x1xf32> to vector<4x256xf32>
    %46 = arith.addf %43, %45 : vector<4x256xf32>
    %c0_29 = arith.constant 0 : index
    %c0_30 = arith.constant 0 : index
    %47 = vector.load %arg7[%c0_29, %c0_30] : memref<4x256xf32, #tpu.memory_space<vmem>>, vector<4x256xf32>
    tpu.vector_store %arg7[%c0_29, %c0_30], %46 {strides = array<i32>} : memref<4x256xf32, #tpu.memory_space<vmem>>, vector<4x256xf32>,
    return
  }
  func.func @transform_0(%arg0: i32) -> (i32, i32) {
    %c0_i32 = arith.constant 0 : i32
    %c0_i32_0 = arith.constant 0 : i32
    return %c0_i32, %arg0 : i32, i32
  }
  func.func @transform_1(%arg0: i32) -> (i32, i32) {
    %c0_i32 = arith.constant 0 : i32
    %c0_i32_0 = arith.constant 0 : i32
    %c0_i32_1 = arith.constant 0 : i32
    return %c0_i32, %c0_i32_0 : i32, i32
  }
  func.func @transform_2(%arg0: i32) -> (i32, i32, i32) {
    %c0_i32 = arith.constant 0 : i32
    %c0_i32_0 = arith.constant 0 : i32
    %c0_i32_1 = arith.constant 0 : i32
    %c0_i32_2 = arith.constant 0 : i32
    return %c0_i32, %c0_i32_0, %c0_i32_1 : i32, i32, i32
  }
  func.func @transform_3(%arg0: i32) -> (i32, i32) {
    %c0_i32 = arith.constant 0 : i32
    %c0_i32_0 = arith.constant 0 : i32
    %c0_i32_1 = arith.constant 0 : i32
    return %c0_i32, %c0_i32_0 : i32, i32
  }
  func.func @transform_4(%arg0: i32) -> (i32, i32, i32) {
    %c0_i32 = arith.constant 0 : i32
    %c0_i32_0 = arith.constant 0 : i32
    %c0_i32_1 = arith.constant 0 : i32
    %c0_i32_2 = arith.constant 0 : i32
    return %c0_i32, %c0_i32_0, %c0_i32_1 : i32, i32, i32
  }
  func.func @transform_5(%arg0: i32) -> (i32, i32) {
    %c0_i32 = arith.constant 0 : i32
    %c0_i32_0 = arith.constant 0 : i32
    %c0_i32_1 = arith.constant 0 : i32
    return %c0_i32, %c0_i32_0 : i32, i32
  }
  func.func @transform_6(%arg0: i32) -> (i32, i32) {
    %c0_i32 = arith.constant 0 : i32
    %c0_i32_0 = arith.constant 0 : i32
    return %c0_i32, %arg0 : i32, i32
  }
}

</mosaic_0001>

<bundles_post_ra>
// kernel: tpu_custom_call.1
= control target key start
LH: loop header
LB: loop body
LE: loop exit
PB: predicated region body
PF: predicated region fallthrough
CT: control target
= control target key end

     0   :  { %11 = vsyncpa [#allocation3], 0  ;;  %s6756_s0 = inlined_call_operand.vmem [shape: f32[8,512], index: 0, kind: input, shape index: {}]   ;;  %s6757_s1 = inlined_call_operand.vmem [shape: f32[128,8], index: 1, kind: input, shape index: {}]   ;;  %s6758_s2 = inlined_call_operand.vmem [shape: f32[2,128,128], index: 2, kind: input, shape index: {}]   ;;  %s6759_s3 = inlined_call_operand.vmem [shape: f32[4,128], index: 3, kind: input, shape index: {}]   ;;  %s6760_s4 = inlined_call_operand.vmem [shape: f32[3,128,1], index: 4, kind: input, shape index: {}]   ;;  %s6761_s5 = inlined_call_operand.vmem [shape: f32[4,1], index: 5, kind: input, shape index: {}]   ;;  %s6762_s6 = inlined_call_operand.hbm [shape: f32[4,512], index: 6, kind: output, shape index: {}]  }
   0x1   :  { %13 = vsyncpa [#allocation3 + $0x1], 0  ;;  %s3609_s21 = smov 0   ;;  %s3611_s22 = smov 0  }
   0x2   :  { %s3613_s23 = smov 0   ;;  %s3615_s24 = smov 0  }
   0x3 LB: > { %s3630_s25 = sadd.s32 4294967295, %s3571_s24   ;;  %s2987_s26 = sadd.s32 4294967294, %s3571_s24   ;;  %s3571_s24 = sphi %s3615_s24, %s7436_s24   ;;  %s3567_s23 = sphi %s3613_s23, %s7435_s23   ;;  %s3563_s22 = sphi %s3611_s22, %s7434_s22   ;;  %s3559_s21 = sphi %s3609_s21, %s7433_s21  }
   0x4   : > { %s3634_s27 = sadd.s32 1, %s3571_s24   ;;  %s157_s28 = sadd.s32 1, %s3567_s23 }
   0x5   : > { %s154_s29 = ssub.s32 %s3571_s24, %s3634_s27  ;;  %p167_p0 = scmp.ne.s32.totalorder %s3567_s23, %s3563_s22 }
   0x6   : > { %p155_p1 = scmp.eq.s32.totalorder %s154_s29, 0  ;;  %p168_p2 = scmp.eq.s32.totalorder %s3630_s25, 1 }
   0x7   : > { %p173_p3 = scmp.ne.s32.totalorder %s3563_s22, %s3559_s21  ;;  %p174_p4 = scmp.eq.s32.totalorder %s2987_s26, 1 }
   0x8   : > { %s3645_s30 = scalar_select %p155_p1, %s3567_s23, %s157_s28  }
   0x9   : > { %p3647_p5 = por %p168_p2, %p167_p0  ;;  %p3651_p6 = por %p174_p4, %p173_p3 }
   0xa   : > { %p2990_p7 = scmp.ge.s32.totalorder %s3571_s24, 1  ;;  %p216_p8 = scmp.lt.s32.totalorder %s3571_s24, 3 }
   0xc   : > { %p217_p9 = pnand %p2990_p7, %p216_p8 }
   0xe   : > { %220 = sbr.rel (%p217_p9) target bundleno = 1149 (0x47d), region = 44 }
  0x13   : > { %v286_v0 = vld [vmem:[%s6760_s4 + $0x78] sm:$0xff]  ;;  %v284_v1 = vld [vmem:[%s6760_s4 + $0x68] sm:$0xff]  ;;  %s2992_s15 = sshll.u32 %s3630_s25, 1  ;;  %v3573_v3 = vmov 0   ;;  %v255_v4 = vld [vmem:[%s6757_s1] sm:$0xff]  ;;  %vm367_vm0 = vcmask 64512  }
  0x14   : > { %v282_v2 = vld [vmem:[%s6760_s4 + $0x58] sm:$0xff]  ;;  %3124 = vset.pattern.permute.xlu2 %v3573_v3  ;;  %3123 = vset.pattern.permute.xlu1 %v3573_v3  ;;  %p247_p10 = scmp.lt.s32.totalorder %s2992_s15, 3  ;;  %v265_v7 = vld [vmem:[%s6757_s1 + $0x50] sm:$0xff]  ;;  %v3679_v8 = vld [vmem:[%s6757_s1 + $0x48] sm:$0xff]  ;;  %s3079_s17 = sshll.u32 %s3630_s25, 3 }
  0x15   : > { %3122 = vset.pattern.permute.xlu0 %v3573_v3  ;;  %354 = vperm.xlu1 %3123, %v284_v1   ;;  %v285_v9 = vld [vmem:[%s6760_s4 + $0x70] sm:$0xff]  ;;  %v283_v10 = vld [vmem:[%s6760_s4 + $0x60] sm:$0xff]  ;;  %v256_v12 = vld [vmem:[%s6757_s1 + $0x8] sm:$0xff]  ;;  %s2923_s20 = scalar_lea.hbm %s6762_s6, %s3079_s17  ;;  %s3529_s13 = scalar_lea.hbm %s6762_s6, 16 }
  0x16   : > { %364 = vperm.xlu0 %3122, %v286_v0   ;;  %344 = vperm.xlu2 %3124, %v282_v2   ;;  %s7438_s15 = smov (!%p247_p10, %s2992_s15), 3  ;;  %v281_v11 = vld [vmem:[%s6760_s4 + $0x50] sm:$0xff]  ;;  %v266_v13 = vld [vmem:[%s6757_s1 + $0x58] sm:$0xff]  ;;  %v280_v14 = vld [vmem:[%s6760_s4 + $0x48] sm:$0xff]  ;;  %s2927_s29 = sshll.u32 %s2923_s20, 4  ;;  %s2928_s29 = int_to_ptr.hbm [resolvable:$true] %s2927_s29 }
  0x17   : > { %s2993_s16 = sshll.u32 %s7438_s15, 3  ;;  %v279_v15 = vld [vmem:[%s6760_s4 + $0x40] sm:$0xff]  ;;  %v278_v16 = vld [vmem:[%s6760_s4 + $0x38] sm:$0xff]  ;;  %v257_v17 = vld [vmem:[%s6757_s1 + $0x10] sm:$0xff]  ;;  %s243_s15 = sand.u32 1, %s3563_s22  }
  0x18   : > { %s250_s19 = scalar_lea.vmem %s6756_s0, %s2993_s16  ;;  %v267_v18 = vld [vmem:[%s6757_s1 + $0x60] sm:$0xff]  ;;  %v277_v19 = vld [vmem:[%s6760_s4 + $0x30] sm:$0xff]  ;;  %v276_v20 = vld [vmem:[%s6760_s4 + $0x28] sm:$0xff]  ;;  %s2991_s16 = sshll.u32 %s243_s15, 3 }
  0x19   : > { %v253_v5 = vld [vmem:[%s250_s19] sm:$0xff]  ;;  %v254_v6 = vld [vmem:[%s250_s19 + $0x8] sm:$0xff]  ;;  %v258_v22 = vld [vmem:[%s6757_s1 + $0x18] sm:$0xff]  ;;  %s245_s26 = scalar_lea.vmem [#allocation2], %s2991_s16  ;;  %s2912_s25 = scalar_lea.sflag [#allocation3], %s243_s15 }
  0x1a   : > { %431 = vmatpush.msra.mxu0 %v253_v5  ;;  %3080 = vmatpush.msra.mxu2 %v253_v5  ;;  %v275_v21 = vld [vmem:[%s6760_s4 + $0x20] sm:$0xff]  ;;  %v268_v23 = vld [vmem:[%s6757_s1 + $0x68] sm:$0xff]  ;;  %v274_v24 = vld [vmem:[%s6760_s4 + $0x18] sm:$0xff]  ;;  %s2925_s28 = sshll.u32 %s245_s26, 4  ;;  %s3523_s9 = sshra.s32 %s2928_s29, 4  ;;  %s2926_s28 = int_to_ptr.vmem [resolvable:$true] %s2925_s28  ;;  %s3524_s9 = int_to_ptr.hbm [resolvable:$true] %s3523_s9 }
  0x1b   : > { %496 = vmatpush.msra.mxu1 %v254_v6  ;;  %3081 = vmatpush.msra.mxu3 %v254_v6  ;;  %v273_v25 = vld [vmem:[%s6760_s4 + $0x10] sm:$0xff]  ;;  %v272_v26 = vld [vmem:[%s6760_s4 + $0x8] sm:$0xff]  ;;  %v259_v27 = vld [vmem:[%s6757_s1 + $0x20] sm:$0xff]  ;;  %s3525_s10 = scalar_lea.hbm %s3524_s9, 8  ;;  %p3530_p0 = scmp.lt.s32.totalorder %s3524_s9, %s6762_s6 }
  0x1c   : > { %2994 = vmatmul.msk.f32.vlgmr.msra.gmra.mxu0 %vm367_vm0, %v255_v4  ;;  %3004 = vmatmul.msk.f32.vlgmr.msra.gmra.mxu2 %vm367_vm0, %v265_v7  ;;  %v269_v28 = vld [vmem:[%s6757_s1 + $0x70] sm:$0xff]  ;;  %v3041_v29 = vld [vmem:[%s6760_s4 + $0xf8] sm:$0xff]  ;;  %v271_v30 = vld [vmem:[%s6760_s4] sm:$0xff]  ;;  %p3526_p11 = scmp.ne.s32.totalorder %s3524_s9, %s3525_s10  ;;  %p3531_p1 = scmp.lt.s32.totalorder %s3529_s13, %s3525_s10 }
  0x1d   : > { %3010 = vmatmul.msk.f32.vlgmr.msra.gmra.mxu1 %vm367_vm0, %v255_v4  ;;  %3019 = vmatmul.msk.f32.vlgmr.msra.gmra.mxu3 %vm367_vm0, %v3679_v8  ;;  %v3040_v31 = vld [vmem:[%s6760_s4 + $0xf0] sm:$0xff]  ;;  %v260_v32 = vld [vmem:[%s6757_s1 + $0x28] sm:$0xff]  ;;  %v270_v33 = vld [vmem:[%s6757_s1 + $0x78] sm:$0xff] }
  0x1e   : > { %359 = vperm.xlu0 %3122, %v285_v9   ;;  %349 = vperm.xlu1 %3123, %v283_v10   ;;  %v3038_v34 = vld [vmem:[%s6760_s4 + $0xe0] sm:$0xff]  ;;  %v3039_v35 = vld [vmem:[%s6760_s4 + $0xe8] sm:$0xff]  ;;  %v3037_v36 = vld [vmem:[%s6760_s4 + $0xd8] sm:$0xff]  ;;  %p3527_p12 = pnand %p3526_p11, %p3647_p5  ;;  %p3532_p2 = por %p3531_p1, %p3530_p0 }
  0x1f   : > { %339 = vperm.xlu2 %3124, %v281_v11   ;;  %v261_v37 = vld [vmem:[%s6757_s1 + $0x30] sm:$0xff]  ;;  %v3035_v38 = vld [vmem:[%s6760_s4 + $0xc8] sm:$0xff]  ;;  %v3034_v40 = vld [vmem:[%s6760_s4 + $0xc0] sm:$0xff] }
  0x20   : > { %v3036_v39 = vld [vmem:[%s6760_s4 + $0xd0] sm:$0xff]  ;;  %v262_v41 = vld [vmem:[%s6757_s1 + $0x38] sm:$0xff]  ;;  %v3031_v44 = vld [vmem:[%s6760_s4 + $0xa8] sm:$0xff]  ;;  %p3528_p13 = pneg %p3527_p12 }
  0x21   : > { %v3032_v42 = vld [vmem:[%s6760_s4 + $0xb0] sm:$0xff]  ;;  %v3033_v43 = vld [vmem:[%s6760_s4 + $0xb8] sm:$0xff]  ;;  %v263_v45 = vld [vmem:[%s6757_s1 + $0x40] sm:$0xff] }
  0x22   : > { %v3029_v46 = vld [vmem:[%s6760_s4 + $0x98] sm:$0xff]  ;;  %v3030_v47 = vld [vmem:[%s6760_s4 + $0xa0] sm:$0xff]  ;;  %v3028_v48 = vld [vmem:[%s6760_s4 + $0x90] sm:$0xff]  ;;  %p3533_p3 = pnand %p3532_p2, %p3528_p13 }
  0x23   : > { %v3026_v49 = vld [vmem:[%s6760_s4 + $0x80] sm:$0xff]  ;;  %v3027_v50 = vld [vmem:[%s6760_s4 + $0x88] sm:$0xff]  ;;  %v3073_v51 = vld [vmem:[%s6760_s4 + $0x178] sm:$0xff] }
  0x24   : > { %2995 = vmatmul.msk.f32.gmra.mxu0 %vm367_vm0, %v256_v12  ;;  %3005 = vmatmul.msk.f32.gmra.mxu2 %vm367_vm0, %v266_v13  ;;  %v3071_v52 = vld [vmem:[%s6760_s4 + $0x168] sm:$0xff]  ;;  %v3072_v53 = vld [vmem:[%s6760_s4 + $0x170] sm:$0xff]  ;;  %v3070_v54 = vld [vmem:[%s6760_s4 + $0x160] sm:$0xff] }
  0x25   : > { %3011 = vmatmul.msk.f32.gmra.mxu1 %vm367_vm0, %v256_v12  ;;  %3020 = vmatmul.msk.f32.gmra.mxu3 %vm367_vm0, %v265_v7  ;;  %v3068_v55 = vld [vmem:[%s6760_s4 + $0x150] sm:$0xff]  ;;  %v3069_v56 = vld [vmem:[%s6760_s4 + $0x158] sm:$0xff]  ;;  %v3067_v57 = vld [vmem:[%s6760_s4 + $0x148] sm:$0xff] }
  0x26   : > { %334 = vperm.xlu0 %3122, %v280_v14   ;;  %329 = vperm.xlu1 %3123, %v279_v15   ;;  %v3065_v59 = vld [vmem:[%s6760_s4 + $0x138] sm:$0xff]  ;;  %v3066_v60 = vld [vmem:[%s6760_s4 + $0x140] sm:$0xff]  ;;  %v3064_v61 = vld [vmem:[%s6760_s4 + $0x130] sm:$0xff] }
  0x27   : > { %324 = vperm.xlu2 %3124, %v278_v16   ;;  %v3062_v63 = vld [vmem:[%s6760_s4 + $0x120] sm:$0xff]  ;;  %v3063_v0 = vld [vmem:[%s6760_s4 + $0x128] sm:$0xff]  ;;  %v3061_v1 = vld [vmem:[%s6760_s4 + $0x118] sm:$0xff] }
  0x28   : > { %v3059_v4 = vld [vmem:[%s6760_s4 + $0x108] sm:$0xff]  ;;  %v3060_v5 = vld [vmem:[%s6760_s4 + $0x110] sm:$0xff]  ;;  %v3058_v6 = vld [vmem:[%s6760_s4 + $0x100] sm:$0xff] }
  0x29   : > { %v2858_v10 = vld [vmem:[%s6761_s5] sm:$0xf] }
  0x2c   : > { %2996 = vmatmul.msk.f32.gmra.mxu0 %vm367_vm0, %v257_v17  ;;  %3006 = vmatmul.msk.f32.gmra.mxu2 %vm367_vm0, %v267_v18 }
  0x2d   : > { %3012 = vmatmul.msk.f32.gmra.mxu1 %vm367_vm0, %v257_v17  ;;  %3021 = vmatmul.msk.f32.gmra.mxu3 %vm367_vm0, %v266_v13 }
  0x2e   : > { %319 = vperm.xlu0 %3122, %v277_v19   ;;  %314 = vperm.xlu1 %3123, %v276_v20  }
  0x2f   : > { %309 = vperm.xlu2 %3124, %v275_v21  }
  0x34   : > { %2997 = vmatmul.msk.f32.gmra.mxu0 %vm367_vm0, %v258_v22  ;;  %3007 = vmatmul.msk.f32.gmra.mxu2 %vm367_vm0, %v268_v23 }
  0x35   : > { %3013 = vmatmul.msk.f32.gmra.mxu1 %vm367_vm0, %v258_v22  ;;  %3022 = vmatmul.msk.f32.gmra.mxu3 %vm367_vm0, %v267_v18 }
  0x36   : > { %304 = vperm.xlu0 %3122, %v274_v24   ;;  %299 = vperm.xlu1 %3123, %v273_v25  }
  0x37   : > { %294 = vperm.xlu2 %3124, %v272_v26  }
  0x3c   : > { %2998 = vmatmul.msk.f32.gmra.mxu0 %vm367_vm0, %v259_v27  ;;  %3008 = vmatmul.msk.f32.gmra.mxu2 %vm367_vm0, %v269_v28 }
  0x3d   : > { %3014 = vmatmul.msk.f32.gmra.mxu1 %vm367_vm0, %v259_v27  ;;  %3023 = vmatmul.msk.f32.gmra.mxu3 %vm367_vm0, %v268_v23 }
  0x3e   : > { %1264 = vperm.xlu1 %3123, %v3041_v29   ;;  %289 = vperm.xlu0 %3122, %v271_v30  }
  0x3f   : > { %1259 = vperm.xlu2 %3124, %v3040_v31  }
  0x44   : > { %2999 = vmatmul.msk.f32.gmra.mxu0 %vm367_vm0, %v260_v32  ;;  %3009 = vmatmul.msk.f32.gmra.mxu2 %vm367_vm0, %v270_v33 }
  0x45   : > { %3015 = vmatmul.msk.f32.gmra.mxu1 %vm367_vm0, %v260_v32  ;;  %3024 = vmatmul.msk.f32.gmra.mxu3 %vm367_vm0, %v269_v28 }
  0x46   : > { %1249 = vperm.xlu1 %3123, %v3038_v34   ;;  %1254 = vperm.xlu0 %3122, %v3039_v35  }
  0x47   : > { %1244 = vperm.xlu2 %3124, %v3037_v36  }
  0x4c   : > { %3000 = vmatmul.msk.f32.gmra.mxu0 %vm367_vm0, %v261_v37 }
  0x4d   : > { %3016 = vmatmul.msk.f32.gmra.mxu1 %vm367_vm0, %v261_v37  ;;  %3025 = vmatmul.msk.f32.gmra.mxu3 %vm367_vm0, %v270_v33 }
  0x4e   : > { %1234 = vperm.xlu1 %3123, %v3035_v38   ;;  %1239 = vperm.xlu0 %3122, %v3036_v39  }
  0x4f   : > { %1229 = vperm.xlu2 %3124, %v3034_v40  }
  0x54   : > { %3001 = vmatmul.msk.f32.gmra.mxu0 %vm367_vm0, %v262_v41 }
  0x55   : > { %3017 = vmatmul.msk.f32.gmra.mxu1 %vm367_vm0, %v262_v41 }
  0x56   : > { %1219 = vperm.xlu1 %3123, %v3032_v42   ;;  %1224 = vperm.xlu0 %3122, %v3033_v43  }
  0x57   : > { %1214 = vperm.xlu2 %3124, %v3031_v44  }
  0x5c   : > { %3002 = vmatmul.msk.f32.gmra.mxu0 %vm367_vm0, %v263_v45 }
  0x5d   : > { %3018 = vmatmul.msk.f32.gmra.mxu1 %vm367_vm0, %v263_v45 }
  0x5e   : > { %1204 = vperm.xlu1 %3123, %v3029_v46   ;;  %1209 = vperm.xlu0 %3122, %v3030_v47  }
  0x5f   : > { %1199 = vperm.xlu2 %3124, %v3028_v48  }
  0x64   : > { %3003 = vmatmul.msk.f32.gmra.mxu0 %vm367_vm0, %v3679_v8 }
  0x66   : > { %1189 = vperm.xlu1 %3123, %v3026_v49   ;;  %1194 = vperm.xlu0 %3122, %v3027_v50  }
  0x67   : > { %2116 = vperm.xlu2 %3124, %v3073_v51  }
  0x6e   : > { %2106 = vperm.xlu1 %3123, %v3071_v52   ;;  %2111 = vperm.xlu0 %3122, %v3072_v53  }
  0x6f   : > { %2101 = vperm.xlu2 %3124, %v3070_v54  }
  0x70   : > { %v3862_v58 = vpop.permute.xlu2 %344 }
  0x76   : > { %2091 = vperm.xlu1 %3123, %v3068_v55   ;;  %2096 = vperm.xlu0 %3122, %v3069_v56  }
  0x77   : > { %2086 = vperm.xlu2 %3124, %v3067_v57  }
  0x79   : > { %v340_v62 = vpop.permute.xlu2 %339 }
  0x7e   : > { %2076 = vperm.xlu1 %3123, %v3065_v59   ;;  %2081 = vperm.xlu0 %3122, %v3066_v60  }
  0x7f   : > { %2071 = vperm.xlu2 %3124, %v3064_v61  }
  0x81   : > { %v3895_v7 = vpop.permute.xlu2 %324 }
  0x86   : > { %2061 = vperm.xlu1 %3123, %v3062_v63   ;;  %2066 = vperm.xlu0 %3122, %v3063_v0  }
  0x87   : > { %v3882_v2 = vpop.permute.xlu1 %354  ;;  %2056 = vperm.xlu2 %3124, %v3061_v1  }
  0x88   : > { %v3884_v3 = vpop.permute.xlu0 %364 }
  0x89   : > { %v3904_v11 = vpop.permute.xlu2 %309 }
  0x8e   : > { %2046 = vperm.xlu1 %3123, %v3059_v4   ;;  %2051 = vperm.xlu0 %3122, %v3060_v5  }
  0x8f   : > { %2041 = vperm.xlu2 %3124, %v3058_v6  }
  0x90   : > { %v3897_v8 = vpop.permute.xlu0 %359  ;;  %v3899_v9 = vpop.permute.xlu1 %349 }
  0x91   : > { %v295_v20 = vpop.permute.xlu2 %294 }
  0x96   : > { %2861 = vperm.xlu0 %3122, %v2858_v10  }
  0x98   : > { %v3906_v12 = vpop.permute.xlu0 %334  ;;  %v3908_v13 = vpop.permute.xlu1 %329 }
  0x99   : > { %v433_v14 = vpop.f32.mrf.mxu0 }
  0x9a   : > { %v498_v15 = vpop.f32.mrf.mxu1 }
  0x9f   : > { %v463_v16 = vpop.f32.mrf.mxu2 }
  0xa0   : > { %v3910_v17 = vpop.permute.xlu0 %319  ;;  %v3912_v18 = vpop.permute.xlu1 %314  ;;  %v3914_v19 = vadd.f32 %v463_v16, %v340_v62 }
  0xa1   : > { %v525_v21 = vpop.f32.mrf.mxu3  ;;  %v436_v24 = vpop.f32.mrf.mxu0 }
  0xa2   : > { %v566_v22 = vsub.f32 0.0, %v3914_v19  ;;  %v3918_v23 = vadd.f32 %v525_v21, %v3906_v12  ;;  %v501_v25 = vpop.f32.mrf.mxu1  ;;  %v3920_v26 = vadd.f32 %v436_v24, %v295_v20 }
  0xa3   : > { %v3922_v27 = vadd.f32 %v501_v25, %v295_v20 }
  0xa4   : > { %6936 = vst [vmem:[#allocation5_spill] sm:$0xff] %v3920_v26  ;;  %v618_v28 = vmul.f32 1.442695, %v566_v22  ;;  %v565_v29 = vsub.f32 0.0, %v3918_v23  ;;  %v548_v30 = vsub.f32 0.0, %v3920_v26 }
  0xa5   : > { %6937 = vst [vmem:[#allocation6_spill] sm:$0xff] %v3922_v27  ;;  %v549_v31 = vsub.f32 0.0, %v3922_v27 }
  0xa6   : > { %3125 = vpow2.f32 %v618_v28  ;;  %v616_v32 = vmul.f32 1.442695, %v565_v29  ;;  %v582_v33 = vmul.f32 1.442695, %v548_v30 }
  0xa7   : > { %v584_v34 = vmul.f32 1.442695, %v549_v31  ;;  %v466_v35 = vpop.f32.mrf.mxu2 }
  0xa8   : > { %3127 = vpow2.f32 %v616_v32  ;;  %v305_v36 = vpop.permute.xlu0 %304  ;;  %v3928_v37 = vadd.f32 %v466_v35, %v3862_v58  ;;  %v300_v38 = vpop.permute.xlu1 %299 }
  0xa9   : > { %3129 = vpow2.f32 %v582_v33  ;;  %v528_v39 = vpop.f32.mrf.mxu3  ;;  %v439_v42 = vpop.f32.mrf.mxu0 }
  0xaa   : > { %3131 = vpow2.f32 %v584_v34  ;;  %v568_v40 = vsub.f32 0.0, %v3928_v37  ;;  %v3931_v41 = vadd.f32 %v528_v39, %v340_v62  ;;  %v504_v43 = vpop.f32.mrf.mxu1  ;;  %v3933_v44 = vadd.f32 %v439_v42, %v300_v38 }
  0xab   : > { %v3935_v45 = vadd.f32 %v504_v43, %v300_v38 }
  0xac   : > { %6938 = vst [vmem:[#allocation7_spill] sm:$0xff] %v3933_v44  ;;  %v3126_v46 = vpop.eup %3125  ;;  %v622_v47 = vmul.f32 1.442695, %v568_v40  ;;  %v567_v48 = vsub.f32 0.0, %v3931_v41  ;;  %v550_v50 = vsub.f32 0.0, %v3933_v44 }
  0xad   : > { %6939 = vst [vmem:[#allocation8_spill] sm:$0xff] %v3935_v45  ;;  %v3938_v49 = vadd.f32 1.0, %v3126_v46  ;;  %v551_v51 = vsub.f32 0.0, %v3935_v45 }
  0xae   : > { %v3128_v52 = vpop.eup %3127  ;;  %3133 = vpow2.f32 %v622_v47  ;;  %v620_v53 = vmul.f32 1.442695, %v567_v48  ;;  %v586_v56 = vmul.f32 1.442695, %v550_v50 }
  0xaf   : > { %v3130_v54 = vpop.eup %3129  ;;  %3135 = vrcp.f32 %v3938_v49  ;;  %v3943_v55 = vadd.f32 1.0, %v3128_v52  ;;  %v469_v57 = vpop.f32.mrf.mxu2  ;;  %v588_v61 = vmul.f32 1.442695, %v551_v51 }
  0xb0   : > { %v3132_v59 = vpop.eup %3131  ;;  %v3945_v60 = vadd.f32 1.0, %v3130_v54  ;;  %3137 = vpow2.f32 %v620_v53  ;;  %v290_v62 = vpop.permute.xlu0 %289  ;;  %v3948_v63 = vadd.f32 %v469_v57, %v3899_v9 }
  0xb1   : > { %3139 = vrcp.f32 %v3943_v55  ;;  %v3951_v0 = vadd.f32 1.0, %v3132_v59  ;;  %v3953_v1 = vadd.f32 %v433_v14, %v290_v62  ;;  %v3955_v4 = vadd.f32 %v498_v15, %v290_v62  ;;  %v531_v5 = vpop.f32.mrf.mxu3  ;;  %v442_v16 = vpop.f32.mrf.mxu0 }
  0xb2   : > { %6940 = vst [vmem:[#allocation9_spill] sm:$0xff] %v3945_v60  ;;  %3141 = vrcp.f32 %v3945_v60  ;;  %v570_v6 = vsub.f32 0.0, %v3948_v63  ;;  %v3960_v10 = vadd.f32 %v531_v5, %v3862_v58  ;;  %v507_v20 = vpop.f32.mrf.mxu1  ;;  %v3965_v14 = vadd.f32 %v442_v16, %v305_v36 }
  0xb3   : > { %6941 = vst [vmem:[#allocation10_spill] sm:$0xff] %v3951_v0  ;;  %3143 = vrcp.f32 %v3951_v0  ;;  %v546_v21 = vsub.f32 0.0, %v3953_v1  ;;  %v547_v22 = vsub.f32 0.0, %v3955_v4  ;;  %v3968_v28 = vadd.f32 %v507_v20, %v305_v36 }
  0xb4   : > { %6942 = vst [vmem:[#allocation11_spill] sm:$0xff] %v3953_v1  ;;  %v3134_v15 = vpop.eup %3133  ;;  %3145 = vpow2.f32 %v586_v56  ;;  %v626_v24 = vmul.f32 1.442695, %v570_v6  ;;  %v569_v25 = vsub.f32 0.0, %v3960_v10  ;;  %v552_v33 = vsub.f32 0.0, %v3965_v14 }
  0xb5   : > { %6943 = vst [vmem:[#allocation12_spill] sm:$0xff] %v3955_v4  ;;  %v3970_v29 = vpop.eup %3135  ;;  %v3972_v58 = vadd.f32 1.0, %v3134_v15  ;;  %3147 = vpow2.f32 %v588_v61  ;;  %v578_v30 = vmul.f32 1.442695, %v546_v21  ;;  %v580_v32 = vmul.f32 1.442695, %v547_v22 }
  0xb6   : > { %6944 = vst [vmem:[#allocation13_spill] sm:$0xff] %v3965_v14  ;;  %v3138_v31 = vpop.eup %3137  ;;  %3149 = vpow2.f32 %v626_v24  ;;  %v624_v38 = vmul.f32 1.442695, %v569_v25  ;;  %v590_v40 = vmul.f32 1.442695, %v552_v33  ;;  %v553_v42 = vsub.f32 0.0, %v3968_v28 }
  0xb7   : > { %6945 = vst [vmem:[#allocation14_spill] sm:$0xff] %v3968_v28  ;;  %v3975_v34 = vpop.eup %3139  ;;  %3151 = vrcp.f32 %v3972_v58  ;;  %v3978_v35 = vadd.f32 1.0, %v3138_v31  ;;  %v472_v36 = vpop.f32.mrf.mxu2  ;;  %vm987_vm4 = vweird.f32 %v3972_v58 }
  0xb8   : > { %v3980_v39 = vpop.eup %3141  ;;  %3153 = vpow2.f32 %v578_v30  ;;  %v3984_v43 = vadd.f32 %v472_v36, %v3882_v2  ;;  %v592_v62 = vmul.f32 1.442695, %v553_v42 }
  0xb9   : > { %6946 = vst [vmem:[#allocation15_spill] sm:$0xff] %v3980_v39  ;;  %v3986_v46 = vpop.eup %3143  ;;  %3155 = vrcp.f32 %v3978_v35  ;;  %v534_v47 = vpop.f32.mrf.mxu3 }
  0xba   : > { %6947 = vst [vmem:[#allocation16_spill] sm:$0xff] %v3986_v46  ;;  %v3146_v48 = vpop.eup %3145  ;;  %3157 = vpow2.f32 %v580_v32  ;;  %v572_v50 = vsub.f32 0.0, %v3984_v43  ;;  %v3991_v51 = vadd.f32 %v534_v47, %v3899_v9  ;;  %v445_v52 = vpop.f32.mrf.mxu0 }
  0xbb   : > { %v510_v53 = vpop.f32.mrf.mxu1  ;;  %v3148_v54 = vpop.eup %3147  ;;  %v3993_v56 = vadd.f32 1.0, %v3146_v48  ;;  %3159 = vpow2.f32 %v624_v38  ;;  %v3996_v57 = vadd.f32 %v445_v52, %v3904_v11 }
  0xbc   : > { %v3150_v59 = vpop.eup %3149  ;;  %v3998_v61 = vadd.f32 1.0, %v3148_v54  ;;  %3161 = vpow2.f32 %v590_v40  ;;  %v4001_v5 = vadd.f32 %v510_v53, %v3904_v11  ;;  %v571_v16 = vsub.f32 0.0, %v3991_v51 }
  0xbd   : > { %6948 = vst [vmem:[#allocation17_spill] sm:$0xff] %v3993_v56  ;;  %v4003_v6 = vpop.eup %3151  ;;  %3163 = vrcp.f32 %v3993_v56  ;;  %v4006_v9 = vadd.f32 1.0, %v3150_v59  ;;  %v554_v20 = vsub.f32 0.0, %v3996_v57  ;;  %v630_v22 = vmul.f32 1.442695, %v572_v50 }
  0xbe   : > { %6949 = vst [vmem:[#allocation18_spill] sm:$0xff] %v3996_v57  ;;  %v3154_v21 = vpop.eup %3153  ;;  %3165 = vrcp.f32 %v3998_v61  ;;  %v555_v30 = vsub.f32 0.0, %v4001_v5  ;;  %v628_v38 = vmul.f32 1.442695, %v571_v16  ;;  %vm988_vm5 = vweird.f32 %v4003_v6 }
  0xbf   : > { %6950 = vst [vmem:[#allocation19_spill] sm:$0xff] %v3998_v61  ;;  %v4011_v15 = vpop.eup %3155  ;;  %v4013_v24 = vadd.f32 1.0, %v3154_v21  ;;  %3167 = vrcp.f32 %v4006_v9  ;;  %v475_v11 = vpop.f32.mrf.mxu2  ;;  %v594_v36 = vmul.f32 1.442695, %v554_v20  ;;  %vm1015_vm1 = vweird.f32 %v4006_v9  ;;  %vm4225_vm15 = vmor %vm987_vm4, %vm988_vm5 }
  0xc0   : > { %6951 = vst [vmem:[#allocation20_spill] sm:$0xff] %v4001_v5  ;;  %v3158_v25 = vpop.eup %3157  ;;  %3169 = vpow2.f32 %v592_v62  ;;  %v4018_v31 = vadd.f32 %v475_v11, %v3897_v8 }
  0xc1   : > { %6952 = vst [vmem:[#allocation21_spill] sm:$0xff] %v4013_v24  ;;  %v3160_v32 = vpop.eup %3159  ;;  %v4020_v33 = vadd.f32 1.0, %v3158_v25  ;;  %3171 = vrcp.f32 %v4013_v24  ;;  %v537_v40 = vpop.f32.mrf.mxu3 }
  0xc2   : > { %v3162_v42 = vpop.eup %3161  ;;  %v4023_v47 = vadd.f32 1.0, %v3160_v32  ;;  %3173 = vpow2.f32 %v630_v22  ;;  %v574_v48 = vsub.f32 0.0, %v4018_v31  ;;  %v4027_v50 = vadd.f32 %v537_v40, %v3882_v2  ;;  %v448_v52 = vpop.f32.mrf.mxu0 }
  0xc3   : > { %6953 = vst [vmem:[#allocation22_spill] sm:$0xff] %v4020_v33  ;;  %v513_v53 = vpop.f32.mrf.mxu1  ;;  %v4029_v54 = vpop.eup %3163  ;;  %3175 = vrcp.f32 %v4020_v33  ;;  %v4032_v59 = vadd.f32 1.0, %v3162_v42  ;;  %v4035_v62 = vadd.f32 %v448_v52, %v3912_v18  ;;  %v596_v2 = vmul.f32 1.442695, %v555_v30 }
  0xc4   : > { %6954 = vst [vmem:[#allocation23_spill] sm:$0xff] %v4029_v54  ;;  %v4038_v16 = vadd.f32 %v513_v53, %v3912_v18  ;;  %v4040_v20 = vpop.eup %3165  ;;  %3177 = vrcp.f32 %v4023_v47  ;;  %v573_v21 = vsub.f32 0.0, %v4027_v50  ;;  %v634_v32 = vmul.f32 1.442695, %v574_v48 }
  0xc5   : > { %6955 = vst [vmem:[#allocation24_spill] sm:$0xff] %v4032_v59  ;;  %v4044_v22 = vpop.eup %3167  ;;  %3179 = vrcp.f32 %v4032_v59  ;;  %v556_v11 = vsub.f32 0.0, %v4035_v62  ;;  %v983_v30 = vmul.f32 %v4003_v6, %v3972_v58  ;;  %v4057_v53 = vmul.f32 %v3970_v29, %v3938_v49 }
  0xc6   : > { %6956 = vst [vmem:[#allocation25_spill] sm:$0xff] %v4035_v62  ;;  %v3170_v25 = vpop.eup %3169  ;;  %3181 = vpow2.f32 %v628_v38  ;;  %v557_v40 = vsub.f32 0.0, %v4038_v16  ;;  %v632_v26 = vmul.f32 1.442695, %v573_v21  ;;  %v1021_v48 = vand.u32 2147483648, %v4006_v9 }
  0xc7   : > { %6957 = vst [vmem:[#allocation26_spill] sm:$0xff] %v4038_v16  ;;  %v4049_v18 = vpop.eup %3171  ;;  %v4051_v42 = vadd.f32 1.0, %v3170_v25  ;;  %3183 = vpow2.f32 %v594_v36  ;;  %v478_v52 = vpop.f32.mrf.mxu2  ;;  %v598_v25 = vmul.f32 1.442695, %v556_v11  ;;  %v1011_v24 = vmul.f32 %v4044_v22, %v4006_v9 }
  0xc8   : > { %6958 = vst [vmem:[#allocation27_spill] sm:$0xff] %v4040_v20  ;;  %v3174_v1 = vpop.eup %3173  ;;  %3185 = vpow2.f32 %v596_v2  ;;  %v4060_v38 = vadd.f32 %v478_v52, %v3884_v3  ;;  %v600_v2 = vmul.f32 1.442695, %v557_v40  ;;  %v984_v11 = vsub.f32 1.0, %v983_v30 }
  0xc9   : > { %6959 = vst [vmem:[#allocation28_spill] sm:$0xff] %v4049_v18  ;;  %v4063_v44 = vpop.eup %3175  ;;  %3187 = vrcp.f32 %v4051_v42  ;;  %v4066_v36 = vadd.f32 1.0, %v3174_v1  ;;  %v540_v18 = vpop.f32.mrf.mxu3  ;;  %v4090_v33 = vor.u32 1.1754944e-38, %v1021_v48  ;;  %vm1016_vm2 = vweird.f32 %v4044_v22 }
  0xca   : > { %6960 = vst [vmem:[#allocation29_spill] sm:$0xff] %v4051_v42  ;;  %v4070_v4 = vpop.eup %3177  ;;  %3189 = vpow2.f32 %v634_v32  ;;  %v576_v21 = vsub.f32 0.0, %v4060_v38  ;;  %v4074_v52 = vadd.f32 %v540_v18, %v3897_v8  ;;  %v451_v39 = vpop.f32.mrf.mxu0  ;;  %v1019_v8 = vand.u32 2147483647, %v4006_v9  ;;  %vm4174_vm10 = vmor %vm1015_vm1, %vm1016_vm2 }
  0xcb   : > { %6961 = vst [vmem:[#allocation30_spill] sm:$0xff] %v4063_v44  ;;  %v516_v60 = vpop.f32.mrf.mxu1  ;;  %v4076_v14 = vpop.eup %3179  ;;  %3191 = vrcp.f32 %v4066_v36  ;;  %v4080_v1 = vadd.f32 %v451_v39, %v3910_v17  ;;  %v1012_v44 = vsub.f32 1.0, %v1011_v24  ;;  %v985_v24 = vmul.f32 %v4003_v6, %v984_v11 }
  0xcc   : > { %6962 = vst [vmem:[#allocation31_spill] sm:$0xff] %v4076_v14  ;;  %v3182_v54 = vpop.eup %3181  ;;  %3193 = vpow2.f32 %v632_v26  ;;  %v575_v32 = vsub.f32 0.0, %v4074_v52  ;;  %v4085_v40 = vadd.f32 %v516_v60, %v3910_v17  ;;  %v638_v27 = vmul.f32 1.442695, %v576_v21 }
  0xcd   : > { %6963 = vst [vmem:[#allocation32_spill] sm:$0xff] %v4080_v1  ;;  %v3184_v18 = vpop.eup %3183  ;;  %v4088_v56 = vadd.f32 1.0, %v3182_v54  ;;  %3195 = vpow2.f32 %v598_v25  ;;  %v558_v26 = vsub.f32 0.0, %v4080_v1  ;;  %v991_v54 = vand.u32 2147483647, %v3972_v58 }
  0xce   : > { %6964 = vst [vmem:[#allocation33_spill] sm:$0xff] %v4085_v40  ;;  %v3186_v39 = vpop.eup %3185  ;;  %v4092_v30 = vadd.f32 1.0, %v3184_v18  ;;  %3197 = vpow2.f32 %v600_v2  ;;  %v636_v25 = vmul.f32 1.442695, %v575_v32  ;;  %v559_v2 = vsub.f32 0.0, %v4085_v40 }
  0xcf   : > { %v4097_v17 = vpop.eup %3187  ;;  %3199 = vrcp.f32 %v4088_v56  ;;  %v4100_v60 = vadd.f32 1.0, %v3186_v39  ;;  %v993_v21 = vand.u32 2147483648, %v3972_v58  ;;  %v1047_v14 = vand.u32 2147483647, %v4066_v36 }
  0xd0   : > { %6965 = vst [vmem:[#allocation34_spill] sm:$0xff] %v4092_v30  ;;  %v3190_v48 = vpop.eup %3189  ;;  %3201 = vrcp.f32 %v4092_v30  ;;  %v1013_v11 = vmul.f32 %v4044_v22, %v1012_v44  ;;  %v602_v45 = vmul.f32 1.442695, %v558_v26  ;;  %vm1043_vm3 = vweird.f32 %v4066_v36 }
  0xd1   : > { %6966 = vst [vmem:[#allocation35_spill] sm:$0xff] %v4097_v17  ;;  %v4107_v18 = vpop.eup %3191  ;;  %3203 = vrcp.f32 %v4100_v60  ;;  %v4110_v57 = vadd.f32 1.0, %v3190_v48  ;;  %v543_v39 = vpop.f32.mrf.mxu3  ;;  %vm4134_vm6 = vcmp.eq.f32.partialorder %v1019_v8, 8.507059e+37  ;;  %v1049_v20 = vand.u32 2147483648, %v4066_v36 }
  0xd2   : > { %6967 = vst [vmem:[#allocation36_spill] sm:$0xff] %v4100_v60  ;;  %v3194_v59 = vpop.eup %3193  ;;  %3205 = vpow2.f32 %v638_v27  ;;  %v4115_v32 = vadd.f32 %v543_v39, %v3884_v3  ;;  %v454_v46 = vpop.f32.mrf.mxu0  ;;  %v1039_v62 = vmul.f32 %v4107_v18, %v4066_v36  ;;  %v604_v39 = vmul.f32 1.442695, %v559_v2 }
  0xd3   : > { %v519_v0 = vpop.f32.mrf.mxu1  ;;  %v3196_v48 = vpop.eup %3195  ;;  %3207 = vrcp.f32 %v4110_v57  ;;  %v4121_v28 = vadd.f32 1.0, %v3194_v59  ;;  %v4124_v44 = vadd.f32 %v454_v46, %v3895_v7  ;;  %v1014_v2 = vadd.f32 %v4044_v22, %v1013_v11 }
  0xd4   : > { %v4127_v27 = vadd.f32 %v519_v0, %v3895_v7  ;;  %v3198_v3 = vpop.eup %3197  ;;  %v4131_v26 = vadd.f32 1.0, %v3196_v48  ;;  %3209 = vpow2.f32 %v636_v25  ;;  %v577_v30 = vsub.f32 0.0, %v4115_v32 }
  0xd5   : > { %6968 = vst [vmem:[#allocation37_spill] sm:$0xff] %v4124_v44  ;;  %v4138_v46 = vpop.eup %3199  ;;  %3211 = vrcp.f32 %v4121_v28  ;;  %v4141_v7 = vadd.f32 1.0, %v3198_v3  ;;  %v560_v0 = vsub.f32 0.0, %v4124_v44  ;;  %v1075_v3 = vand.u32 2147483647, %v4110_v57 }
  0xd6   : > { %6969 = vst [vmem:[#allocation38_spill] sm:$0xff] %v4131_v26  ;;  %v4145_v48 = vpop.eup %3201  ;;  %3213 = vrcp.f32 %v4131_v26  ;;  %v640_v25 = vmul.f32 1.442695, %v577_v30  ;;  %v561_v8 = vsub.f32 0.0, %v4127_v27  ;;  %v1077_v1 = vand.u32 2147483648, %v4110_v57 }
  0xd7   : > { %6972 = vst [vmem:[#allocation39_spill] sm:$0xff] %v4141_v7  ;;  %v4150_v61 = vpop.eup %3203  ;;  %3215 = vrcp.f32 %v4141_v7  ;;  %v1040_v5 = vsub.f32 1.0, %v1039_v62  ;;  %vm4155_vm7 = vcmp.eq.f32.partialorder %v1047_v14, 8.507059e+37  ;;  %v606_v30 = vmul.f32 1.442695, %v560_v0 }
  0xd8   : > { %6973 = vst [vmem:[#allocation40_spill] sm:$0xff] %v4145_v48  ;;  %v3206_v48 = vpop.eup %3205  ;;  %3217 = vpow2.f32 %v602_v45  ;;  %v4160_v26 = vadd.f32 %v4003_v6, %v985_v24  ;;  %v4162_v11 = vor.u32 1.1754944e-38, %v993_v21  ;;  %vm1071_vm8 = vweird.f32 %v4110_v57 }
  0xd9   : > { %6974 = vst [vmem:[#allocation41_spill] sm:$0xff] %v4150_v61  ;;  %v4164_v42 = vpop.eup %3207  ;;  %v4166_v44 = vadd.f32 1.0, %v3206_v48  ;;  %3219 = vpow2.f32 %v604_v39  ;;  %vm1044_vm9 = vweird.f32 %v4107_v18  ;;  %vm4178_vm11 = vcmp.eq.f32.partialorder %v991_v54, 8.507059e+37 }
  0xda   : > { %v3210_v62 = vpop.eup %3209  ;;  %3221 = vpow2.f32 %v640_v25  ;;  %v608_v24 = vmul.f32 1.442695, %v561_v8  ;;  %v457_v21 = vpop.f32.mrf.mxu0  ;;  %v1067_v0 = vmul.f32 %v4164_v42, %v4110_v57  ;;  %v1041_v48 = vmul.f32 %v4107_v18, %v1040_v5  ;;  %vm4214_vm14 = vmor %vm1043_vm3, %vm1044_vm9 }
  0xdb   : > { %v522_v39 = vpop.f32.mrf.mxu1  ;;  %v4185_v16 = vpop.eup %3211  ;;  %3223 = vrcp.f32 %v4166_v44  ;;  %v4189_v9 = vadd.f32 %v457_v21, %v3908_v13  ;;  %vm4194_vm12 = vcmp.eq.f32.partialorder %v1075_v3, 8.507059e+37  ;;  %v1078_v8 = vor.u32 1.1754944e-38, %v1077_v1 }
  0xdc   : > { %v4192_v54 = vadd.f32 %v522_v39, %v3908_v13  ;;  %v4198_v61 = vpop.eup %3213  ;;  %v4200_v60 = vadd.f32 1.0, %v3210_v62  ;;  %3225 = vpow2.f32 %v606_v30  ;;  %v1105_v5 = vand.u32 2147483648, %v4166_v44 }
  0xdd   : > { %6981 = vst [vmem:[#allocation42_spill] sm:$0xff] %v4189_v9  ;;  %v1018_v21 = vsel %vm4174_vm10, %v4044_v22, %v1014_v2  ;;  %v4206_v40 = vpop.eup %3215  ;;  %v562_v13 = vsub.f32 0.0, %v4189_v9  ;;  %v1068_v3 = vsub.f32 1.0, %v1067_v0  ;;  %vm1072_vm13 = vweird.f32 %v4164_v42 }
  0xde   : > { %6984 = vst [vmem:[#allocation43_spill] sm:$0xff] %v4198_v61  ;;  %v1050_v30 = vor.u32 1.1754944e-38, %v1049_v20  ;;  %v3218_v62 = vpop.eup %3217  ;;  %3227 = vpow2.f32 %v608_v24  ;;  %v563_v22 = vsub.f32 0.0, %v4192_v54  ;;  %v1103_v2 = vand.u32 2147483647, %v4166_v44  ;;  %vm1073_vm2 = vmor %vm1071_vm8, %vm1072_vm13 }
  0xdf   : > { %6985 = vst [vmem:[#allocation44_spill] sm:$0xff] %v4206_v40  ;;  %v1042_v45 = vadd.f32 %v4107_v18, %v1041_v48  ;;  %v3220_v36 = vpop.eup %3219  ;;  %v4229_v0 = vadd.f32 1.0, %v3218_v62  ;;  %vm1099_vm0 = vweird.f32 %v4166_v44  ;;  %v1069_v20 = vmul.f32 %v4164_v42, %v1068_v3 }
  0xe0   : > { %v1023_v24 = vsel %vm4134_vm6, %v4090_v33, %v1018_v21  ;;  %v3222_v48 = vpop.eup %3221  ;;  %3229 = vrcp.f32 %v4200_v60  ;;  %v610_v61 = vmul.f32 1.442695, %v562_v13  ;;  %v1106_v58 = vor.u32 1.1754944e-38, %v1105_v5 }
  0xe1   : > { %v1046_v9 = vsel %vm4214_vm14, %v4107_v18, %v1042_v45  ;;  %v3224_v40 = vpop.eup %3223  ;;  %v4240_v62 = vadd.f32 1.0, %v3220_v36  ;;  %v4242_v7 = vadd.f32 1.0, %v3222_v48  ;;  %v1070_v3 = vadd.f32 %v4164_v42, %v1069_v20 }
  0xe2   : > { %v990_v33 = vsel %vm4225_vm15, %v4003_v6, %v4160_v26  ;;  %v3226_v59 = vpop.eup %3225  ;;  %3231 = vrcp.f32 %v4229_v0  ;;  %v612_v5 = vmul.f32 1.442695, %v563_v22  ;;  %v460_v21 = vpop.f32.mrf.mxu0  ;;  %v1095_v13 = vmul.f32 %v3224_v40, %v4166_v44 }
  0xe3   : > { %vm4251_vm1 = vcmp.eq.f32.partialorder %v1103_v2, 8.507059e+37  ;;  %v1051_v1 = vsel %vm4155_vm7, %v1050_v30, %v1046_v9  ;;  %3233 = vrcp.f32 %v4242_v7  ;;  %v4262_v6 = vadd.f32 1.0, %v3226_v59 }
  0xe4   : > { %v4265_v26 = vadd.f32 %v460_v21, %v3906_v12  ;;  %v1074_v22 = vsel %vm1073_vm2, %v4164_v42, %v1070_v3  ;;  %v3228_v2 = vpop.eup %3227  ;;  %3235 = vpow2.f32 %v610_v61  ;;  %v1096_v45 = vsub.f32 1.0, %v1095_v13 }
  0xe5   : > { %v1079_v39 = vsel %vm4194_vm12, %v1078_v8, %v1074_v22  ;;  %v995_v57 = vsel %vm4178_vm11, %v4162_v11, %v990_v33  ;;  %3237 = vrcp.f32 %v4240_v62  ;;  %vm1100_vm3 = vweird.f32 %v3224_v40 }
  0xe6   : > { %v564_v17 = vsub.f32 0.0, %v4265_v26  ;;  %v4276_v12 = vmul.f32 %v1023_v24, %v3948_v63  ;;  %v4278_v9 = vpop.eup %3229  ;;  %v4280_v42 = vadd.f32 1.0, %v3228_v2  ;;  %3239 = vpow2.f32 %v612_v5  ;;  %vm4292_vm4 = vmor %vm1099_vm0, %vm1100_vm3 }
  0xe7   : > { %v1097_v61 = vmul.f32 %v3224_v40, %v1096_v45  ;;  %v1148_v25 = vmul.f32 %v1051_v1, %v3984_v43  ;;  %3241 = vrcp.f32 %v4262_v6  ;;  %v1150_v11 = vmul.f32 %v1079_v39, %v4018_v31 }
  0xe8   : > { %v614_v14 = vmul.f32 1.442695, %v564_v17  ;;  %v4286_v8 = vmul.f32 %v995_v57, %v3928_v37  ;;  %v4288_v30 = vpop.eup %3231  ;;  %vm1113_vm5 = vweird.f32 %v4242_v7  ;;  %v6994_v43 = vsub.f32 1.0, %v4057_v53 }
  0xe9   : > { %v1098_v63 = vadd.f32 %v3224_v40, %v1097_v61  ;;  %vm959_vm6 = vweird.f32 %v3938_v49  ;;  %vm960_vm7 = vweird.f32 %v3970_v29  ;;  %v3234_v37 = vpop.eup %3233  ;;  %v1117_v31 = vand.u32 2147483647, %v4242_v7 }
  0xea   : > { %v957_v20 = vmul.f32 %v3970_v29, %v6994_v43  ;;  %3243 = vpow2.f32 %v614_v14  ;;  %v1119_v44 = vand.u32 2147483648, %v4242_v7  ;;  %vm4304_vm8 = vmor %vm959_vm6, %vm960_vm7  ;;  %v963_v48 = vand.u32 2147483647, %v3938_v49  ;;  %v3236_v3 = vpop.eup %3235 }
  0xeb   : > { %3245 = vrcp.f32 %v4280_v42  ;;  %v1102_v53 = vsel %vm4292_vm4, %v3224_v40, %v1098_v63  ;;  %v1109_v33 = vmul.f32 %v3234_v37, %v4242_v7  ;;  %v4314_v5 = vpop.eup %3237  ;;  %v4316_v21 = vadd.f32 1.0, %v3236_v3 }
  0xec   : > { %v958_v59 = vadd.f32 %v3970_v29, %v957_v20  ;;  %v1107_v13 = vsel %vm4251_vm1, %v1106_v58, %v1102_v53  ;;  %vm4320_vm9 = vcmp.eq.f32.partialorder %v963_v48, 8.507059e+37  ;;  %v965_v22 = vand.u32 2147483648, %v3938_v49  ;;  %v3240_v2 = vpop.eup %3239 }
  0xed   : > { %v1152_v40 = vmul.f32 %v1107_v13, %v4060_v38  ;;  %v1110_v45 = vsub.f32 1.0, %v1109_v33  ;;  %v1081_v57 = vmul.f32 %v4278_v9, %v4200_v60  ;;  %v4331_v17 = vpop.eup %3241  ;;  %v4333_v58 = vadd.f32 1.0, %v3240_v2 }
  0xee   : > { %v962_v39 = vsel %vm4304_vm8, %v3970_v29, %v958_v59  ;;  %vm4335_vm10 = vcmp.eq.f32.partialorder %v1117_v31, 8.507059e+37  ;;  %v1120_v49 = vor.u32 1.1754944e-38, %v1119_v44  ;;  %v966_v61 = vor.u32 1.1754944e-38, %v965_v22 }
  0xef   : > { %3247 = vrcp.f32 %v4316_v21  ;;  %1267 = vmatpush.msrb.mxu2 %v1152_v40  ;;  %v1111_v38 = vmul.f32 %v3234_v37, %v1110_v45  ;;  %vm1114_vm11 = vweird.f32 %v3234_v37  ;;  %v1082_v14 = vsub.f32 1.0, %v1081_v57 }
  0xf0   : > { %v3244_v29 = vpop.eup %3243  ;;  %v967_v63 = vsel %vm4320_vm9, %v966_v61, %v962_v39  ;;  %vm1085_vm12 = vweird.f32 %v4200_v60  ;;  %v1091_v36 = vand.u32 2147483648, %v4200_v60  ;;  %v1053_v43 = vmul.f32 %v4185_v16, %v4121_v28  ;;  %vm1115_vm14 = vmor %vm1113_vm5, %vm1114_vm11 }
  0xf1   : > { %v4346_v20 = vpop.eup %3245  ;;  %1268 = vmatpush.msrb.mxu2 %v1150_v11  ;;  %v1112_v31 = vadd.f32 %v3234_v37, %v1111_v38  ;;  %v1083_v44 = vmul.f32 %v4278_v9, %v1082_v14  ;;  %vm1086_vm13 = vweird.f32 %v4278_v9  ;;  %v1089_v24 = vand.u32 2147483647, %v4200_v60 }
  0xf2   : > { %3249 = vrcp.f32 %v4333_v58  ;;  %v4352_v48 = vadd.f32 1.0, %v3244_v29  ;;  %v1142_v3 = vmul.f32 %v967_v63, %v3914_v19  ;;  %v1054_v53 = vsub.f32 1.0, %v1053_v43  ;;  %vm1087_vm0 = vmor %vm1085_vm12, %vm1086_vm13 }
  0xf3   : > { %1269 = vmatpush.msrb.mxu2 %v1148_v25  ;;  %v1116_v11 = vsel %vm1115_vm14, %v3234_v37, %v1112_v31  ;;  %v1084_v33 = vadd.f32 %v4278_v9, %v1083_v44  ;;  %v1092_v59 = vor.u32 1.1754944e-38, %v1091_v36  ;;  %vm1058_vm15 = vweird.f32 %v4185_v16 }
  0xf4   : > { %v1121_v13 = vsel %vm4335_vm10, %v1120_v49, %v1116_v11  ;;  %v1055_v1 = vmul.f32 %v4185_v16, %v1054_v53  ;;  %v1061_v7 = vand.u32 2147483647, %v4121_v28  ;;  %v1063_v19 = vand.u32 2147483648, %v4121_v28 }
  0xf5   : > { %v4367_v22 = vpop.eup %3247  ;;  %1270 = vmatpush.msrb.mxu2 %v4276_v12  ;;  %v1153_v25 = vmul.f32 %v1121_v13, %v4115_v32  ;;  %v1088_v37 = vsel %vm1087_vm0, %v4278_v9, %v1084_v33  ;;  %vm1090_vm1 = vcmp.eq.f32.partialorder %v1089_v24, 8.507059e+37  ;;  %v1025_v2 = vmul.f32 %v4138_v46, %v4088_v56 }
  0xf6   : > { %3251 = vrcp.f32 %v4352_v48  ;;  %v1093_v60 = vsel %vm1090_vm1, %v1092_v59, %v1088_v37  ;;  %v1056_v40 = vadd.f32 %v4185_v16, %v1055_v1  ;;  %vm1057_vm2 = vweird.f32 %v4121_v28 }
  0xf7   : > { %1271 = vmatpush.msrb.mxu2 %v4286_v8  ;;  %1332 = vmatpush.msrb.mxu3 %v1153_v25  ;;  %v1151_v12 = vmul.f32 %v1093_v60, %v4074_v52  ;;  %vm1059_vm3 = vmor %vm1057_vm2, %vm1058_vm15  ;;  %v1064_v32 = vor.u32 1.1754944e-38, %v1063_v19  ;;  %v1026_v9 = vsub.f32 1.0, %v1025_v2  ;;  %v1033_v45 = vand.u32 2147483647, %v4088_v56 }
  0xf8   : > { %v4382_v39 = vpop.eup %3249  ;;  %v1060_v57 = vsel %vm1059_vm3, %v4185_v16, %v1056_v40  ;;  %vm1062_vm4 = vcmp.eq.f32.partialorder %v1061_v7, 8.507059e+37  ;;  %v1035_v18 = vand.u32 2147483648, %v4088_v56  ;;  %v997_v28 = vmul.f32 %v4070_v4, %v4023_v47 }
  0xf9   : > { %1272 = vmatpush.msrb.mxu2 %v1142_v3  ;;  %1333 = vmatpush.msrb.mxu3 %v1151_v12  ;;  %v1065_v52 = vsel %vm1062_vm4, %v1064_v32, %v1060_v57  ;;  %v1027_v8 = vmul.f32 %v4138_v46, %v1026_v9  ;;  %vm1029_vm5 = vweird.f32 %v4088_v56  ;;  %vm1030_vm6 = vweird.f32 %v4138_v46 }
  0xfa   : > { %v1149_v49 = vmul.f32 %v1065_v52, %v4027_v50  ;;  %v998_v61 = vsub.f32 1.0, %v997_v28  ;;  %vm1001_vm7 = vweird.f32 %v4023_v47  ;;  %v1005_v16 = vand.u32 2147483647, %v4023_v47  ;;  %vm1031_vm9 = vmor %vm1029_vm5, %vm1030_vm6 }
  0xfb   : > { %v1028_v38 = vadd.f32 %v4138_v46, %v1027_v8  ;;  %vm1034_vm8 = vcmp.eq.f32.partialorder %v1033_v45, 8.507059e+37  ;;  %v1007_v14 = vand.u32 2147483648, %v4023_v47  ;;  %v969_v29 = vmul.f32 %v4011_v15, %v3978_v35 }
  0xfc   : > { %v4398_v63 = vpop.eup %3251  ;;  %1334 = vmatpush.msrb.mxu3 %v1149_v49  ;;  %v1036_v56 = vor.u32 1.1754944e-38, %v1035_v18  ;;  %v999_v50 = vmul.f32 %v4070_v4, %v998_v61  ;;  %vm1002_vm10 = vweird.f32 %v4070_v4  ;;  %v977_v36 = vand.u32 2147483647, %v3978_v35 }
  0xfd   : > { %v1032_v43 = vsel %vm1031_vm9, %v4138_v46, %v1028_v38  ;;  %v970_v31 = vsub.f32 1.0, %v969_v29  ;;  %vm973_vm11 = vweird.f32 %v3978_v35  ;;  %v979_v44 = vand.u32 2147483648, %v3978_v35  ;;  %vm1003_vm13 = vmor %vm1001_vm7, %vm1002_vm10 }
  0xfe   : > { %v1037_v24 = vsel %vm1034_vm8, %v1036_v56, %v1032_v43  ;;  %v1000_v3 = vadd.f32 %v4070_v4, %v999_v50  ;;  %vm1006_vm12 = vcmp.eq.f32.partialorder %v1005_v16, 8.507059e+37  ;;  %v941_v53 = vmul.f32 %v3975_v34, %v3943_v55 }
  0xff   : > { %v1147_v11 = vmul.f32 %v1037_v24, %v3991_v51  ;;  %v1008_v33 = vor.u32 1.1754944e-38, %v1007_v14  ;;  %v971_v46 = vmul.f32 %v4011_v15, %v970_v31  ;;  %vm974_vm14 = vweird.f32 %v4011_v15 }
 0x100   : > { %v1004_v59 = vsel %vm1003_vm13, %v4070_v4, %v1000_v3  ;;  %vm4415_vm15 = vcmp.eq.f32.partialorder %v977_v36, 8.507059e+37  ;;  %v980_v1 = vor.u32 1.1754944e-38, %v979_v44  ;;  %v942_v7 = vsub.f32 1.0, %v941_v53  ;;  %vm975_vm0 = vmor %vm973_vm11, %vm974_vm14 }
 0x101   : > { %1335 = vmatpush.msrb.mxu3 %v1147_v11  ;;  %v1009_v19 = vsel %vm1006_vm12, %v1008_v33, %v1004_v59  ;;  %v972_v51 = vadd.f32 %v4011_v15, %v971_v46  ;;  %v951_v47 = vand.u32 2147483648, %v3943_v55  ;;  %v913_v25 = vmul.f32 %v4382_v39, %v4333_v58 }
 0x102   : > { %v1145_v37 = vmul.f32 %v1009_v19, %v3960_v10  ;;  %v943_v4 = vmul.f32 %v3975_v34, %v942_v7  ;;  %vm946_vm1 = vweird.f32 %v3975_v34  ;;  %v949_v2 = vand.u32 2147483647, %v3943_v55 }
 0x103   : > { %v976_v60 = vsel %vm975_vm0, %v4011_v15, %v972_v51  ;;  %vm945_vm2 = vweird.f32 %v3943_v55  ;;  %v952_v40 = vor.u32 1.1754944e-38, %v951_v47  ;;  %v914_v12 = vsub.f32 1.0, %v913_v25  ;;  %v7005_v51 = vld [vmem:[#allocation39_spill] sm:$0xff]  ;;  %v7006_v47 = vld [vmem:[#allocation44_spill] sm:$0xff] }
 0x104   : > { %1336 = vmatpush.msrb.mxu3 %v1145_v37  ;;  %v981_v32 = vsel %vm4415_vm15, %v980_v1, %v976_v60  ;;  %v944_v10 = vadd.f32 %v3975_v34, %v943_v4  ;;  %vm918_vm3 = vweird.f32 %v4382_v39  ;;  %v923_v35 = vand.u32 2147483648, %v4333_v58  ;;  %vm947_vm4 = vmor %vm945_vm2, %vm946_vm1 }
 0x105   : > { %v1143_v9 = vmul.f32 %v981_v32, %v3931_v41  ;;  %v915_v45 = vmul.f32 %v4382_v39, %v914_v12  ;;  %v921_v15 = vand.u32 2147483647, %v4333_v58  ;;  %v885_v55 = vmul.f32 %v4346_v20, %v4280_v42 }
 0x106   : > { %v948_v57 = vsel %vm947_vm4, %v3975_v34, %v944_v10  ;;  %vm950_vm5 = vcmp.eq.f32.partialorder %v949_v2, 8.507059e+37  ;;  %vm917_vm6 = vweird.f32 %v4333_v58  ;;  %vm889_vm7 = vweird.f32 %v4280_v42 }
 0x107   : > { %1337 = vmatpush.msrb.mxu3 %v1143_v9  ;;  %v953_v18 = vsel %vm950_vm5, %v952_v40, %v948_v57  ;;  %v916_v28 = vadd.f32 %v4382_v39, %v915_v45  ;;  %v924_v41 = vor.u32 1.1754944e-38, %v923_v35  ;;  %v886_v52 = vsub.f32 1.0, %v885_v55  ;;  %vm919_vm8 = vmor %vm917_vm6, %vm918_vm3  ;;  %v7007_v40 = vld [vmem:[#allocation33_spill] sm:$0xff]  ;;  %v7010_v55 = vld [vmem:[#allocation42_spill] sm:$0xff] }
 0x108   : > { %v1141_v8 = vmul.f32 %v953_v18, %v3918_v23  ;;  %v893_v49 = vand.u32 2147483647, %v4280_v42  ;;  %v895_v34 = vand.u32 2147483648, %v4280_v42  ;;  %v927_v58 = vmul.f32 %v4398_v63, %v4352_v48 }
 0x109   : > { %v920_v61 = vsel %vm919_vm8, %v4382_v39, %v916_v28  ;;  %vm922_vm9 = vcmp.eq.f32.partialorder %v921_v15, 8.507059e+37  ;;  %v887_v16 = vmul.f32 %v4346_v20, %v886_v52  ;;  %vm890_vm10 = vweird.f32 %v4346_v20  ;;  %v7011_v28 = vld [vmem:[#allocation36_spill] sm:$0xff] }
 0x10a   : > { %1338 = vmatpush.msrb.mxu3 %v1141_v8  ;;  %v925_v38 = vsel %vm922_vm9, %v924_v41, %v920_v61  ;;  %v928_v23 = vsub.f32 1.0, %v927_v58  ;;  %vm931_vm11 = vweird.f32 %v4352_v48  ;;  %v935_v14 = vand.u32 2147483647, %v4352_v48  ;;  %vm891_vm12 = vmor %vm889_vm7, %vm890_vm10  ;;  %v7012_v41 = vld [vmem:[#allocation41_spill] sm:$0xff] }
 0x10b   : > { %v1139_v29 = vmul.f32 %v925_v38, %v4192_v54  ;;  %v888_v56 = vadd.f32 %v4346_v20, %v887_v16  ;;  %v937_v50 = vand.u32 2147483648, %v4352_v48  ;;  %v857_v39 = vmul.f32 %v4314_v5, %v4240_v62 }
 0x10c   : > { %vm894_vm13 = vcmp.eq.f32.partialorder %v893_v49, 8.507059e+37  ;;  %v896_v36 = vor.u32 1.1754944e-38, %v895_v34  ;;  %v929_v43 = vmul.f32 %v4398_v63, %v928_v23  ;;  %vm932_vm14 = vweird.f32 %v4398_v63 }
 0x10d   : > { %1339 = vmatpush.msrb.mxu3 %v1139_v29  ;;  %v892_v31 = vsel %vm891_vm12, %v4346_v20, %v888_v56  ;;  %vm4467_vm15 = vcmp.eq.f32.partialorder %v935_v14, 8.507059e+37  ;;  %v858_v44 = vsub.f32 1.0, %v857_v39  ;;  %vm862_vm0 = vweird.f32 %v4314_v5  ;;  %vm933_vm1 = vmor %vm931_vm11, %vm932_vm14  ;;  %v7013_v29 = vld [vmem:[#allocation26_spill] sm:$0xff] }
 0x10e   : > { %v897_v24 = vsel %vm894_vm13, %v896_v36, %v892_v31  ;;  %v930_v42 = vadd.f32 %v4398_v63, %v929_v43  ;;  %v867_v3 = vand.u32 2147483648, %v4240_v62  ;;  %v899_v53 = vmul.f32 %v4367_v22, %v4316_v21 }
 0x10f   : > { %v1137_v11 = vmul.f32 %v897_v24, %v4127_v27  ;;  %v938_v20 = vor.u32 1.1754944e-38, %v937_v50  ;;  %v859_v33 = vmul.f32 %v4314_v5, %v858_v44  ;;  %v865_v46 = vand.u32 2147483647, %v4240_v62 }
 0x110   : > { %v934_v59 = vsel %vm933_vm1, %v4398_v63, %v930_v42  ;;  %vm861_vm2 = vweird.f32 %v4240_v62  ;;  %v868_v13 = vor.u32 1.1754944e-38, %v867_v3  ;;  %v900_v1 = vsub.f32 1.0, %v899_v53 }
 0x111   : > { %1340 = vmatpush.msrb.mxu3 %v1137_v11  ;;  %v939_v7 = vsel %vm4467_vm15, %v938_v20, %v934_v59  ;;  %v860_v27 = vadd.f32 %v4314_v5, %v859_v33  ;;  %vm904_vm3 = vweird.f32 %v4367_v22  ;;  %v909_v48 = vand.u32 2147483648, %v4316_v21  ;;  %vm863_vm4 = vmor %vm861_vm2, %vm862_vm0  ;;  %v7015_v11 = vld [vmem:[#allocation29_spill] sm:$0xff]  ;;  %v7016_v20 = vld [vmem:[#allocation35_spill] sm:$0xff] }
 0x112   : > { %v1140_v19 = vmul.f32 %v939_v7, %v4265_v26  ;;  %v901_v63 = vmul.f32 %v4367_v22, %v900_v1  ;;  %v907_v62 = vand.u32 2147483647, %v4316_v21  ;;  %v829_v25 = vmul.f32 %v7006_v47, %v7005_v51 }
 0x113   : > { %v864_v37 = vsel %vm863_vm4, %v4314_v5, %v860_v27  ;;  %vm866_vm5 = vcmp.eq.f32.partialorder %v865_v46, 8.507059e+37  ;;  %vm903_vm6 = vweird.f32 %v4316_v21  ;;  %vm833_vm7 = vweird.f32 %v7005_v51  ;;  %v7017_v27 = vld [vmem:[#allocation20_spill] sm:$0xff] }
 0x114   : > { %1273 = vmatpush.msrb.mxu2 %v1140_v19  ;;  %v869_v4 = vsel %vm866_vm5, %v868_v13, %v864_v37  ;;  %v902_v26 = vadd.f32 %v4367_v22, %v901_v63  ;;  %v830_v2 = vsub.f32 1.0, %v829_v25  ;;  %v837_v60 = vand.u32 2147483647, %v7005_v51  ;;  %vm905_vm8 = vmor %vm903_vm6, %vm904_vm3 }
 0x115   : > { %v1135_v12 = vmul.f32 %v869_v4, %v7007_v40  ;;  %v910_v32 = vor.u32 1.1754944e-38, %v909_v48  ;;  %v839_v5 = vand.u32 2147483648, %v7005_v51  ;;  %v871_v21 = vmul.f32 %v4331_v17, %v4262_v6  ;;  %v7019_v51 = vld [vmem:[#allocation43_spill] sm:$0xff] }
 0x116   : > { %v906_v10 = vsel %vm905_vm8, %v4367_v22, %v902_v26  ;;  %vm908_vm9 = vcmp.eq.f32.partialorder %v907_v62, 8.507059e+37  ;;  %v831_v35 = vmul.f32 %v7006_v47, %v830_v2  ;;  %vm834_vm10 = vweird.f32 %v7006_v47  ;;  %v7018_v62 = vld [vmem:[#allocation38_spill] sm:$0xff]  ;;  %v7022_v2 = vld [vmem:[#allocation32_spill] sm:$0xff] }
 0x117   : > { %1341 = vmatpush.msrb.mxu3 %v1135_v12  ;;  %v911_v9 = vsel %vm908_vm9, %v910_v32, %v906_v10  ;;  %vm4509_vm11 = vcmp.eq.f32.partialorder %v837_v60, 8.507059e+37  ;;  %v872_v15 = vsub.f32 1.0, %v871_v21  ;;  %vm875_vm12 = vweird.f32 %v4262_v6  ;;  %vm835_vm13 = vmor %vm833_vm7, %vm834_vm10  ;;  %v7023_v12 = vld [vmem:[#allocation19_spill] sm:$0xff] }
 0x118   : > { %v1138_v57 = vmul.f32 %v911_v9, %v7010_v55  ;;  %v832_v18 = vadd.f32 %v7006_v47, %v831_v35  ;;  %v881_v22 = vand.u32 2147483648, %v4262_v6  ;;  %v801_v52 = vmul.f32 %v7012_v41, %v7011_v28  ;;  %v7024_v32 = vld [vmem:[#allocation27_spill] sm:$0xff] }
 0x119   : > { %v840_v8 = vor.u32 1.1754944e-38, %v839_v5  ;;  %v873_v49 = vmul.f32 %v4331_v17, %v872_v15  ;;  %vm876_vm14 = vweird.f32 %v4331_v17  ;;  %v879_v34 = vand.u32 2147483647, %v4262_v6  ;;  %v7014_v6 = vld [vmem:[#allocation37_spill] sm:$0xff] }
 0x11a   : > { %1274 = vmatpush.msrb.mxu2 %v1138_v57  ;;  %v836_v58 = vsel %vm835_vm13, %v7006_v47, %v832_v18  ;;  %v802_v61 = vsub.f32 1.0, %v801_v52  ;;  %vm805_vm15 = vweird.f32 %v7011_v28  ;;  %vm806_vm0 = vweird.f32 %v7012_v41  ;;  %vm877_vm1 = vmor %vm875_vm12, %vm876_vm14  ;;  %v7025_v18 = vld [vmem:[#allocation34_spill] sm:$0xff] }
 0x11b   : > { %v841_v16 = vsel %vm4509_vm11, %v840_v8, %v836_v58  ;;  %v874_v38 = vadd.f32 %v4331_v17, %v873_v49  ;;  %v811_v23 = vand.u32 2147483648, %v7011_v28  ;;  %v843_v14 = vmul.f32 %v4288_v30, %v4229_v0  ;;  %vm807_vm4 = vmor %vm805_vm15, %vm806_vm0 }
 0x11c   : > { %v1133_v56 = vmul.f32 %v841_v16, %v7013_v29  ;;  %v882_v50 = vor.u32 1.1754944e-38, %v881_v22  ;;  %v803_v39 = vmul.f32 %v7012_v41, %v802_v61  ;;  %v809_v36 = vand.u32 2147483647, %v7011_v28  ;;  %v7026_v22 = vld [vmem:[#allocation40_spill] sm:$0xff]  ;;  %v7028_v29 = vld [vmem:[#allocation25_spill] sm:$0xff] }
 0x11d   : > { %v878_v43 = vsel %vm877_vm1, %v4331_v17, %v874_v38  ;;  %vm880_vm2 = vcmp.eq.f32.partialorder %v879_v34, 8.507059e+37  ;;  %v812_v31 = vor.u32 1.1754944e-38, %v811_v23  ;;  %v844_v54 = vsub.f32 1.0, %v843_v14 }
 0x11e   : > { %1342 = vmatpush.msrb.mxu3 %v1133_v56  ;;  %v883_v44 = vsel %vm880_vm2, %v882_v50, %v878_v43  ;;  %v804_v24 = vadd.f32 %v7012_v41, %v803_v39  ;;  %vm848_vm3 = vweird.f32 %v4288_v30  ;;  %v853_v42 = vand.u32 2147483648, %v4229_v0  ;;  %v7030_v43 = vld [vmem:[#allocation16_spill] sm:$0xff] }
 0x11f   : > { %v1136_v3 = vmul.f32 %v883_v44, %v7014_v6  ;;  %v845_v17 = vmul.f32 %v4288_v30, %v844_v54  ;;  %v851_v53 = vand.u32 2147483647, %v4229_v0  ;;  %v773_v33 = vmul.f32 %v7016_v20, %v7015_v11 }
 0x120   : > { %v808_v46 = vsel %vm807_vm4, %v7012_v41, %v804_v24  ;;  %vm810_vm5 = vcmp.eq.f32.partialorder %v809_v36, 8.507059e+37  ;;  %vm847_vm6 = vweird.f32 %v4229_v0  ;;  %vm777_vm7 = vweird.f32 %v7015_v11  ;;  %v7027_v41 = vld [vmem:[#allocation14_spill] sm:$0xff] }
 0x121   : > { %1275 = vmatpush.msrb.mxu2 %v1136_v3  ;;  %v813_v59 = vsel %vm810_vm5, %v812_v31, %v808_v46  ;;  %v846_v13 = vadd.f32 %v4288_v30, %v845_v17  ;;  %v774_v1 = vsub.f32 1.0, %v773_v33  ;;  %v781_v7 = vand.u32 2147483647, %v7015_v11  ;;  %vm849_vm8 = vmor %vm847_vm6, %vm848_vm3  ;;  %v7029_v36 = vld [vmem:[#allocation10_spill] sm:$0xff]  ;;  %v7031_v3 = vld [vmem:[#allocation8_spill] sm:$0xff] }
 0x122   : > { %v1131_v48 = vmul.f32 %v813_v59, %v7017_v27  ;;  %v854_v19 = vor.u32 1.1754944e-38, %v853_v42  ;;  %v783_v63 = vand.u32 2147483648, %v7015_v11  ;;  %v815_v0 = vmul.f32 %v7019_v51, %v7018_v62  ;;  %v7033_v33 = vld [vmem:[#allocation31_spill] sm:$0xff] }
 0x123   : > { %v850_v47 = vsel %vm849_vm8, %v4288_v30, %v846_v13  ;;  %vm852_vm9 = vcmp.eq.f32.partialorder %v851_v53, 8.507059e+37  ;;  %v775_v25 = vmul.f32 %v7016_v20, %v774_v1  ;;  %vm778_vm10 = vweird.f32 %v7016_v20 }
 0x124   : > { %1343 = vmatpush.msrb.mxu3 %v1131_v48  ;;  %v855_v37 = vsel %vm852_vm9, %v854_v19, %v850_v47  ;;  %vm4565_vm11 = vcmp.eq.f32.partialorder %v781_v7, 8.507059e+37  ;;  %v816_v26 = vsub.f32 1.0, %v815_v0  ;;  %vm819_vm12 = vweird.f32 %v7018_v62  ;;  %vm779_vm13 = vmor %vm777_vm7, %vm778_vm10  ;;  %v7034_v48 = vld [vmem:[#allocation18_spill] sm:$0xff] }
 0x125   : > { %v1134_v60 = vmul.f32 %v855_v37, %v7022_v2  ;;  %v776_v40 = vadd.f32 %v7016_v20, %v775_v25  ;;  %v825_v30 = vand.u32 2147483648, %v7018_v62  ;;  %v745_v5 = vmul.f32 %v7024_v32, %v7023_v12  ;;  %v7036_v0 = vld [vmem:[#allocation30_spill] sm:$0xff] }
 0x126   : > { %v784_v21 = vor.u32 1.1754944e-38, %v783_v63  ;;  %v817_v10 = vmul.f32 %v7019_v51, %v816_v26  ;;  %vm820_vm14 = vweird.f32 %v7019_v51  ;;  %v823_v35 = vand.u32 2147483647, %v7018_v62  ;;  %v1159_v26 = vld [vmem:[%s6758_s2 + $0x28] sm:$0xff] }
 0x127   : > { %1276 = vmatpush.msrb.mxu2 %v1134_v60  ;;  %v780_v9 = vsel %vm779_vm13, %v7016_v20, %v776_v40  ;;  %v746_v45 = vsub.f32 1.0, %v745_v5  ;;  %vm749_vm15 = vweird.f32 %v7023_v12  ;;  %vm750_vm0 = vweird.f32 %v7024_v32  ;;  %vm821_vm1 = vmor %vm819_vm12, %vm820_vm14  ;;  %v7032_v20 = vld [vmem:[#allocation24_spill] sm:$0xff] }
 0x128   : > { %v785_v15 = vsel %vm4565_vm11, %v784_v21, %v780_v9  ;;  %v818_v55 = vadd.f32 %v7019_v51, %v817_v10  ;;  %v755_v57 = vand.u32 2147483648, %v7023_v12  ;;  %v787_v28 = vmul.f32 %v7026_v22, %v7025_v18  ;;  %vm751_vm4 = vmor %vm749_vm15, %vm750_vm0  ;;  %v7041_v21 = vld [vmem:[#allocation6_spill] sm:$0xff] }
 0x129   : > { %v1129_v52 = vmul.f32 %v785_v15, %v7027_v41  ;;  %v826_v8 = vor.u32 1.1754944e-38, %v825_v30  ;;  %v747_v49 = vmul.f32 %v7024_v32, %v746_v45  ;;  %v753_v34 = vand.u32 2147483647, %v7023_v12  ;;  %v7039_v12 = vld [vmem:[#allocation17_spill] sm:$0xff] }
 0x12a   : > { %v822_v58 = vsel %vm821_vm1, %v7019_v51, %v818_v55  ;;  %vm824_vm2 = vcmp.eq.f32.partialorder %v823_v35, 8.507059e+37  ;;  %v756_v61 = vor.u32 1.1754944e-38, %v755_v57  ;;  %v788_v16 = vsub.f32 1.0, %v787_v28  ;;  %v7035_v51 = vld [vmem:[#allocation22_spill] sm:$0xff] }
 0x12b   : > { %1344 = vmatpush.msrb.mxu3 %v1129_v52  ;;  %v827_v38 = vsel %vm824_vm2, %v826_v8, %v822_v58  ;;  %v748_v23 = vadd.f32 %v7024_v32, %v747_v49  ;;  %vm792_vm3 = vweird.f32 %v7026_v22  ;;  %v797_v14 = vand.u32 2147483648, %v7025_v18  ;;  %v7042_v52 = vld [vmem:[#allocation13_spill] sm:$0xff]  ;;  %v7044_v58 = vld [vmem:[#allocation15_spill] sm:$0xff] }
 0x12c   : > { %v1132_v56 = vmul.f32 %v827_v38, %v7028_v29  ;;  %v789_v50 = vmul.f32 %v7026_v22, %v788_v16  ;;  %v795_v39 = vand.u32 2147483647, %v7025_v18  ;;  %v717_v31 = vmul.f32 %v7030_v43, %v7029_v36  ;;  %v7045_v29 = vld [vmem:[#allocation12_spill] sm:$0xff] }
 0x12d   : > { %v752_v54 = vsel %vm751_vm4, %v7024_v32, %v748_v23  ;;  %vm754_vm5 = vcmp.eq.f32.partialorder %v753_v34, 8.507059e+37  ;;  %vm791_vm6 = vweird.f32 %v7025_v18  ;;  %vm721_vm7 = vweird.f32 %v7029_v36  ;;  %v7040_v32 = vld [vmem:[#allocation23_spill] sm:$0xff]  ;;  %v7043_v34 = vld [vmem:[#allocation9_spill] sm:$0xff] }
 0x12e   : > { %1277 = vmatpush.msrb.mxu2 %v1132_v56  ;;  %v757_v44 = vsel %vm754_vm5, %v756_v61, %v752_v54  ;;  %v790_v24 = vadd.f32 %v7026_v22, %v789_v50  ;;  %v798_v42 = vor.u32 1.1754944e-38, %v797_v14  ;;  %v718_v6 = vsub.f32 1.0, %v717_v31  ;;  %vm793_vm8 = vmor %vm791_vm6, %vm792_vm3  ;;  %v1154_v50 = vld [vmem:[%s6758_s2] sm:$0xff]  ;;  %v7047_v31 = vld [vmem:[#allocation28_spill] sm:$0xff] }
 0x12f   : > { %v1127_v17 = vmul.f32 %v757_v44, %v7031_v3  ;;  %v725_v53 = vand.u32 2147483647, %v7029_v36  ;;  %v727_v11 = vand.u32 2147483648, %v7029_v36  ;;  %v759_v46 = vmul.f32 %v7033_v33, %v7032_v20 }
 0x130   : > { %v794_v59 = vsel %vm793_vm8, %v7026_v22, %v790_v24  ;;  %vm796_vm9 = vcmp.eq.f32.partialorder %v795_v39, 8.507059e+37  ;;  %v719_v13 = vmul.f32 %v7030_v43, %v718_v6  ;;  %vm722_vm10 = vweird.f32 %v7030_v43 }
 0x131   : > { %1345 = vmatpush.msrb.mxu3 %v1127_v17  ;;  %v799_v1 = vsel %vm796_vm9, %v798_v42, %v794_v59  ;;  %v760_v7 = vsub.f32 1.0, %v759_v46  ;;  %vm763_vm11 = vweird.f32 %v7032_v20  ;;  %v767_v27 = vand.u32 2147483647, %v7032_v20  ;;  %vm723_vm12 = vmor %vm721_vm7, %vm722_vm10  ;;  %v7048_v17 = vld [vmem:[#allocation7_spill] sm:$0xff] }
 0x132   : > { %v1130_v19 = vmul.f32 %v799_v1, %v7034_v48  ;;  %v720_v63 = vadd.f32 %v7030_v43, %v719_v13  ;;  %v769_v62 = vand.u32 2147483648, %v7032_v20  ;;  %v689_v47 = vmul.f32 %v7036_v0, %v7035_v51 }
 0x133   : > { %vm726_vm13 = vcmp.eq.f32.partialorder %v725_v53, 8.507059e+37  ;;  %v728_v25 = vor.u32 1.1754944e-38, %v727_v11  ;;  %v761_v37 = vmul.f32 %v7033_v33, %v760_v7  ;;  %vm764_vm14 = vweird.f32 %v7033_v33 }
 0x134   : > { %1278 = vmatpush.msrb.mxu2 %v1130_v19  ;;  %v724_v4 = vsel %vm723_vm12, %v7030_v43, %v720_v63  ;;  %vm4633_vm15 = vcmp.eq.f32.partialorder %v767_v27, 8.507059e+37  ;;  %v690_v2 = vsub.f32 1.0, %v689_v47  ;;  %vm694_vm0 = vweird.f32 %v7036_v0  ;;  %vm765_vm1 = vmor %vm763_vm11, %vm764_vm14  ;;  %v7046_v43 = vld [vmem:[#allocation21_spill] sm:$0xff] }
 0x135   : > { %v729_v60 = vsel %vm726_vm13, %v728_v25, %v724_v4  ;;  %v762_v40 = vadd.f32 %v7033_v33, %v761_v37  ;;  %v699_v30 = vand.u32 2147483648, %v7035_v51  ;;  %v731_v5 = vmul.f32 %v7040_v32, %v7039_v12  ;;  %v7049_v27 = vld [vmem:[#allocation5_spill] sm:$0xff]  ;;  %v1157_v37 = vld [vmem:[%s6758_s2 + $0x18] sm:$0xff]  ;;  %v1158_v4 = vld [vmem:[%s6758_s2 + $0x20] sm:$0xff] }
 0x136   : > { %v1125_v10 = vmul.f32 %v729_v60, %v7041_v21  ;;  %v770_v35 = vor.u32 1.1754944e-38, %v769_v62  ;;  %v691_v9 = vmul.f32 %v7036_v0, %v690_v2  ;;  %v697_v45 = vand.u32 2147483647, %v7035_v51  ;;  %v1155_v62 = vld [vmem:[%s6758_s2 + $0x8] sm:$0xff]  ;;  %v1156_v25 = vld [vmem:[%s6758_s2 + $0x10] sm:$0xff]  ;;  %v1161_v60 = vld [vmem:[%s6758_s2 + $0x38] sm:$0xff] }
 0x137   : > { %v766_v15 = vsel %vm765_vm1, %v7033_v33, %v762_v40  ;;  %vm693_vm2 = vweird.f32 %v7035_v51  ;;  %v700_v55 = vor.u32 1.1754944e-38, %v699_v30  ;;  %v732_v57 = vsub.f32 1.0, %v731_v5  ;;  %v1160_v2 = vld [vmem:[%s6758_s2 + $0x30] sm:$0xff]  ;;  %v1162_v40 = vld [vmem:[%s6758_s2 + $0x40] sm:$0xff]  ;;  %v1163_v30 = vld [vmem:[%s6758_s2 + $0x48] sm:$0xff] }
 0x138   : > { %1346 = vmatpush.msrb.mxu3 %v1125_v10  ;;  %v771_v18 = vsel %vm4633_vm15, %v770_v35, %v766_v15  ;;  %v692_v22 = vadd.f32 %v7036_v0, %v691_v9  ;;  %v739_v28 = vand.u32 2147483647, %v7039_v12  ;;  %v741_v41 = vand.u32 2147483648, %v7039_v12  ;;  %vm695_vm3 = vmor %vm693_vm2, %vm694_vm0  ;;  %v1166_v5 = vld [vmem:[%s6758_s2 + $0x60] sm:$0xff]  ;;  %v1167_v21 = vld [vmem:[%s6758_s2 + $0x68] sm:$0xff] }
 0x139   : > { %v1128_v8 = vmul.f32 %v771_v18, %v7042_v52  ;;  %v733_v49 = vmul.f32 %v7040_v32, %v732_v57  ;;  %vm736_vm4 = vweird.f32 %v7040_v32  ;;  %v703_v61 = vmul.f32 %v7044_v58, %v7043_v34  ;;  %v1168_v10 = vld [vmem:[%s6758_s2 + $0x70] sm:$0xff]  ;;  %v1169_v35 = vld [vmem:[%s6758_s2 + $0x78] sm:$0xff]  ;;  %v4737_v18 = vpop.permute.xlu0 %1254 }
 0x13a   : > { %v696_v16 = vsel %vm695_vm3, %v7036_v0, %v692_v22  ;;  %vm698_vm5 = vcmp.eq.f32.partialorder %v697_v45, 8.507059e+37  ;;  %vm735_vm6 = vweird.f32 %v7039_v12  ;;  %vm740_vm7 = vcmp.eq.f32.partialorder %v739_v28, 8.507059e+37  ;;  %v7050_v0 = vld [vmem:[#allocation11_spill] sm:$0xff]  ;;  %v1164_v12 = vld [vmem:[%s6758_s2 + $0x50] sm:$0xff]  ;;  %v4733_v45 = vpop.permute.xlu1 %1264 }
 0x13b   : > { %1279 = vmatpush.msrb.mxu2 %v1128_v8  ;;  %v701_v38 = vsel %vm698_vm5, %v700_v55, %v696_v16  ;;  %v734_v23 = vadd.f32 %v7040_v32, %v733_v49  ;;  %v704_v14 = vsub.f32 1.0, %v703_v61  ;;  %vm737_vm8 = vmor %vm735_vm6, %vm736_vm4  ;;  %v742_v39 = vor.u32 1.1754944e-38, %v741_v41  ;;  %v4739_v41 = vpop.permute.xlu2 %1259 }
 0x13c   : > { %v1123_v56 = vmul.f32 %v701_v38, %v7045_v29  ;;  %v713_v36 = vand.u32 2147483648, %v7043_v34  ;;  %v675_v54 = vmul.f32 %v7047_v31, %v7046_v43  ;;  %vm708_vm9 = vweird.f32 %v7044_v58 }
 0x13d   : > { %v738_v44 = vsel %vm737_vm8, %v7040_v32, %v734_v23  ;;  %v705_v24 = vmul.f32 %v7044_v58, %v704_v14  ;;  %v711_v42 = vand.u32 2147483647, %v7043_v34  ;;  %vm707_vm10 = vweird.f32 %v7043_v34  ;;  %v1165_v32 = vld [vmem:[%s6758_s2 + $0x58] sm:$0xff] }
 0x13e   : > { %1347 = vmatpush.msrb.mxu3 %v1123_v56  ;;  %v743_v6 = vsel %vm740_vm7, %v742_v39, %v738_v44  ;;  %v676_v3 = vsub.f32 1.0, %v675_v54  ;;  %v685_v20 = vand.u32 2147483648, %v7046_v43  ;;  %vm709_vm11 = vmor %vm707_vm10, %vm708_vm9  ;;  %v714_v33 = vor.u32 1.1754944e-38, %v713_v36 }
 0x13f   : > { %1348 = vmatmul.f32.vlgmr.msrb.gmra.mxu3 %v1154_v50  ;;  %v1126_v53 = vmul.f32 %v743_v6, %v7048_v17  ;;  %v706_v11 = vadd.f32 %v7044_v58, %v705_v24  ;;  %vm680_vm12 = vweird.f32 %v7047_v31  ;;  %v683_v59 = vand.u32 2147483647, %v7046_v43 }
 0x140   : > { %v677_v46 = vmul.f32 %v7047_v31, %v676_v3  ;;  %vm712_vm13 = vcmp.eq.f32.partialorder %v711_v42, 8.507059e+37  ;;  %vm679_vm14 = vweird.f32 %v7046_v43  ;;  %v686_v19 = vor.u32 1.1754944e-38, %v685_v20 }
 0x141   : > { %1280 = vmatpush.msrb.mxu2 %v1126_v53  ;;  %v710_v13 = vsel %vm709_vm11, %v7044_v58, %v706_v11  ;;  %vm681_vm15 = vmor %vm679_vm14, %vm680_vm12  ;;  %vm684_vm0 = vcmp.eq.f32.partialorder %v683_v59, 8.507059e+37  ;;  %v4743_v8 = vpop.permute.xlu0 %1239 }
 0x142   : > { %v715_v1 = vsel %vm712_vm13, %v714_v33, %v710_v13  ;;  %v678_v7 = vadd.f32 %v7047_v31, %v677_v46  ;;  %v4735_v57 = vpop.permute.xlu1 %1249 }
 0x143   : > { %v1124_v48 = vmul.f32 %v715_v1, %v7049_v27  ;;  %v4745_v58 = vpop.permute.xlu2 %1244 }
 0x144   : > { %v682_v63 = vsel %vm681_vm15, %v7047_v31, %v678_v7 }
 0x145   : > { %1281 = vmatpush.msrb.mxu2 %v1124_v48  ;;  %v687_v51 = vsel %vm684_vm0, %v686_v19, %v682_v63 }
 0x146   : > { %v1122_v47 = vmul.f32 %v687_v51, %v7050_v0 }
 0x147   : > { %1351 = vmatmul.f32.gmra.mxu3 %v1155_v62 }
 0x148   : > { %1282 = vmatpush.msrb.mxu2 %v1122_v47 }
 0x149   : > { %1283 = vmatmul.f32.vlgmr.msrb.gmra.mxu2 %v1154_v50  ;;  %v4749_v38 = vpop.permute.xlu0 %1224 }
 0x14a   : > { %v4741_v52 = vpop.permute.xlu1 %1234 }
 0x14b   : > { %v4751_v29 = vpop.permute.xlu2 %1229 }
 0x14f   : > { %1354 = vmatmul.f32.gmra.mxu3 %v1156_v25 }
 0x151   : > { %1286 = vmatmul.f32.gmra.mxu2 %v1155_v62  ;;  %v1210_v39 = vpop.permute.xlu0 %1209 }
 0x152   : > { %v4747_v61 = vpop.permute.xlu1 %1219 }
 0x153   : > { %v1215_v31 = vpop.permute.xlu2 %1214 }
 0x157   : > { %1357 = vmatmul.f32.gmra.mxu3 %v1157_v37 }
 0x159   : > { %1289 = vmatmul.f32.gmra.mxu2 %v1156_v25  ;;  %v1195_v24 = vpop.permute.xlu0 %1194 }
 0x15a   : > { %v1205_v56 = vpop.permute.xlu1 %1204 }
 0x15b   : > { %v1200_v46 = vpop.permute.xlu2 %1199 }
 0x15f   : > { %1360 = vmatmul.f32.gmra.mxu3 %v1158_v4 }
 0x161   : > { %1292 = vmatmul.f32.gmra.mxu2 %v1157_v37 }
 0x162   : > { %v1190_v54 = vpop.permute.xlu1 %1189 }
 0x167   : > { %1363 = vmatmul.f32.gmra.mxu3 %v1159_v26 }
 0x169   : > { %1295 = vmatmul.f32.gmra.mxu2 %v1158_v4 }
 0x16f   : > { %1366 = vmatmul.f32.gmra.mxu3 %v1160_v2 }
 0x171   : > { %1298 = vmatmul.f32.gmra.mxu2 %v1159_v26 }
 0x177   : > { %1369 = vmatmul.f32.gmra.mxu3 %v1161_v60 }
 0x179   : > { %1301 = vmatmul.f32.gmra.mxu2 %v1160_v2 }
 0x17f   : > { %1372 = vmatmul.f32.gmra.mxu3 %v1162_v40 }
 0x181   : > { %1304 = vmatmul.f32.gmra.mxu2 %v1161_v60 }
 0x187   : > { %1375 = vmatmul.f32.gmra.mxu3 %v1163_v30 }
 0x189   : > { %1307 = vmatmul.f32.gmra.mxu2 %v1162_v40 }
 0x18f   : > { %1378 = vmatmul.f32.gmra.mxu3 %v1164_v12 }
 0x191   : > { %1310 = vmatmul.f32.gmra.mxu2 %v1163_v30 }
 0x197   : > { %1381 = vmatmul.f32.gmra.mxu3 %v1165_v32 }
 0x199   : > { %1313 = vmatmul.f32.gmra.mxu2 %v1164_v12 }
 0x19f   : > { %1384 = vmatmul.f32.gmra.mxu3 %v1166_v5 }
 0x1a1   : > { %1316 = vmatmul.f32.gmra.mxu2 %v1165_v32 }
 0x1a7   : > { %1387 = vmatmul.f32.gmra.mxu3 %v1167_v21 }
 0x1a9   : > { %1319 = vmatmul.f32.gmra.mxu2 %v1166_v5 }
 0x1af   : > { %1390 = vmatmul.f32.gmra.mxu3 %v1168_v10 }
 0x1b1   : > { %1322 = vmatmul.f32.gmra.mxu2 %v1167_v21 }
 0x1b7   : > { %1393 = vmatmul.f32.gmra.mxu3 %v1169_v35 }
 0x1b9   : > { %1325 = vmatmul.f32.gmra.mxu2 %v1168_v10 }
 0x1c1   : > { %1328 = vmatmul.f32.gmra.mxu2 %v1169_v35 }
 0x1c2   : > { %v1349_v9 = vpop.f32.mrf.mxu3 }
 0x1c3   : > { %v4753_v44 = vadd.f32 %v1349_v9, %v1190_v54 }
 0x1c5   : > { %7051 = vst [vmem:[#allocation39_spill] sm:$0xff] %v4753_v44  ;;  %v1398_v17 = vsub.f32 0.0, %v4753_v44 }
 0x1c7   : > { %v1431_v33 = vmul.f32 1.442695, %v1398_v17 }
 0x1c9   : > { %3253 = vpow2.f32 %v1431_v33 }
 0x1ca   : > { %v1352_v15 = vpop.f32.mrf.mxu3 }
 0x1cb   : > { %v4755_v42 = vadd.f32 %v1352_v15, %v1195_v24 }
 0x1cc   : > { %v1284_v55 = vpop.f32.mrf.mxu2 }
 0x1cd   : > { %7052 = vst [vmem:[#allocation44_spill] sm:$0xff] %v4755_v42  ;;  %v4757_v6 = vadd.f32 %v1284_v55, %v1190_v54  ;;  %v1400_v11 = vsub.f32 0.0, %v4755_v42 }
 0x1cf   : > { %7053 = vst [vmem:[#allocation33_spill] sm:$0xff] %v4757_v6  ;;  %v1397_v20 = vsub.f32 0.0, %v4757_v6  ;;  %v1435_v59 = vmul.f32 1.442695, %v1400_v11  ;;  %v3254_v25 = vpop.eup %3253 }
 0x1d0   : > { %v4786_v21 = vadd.f32 1.0, %v3254_v25 }
 0x1d1   : > { %v1429_v1 = vmul.f32 1.442695, %v1397_v20  ;;  %3255 = vpow2.f32 %v1435_v59 }
 0x1d2   : > { %v1355_v22 = vpop.f32.mrf.mxu3  ;;  %7062 = vst [vmem:[#allocation38_spill] sm:$0xff] %v4786_v21 }
 0x1d3   : > { %v4762_v13 = vadd.f32 %v1355_v22, %v1200_v46  ;;  %3257 = vpow2.f32 %v1429_v1 }
 0x1d4   : > { %v1287_v28 = vpop.f32.mrf.mxu2 }
 0x1d5   : > { %7054 = vst [vmem:[#allocation42_spill] sm:$0xff] %v4762_v13  ;;  %v4764_v7 = vadd.f32 %v1287_v28, %v1195_v24  ;;  %v1402_v63 = vsub.f32 0.0, %v4762_v13 }
 0x1d7   : > { %7055 = vst [vmem:[#allocation36_spill] sm:$0xff] %v4764_v7  ;;  %v1399_v51 = vsub.f32 0.0, %v4764_v7  ;;  %v1439_v37 = vmul.f32 1.442695, %v1402_v63  ;;  %v3256_v30 = vpop.eup %3255 }
 0x1d8   : > { %v4797_v28 = vadd.f32 1.0, %v3256_v30 }
 0x1d9   : > { %v1433_v2 = vmul.f32 1.442695, %v1399_v51  ;;  %v3258_v5 = vpop.eup %3257  ;;  %3259 = vpow2.f32 %v1439_v37 }
 0x1da   : > { %v1358_v49 = vpop.f32.mrf.mxu3  ;;  %7065 = vst [vmem:[#allocation19_spill] sm:$0xff] %v4797_v28 }
 0x1db   : > { %v4766_v48 = vadd.f32 %v1358_v49, %v1205_v56  ;;  %3261 = vpow2.f32 %v1433_v2 }
 0x1dc   : > { %v1290_v34 = vpop.f32.mrf.mxu2 }
 0x1dd   : > { %7056 = vst [vmem:[#allocation41_spill] sm:$0xff] %v4766_v48  ;;  %v4771_v62 = vadd.f32 %v1290_v34, %v1200_v46  ;;  %v1404_v0 = vsub.f32 0.0, %v4766_v48  ;;  %v4800_v34 = vadd.f32 1.0, %v3258_v5 }
 0x1df   : > { %7057 = vst [vmem:[#allocation26_spill] sm:$0xff] %v4771_v62  ;;  %v1401_v4 = vsub.f32 0.0, %v4771_v62  ;;  %v1443_v12 = vmul.f32 1.442695, %v1404_v0 }
 0x1e0   : > { %7066 = vst [vmem:[#allocation27_spill] sm:$0xff] %v4800_v34 }
 0x1e1   : > { %v1437_v15 = vmul.f32 1.442695, %v1401_v4  ;;  %3263 = vpow2.f32 %v1443_v12 }
 0x1e2   : > { %v1361_v16 = vpop.f32.mrf.mxu3  ;;  %3265 = vrcp.f32 %v4786_v21 }
 0x1e3   : > { %v4775_v47 = vadd.f32 %v1361_v16, %v1210_v39  ;;  %3267 = vpow2.f32 %v1437_v15 }
 0x1e4   : > { %v1293_v23 = vpop.f32.mrf.mxu2  ;;  %3269 = vrcp.f32 %v4797_v28 }
 0x1e5   : > { %7058 = vst [vmem:[#allocation37_spill] sm:$0xff] %v4775_v47  ;;  %v4778_v26 = vadd.f32 %v1293_v23, %v1205_v56  ;;  %v1406_v10 = vsub.f32 0.0, %v4775_v47  ;;  %3271 = vrcp.f32 %v4800_v34 }
 0x1e7   : > { %7059 = vst [vmem:[#allocation29_spill] sm:$0xff] %v4778_v26  ;;  %v1403_v55 = vsub.f32 0.0, %v4778_v26  ;;  %v1447_v23 = vmul.f32 1.442695, %v1406_v10 }
 0x1e9   : > { %v1441_v56 = vmul.f32 1.442695, %v1403_v55  ;;  %3273 = vpow2.f32 %v1447_v23 }
 0x1ea   : > { %v1364_v14 = vpop.f32.mrf.mxu3 }
 0x1eb   : > { %v4780_v60 = vadd.f32 %v1364_v14, %v1215_v31  ;;  %3275 = vpow2.f32 %v1441_v56 }
 0x1ec   : > { %v1296_v50 = vpop.f32.mrf.mxu2 }
 0x1ed   : > { %7060 = vst [vmem:[#allocation35_spill] sm:$0xff] %v4780_v60  ;;  %v4784_v32 = vadd.f32 %v1296_v50, %v1210_v39  ;;  %v1408_v49 = vsub.f32 0.0, %v4780_v60 }
 0x1ef   : > { %7061 = vst [vmem:[#allocation20_spill] sm:$0xff] %v4784_v32  ;;  %v1405_v16 = vsub.f32 0.0, %v4784_v32 }
 0x1f1   : > { %v1445_v54 = vmul.f32 1.442695, %v1405_v16 }
 0x1f2   : > { %v1367_v36 = vpop.f32.mrf.mxu3 }
 0x1f3   : > { %v4790_v35 = vadd.f32 %v1367_v36, %v4747_v61  ;;  %v1451_v36 = vmul.f32 1.442695, %v1408_v49 }
 0x1f4   : > { %v1299_v43 = vpop.f32.mrf.mxu2 }
 0x1f5   : > { %7063 = vst [vmem:[#allocation43_spill] sm:$0xff] %v4790_v35  ;;  %v4795_v22 = vadd.f32 %v1299_v43, %v1215_v31  ;;  %v1410_v14 = vsub.f32 0.0, %v4790_v35  ;;  %v3260_v31 = vpop.eup %3259  ;;  %3277 = vpow2.f32 %v1451_v36 }
 0x1f6   : > { %v3262_v17 = vpop.eup %3261  ;;  %v4822_v63 = vadd.f32 1.0, %v3260_v31  ;;  %3279 = vpow2.f32 %v1445_v54 }
 0x1f7   : > { %7064 = vst [vmem:[#allocation32_spill] sm:$0xff] %v4795_v22  ;;  %v1407_v50 = vsub.f32 0.0, %v4795_v22  ;;  %v1455_v11 = vmul.f32 1.442695, %v1410_v14  ;;  %v3264_v33 = vpop.eup %3263 }
 0x1f8   : > { %v4820_v1 = vpop.eup %3265  ;;  %7070 = vst [vmem:[#allocation25_spill] sm:$0xff] %v4822_v63 }
 0x1f9   : > { %v1449_v46 = vmul.f32 1.442695, %v1407_v50  ;;  %7069 = vst [vmem:[#allocation14_spill] sm:$0xff] %v4820_v1  ;;  %v3268_v51 = vpop.eup %3267  ;;  %3281 = vpow2.f32 %v1455_v11 }
 0x1fa   : > { %v1370_v3 = vpop.f32.mrf.mxu3  ;;  %v4827_v0 = vpop.eup %3269  ;;  %v4835_v30 = vadd.f32 1.0, %v3268_v51 }
 0x1fb   : > { %v4807_v39 = vadd.f32 %v1370_v3, %v4749_v38  ;;  %7072 = vst [vmem:[#allocation16_spill] sm:$0xff] %v4827_v0  ;;  %v4832_v37 = vpop.eup %3271  ;;  %3283 = vpow2.f32 %v1449_v46 }
 0x1fc   : > { %v1302_v53 = vpop.f32.mrf.mxu2  ;;  %7074 = vst [vmem:[#allocation24_spill] sm:$0xff] %v4832_v37  ;;  %v3274_v2 = vpop.eup %3273  ;;  %3285 = vrcp.f32 %v4822_v63 }
 0x1fd   : > { %7067 = vst [vmem:[#allocation34_spill] sm:$0xff] %v4807_v39  ;;  %v4814_v24 = vadd.f32 %v1302_v53, %v4747_v61  ;;  %v1412_v59 = vsub.f32 0.0, %v4807_v39  ;;  %v4824_v61 = vadd.f32 1.0, %v3262_v17  ;;  %v3276_v5 = vpop.eup %3275  ;;  %v4847_v56 = vadd.f32 1.0, %v3274_v2 }
 0x1fe   : > { %7075 = vst [vmem:[#allocation31_spill] sm:$0xff] %v4835_v30  ;;  %v3278_v55 = vpop.eup %3277 }
 0x1ff   : > { %7068 = vst [vmem:[#allocation40_spill] sm:$0xff] %v4814_v24  ;;  %v1409_v53 = vsub.f32 0.0, %v4814_v24  ;;  %v1459_v4 = vmul.f32 1.442695, %v1412_v59  ;;  %3287 = vrcp.f32 %v4824_v61  ;;  %v3280_v14 = vpop.eup %3279  ;;  %v4856_v31 = vadd.f32 1.0, %v3278_v55 }
 0x200   : > { %7071 = vst [vmem:[#allocation10_spill] sm:$0xff] %v4824_v61  ;;  %v3282_v36 = vpop.eup %3281  ;;  %v4861_v17 = vadd.f32 1.0, %v3280_v14 }
 0x201   : > { %v1453_v10 = vmul.f32 1.442695, %v1409_v53  ;;  %7077 = vst [vmem:[#allocation22_spill] sm:$0xff] %v4847_v56 }
 0x202   : > { %v1373_v27 = vpop.f32.mrf.mxu3  ;;  %7080 = vst [vmem:[#allocation23_spill] sm:$0xff] %v4856_v31 }
 0x203   : > { %v4817_v20 = vadd.f32 %v1373_v27, %v4751_v29  ;;  %v4829_v27 = vadd.f32 1.0, %v3264_v33  ;;  %7082 = vst [vmem:[#allocation13_spill] sm:$0xff] %v4861_v17 }
 0x204   : > { %v4768_v19 = vpop.f32.mrf.mxu2 }
 0x205   : > { %7073 = vst [vmem:[#allocation8_spill] sm:$0xff] %v4829_v27  ;;  %v1414_v25 = vsub.f32 0.0, %v4817_v20  ;;  %v4840_v15 = vadd.f32 %v4768_v19, %v4749_v38  ;;  %3289 = vrcp.f32 %v4829_v27  ;;  %v4854_v38 = vadd.f32 1.0, %v3276_v5  ;;  %v3284_v19 = vpop.eup %3283 }
 0x206   : > { %3291 = vpow2.f32 %v1459_v4  ;;  %v4859_v54 = vpop.eup %3285  ;;  %v4873_v59 = vadd.f32 1.0, %v3284_v19 }
 0x207   : > { %7076 = vst [vmem:[#allocation18_spill] sm:$0xff] %v4840_v15  ;;  %v1463_v49 = vmul.f32 1.442695, %v1414_v25  ;;  %3293 = vrcp.f32 %v4835_v30 }
 0x208   : > { %7079 = vst [vmem:[#allocation17_spill] sm:$0xff] %v4854_v38  ;;  %3295 = vpow2.f32 %v1453_v10 }
 0x209   : > { %7081 = vst [vmem:[#allocation6_spill] sm:$0xff] %v4859_v54  ;;  %3297 = vpow2.f32 %v1463_v49 }
 0x20a   : > { %v4782_v40 = vpop.f32.mrf.mxu3  ;;  %3299 = vrcp.f32 %v4847_v56  ;;  %7085 = vst [vmem:[#allocation12_spill] sm:$0xff] %v4873_v59 }
 0x20b   : > { %v4845_v16 = vadd.f32 %v4782_v40, %v4741_v52  ;;  %v1411_v40 = vsub.f32 0.0, %v4840_v15  ;;  %3301 = vrcp.f32 %v4854_v38 }
 0x20c   : > { %v4792_v9 = vpop.f32.mrf.mxu2  ;;  %3303 = vrcp.f32 %v4856_v31 }
 0x20d   : > { %v4851_v50 = vadd.f32 %v4792_v9, %v4751_v29  ;;  %v1416_v11 = vsub.f32 0.0, %v4845_v16  ;;  %v4864_v29 = vpop.eup %3287  ;;  %v4867_v9 = vadd.f32 1.0, %v3282_v36  ;;  %v1457_v4 = vmul.f32 1.442695, %v1411_v40 }
 0x20e   : > { %7083 = vst [vmem:[#allocation9_spill] sm:$0xff] %v4864_v29  ;;  %v4870_v46 = vpop.eup %3289  ;;  %3305 = vrcp.f32 %v4861_v17 }
 0x20f   : > { %7078 = vst [vmem:[#allocation30_spill] sm:$0xff] %v4851_v50  ;;  %v1413_v33 = vsub.f32 0.0, %v4851_v50  ;;  %v3292_v25 = vpop.eup %3291  ;;  %v1467_v10 = vmul.f32 1.442695, %v1416_v11  ;;  %3307 = vrcp.f32 %v4867_v9 }
 0x210   : > { %7084 = vst [vmem:[#allocation15_spill] sm:$0xff] %v4870_v46  ;;  %v4883_v5 = vpop.eup %3293  ;;  %3309 = vrcp.f32 %v4873_v59  ;;  %v4891_v19 = vadd.f32 1.0, %v3292_v25 }
 0x211   : > { %7087 = vst [vmem:[#allocation28_spill] sm:$0xff] %v4883_v5  ;;  %v3296_v14 = vpop.eup %3295  ;;  %3311 = vpow2.f32 %v1457_v4 }
 0x212   : > { %v4810_v43 = vpop.f32.mrf.mxu3  ;;  %v3298_v36 = vpop.eup %3297  ;;  %3313 = vpow2.f32 %v1467_v10 }
 0x213   : > { %v4877_v51 = vadd.f32 %v4810_v43, %v4743_v8  ;;  %v1461_v43 = vmul.f32 1.442695, %v1413_v33  ;;  %v4897_v40 = vpop.eup %3299  ;;  %v4905_v33 = vadd.f32 1.0, %v3296_v14  ;;  %v4910_v62 = vadd.f32 1.0, %v3298_v36 }
 0x214   : > { %v1311_v3 = vpop.f32.mrf.mxu2  ;;  %7088 = vst [vmem:[#allocation7_spill] sm:$0xff] %v4897_v40  ;;  %v4903_v6 = vpop.eup %3301 }
 0x215   : > { %v4881_v2 = vadd.f32 %v1311_v3, %v4741_v52  ;;  %v1418_v52 = vsub.f32 0.0, %v4877_v51  ;;  %7089 = vst [vmem:[#allocation5_spill] sm:$0xff] %v4903_v6  ;;  %v4908_v7 = vpop.eup %3303  ;;  %3315 = vpow2.f32 %v1461_v43 }
 0x216   : > { %7090 = vst [vmem:[#allocation11_spill] sm:$0xff] %v4905_v33  ;;  %3317 = vrcp.f32 %v4891_v19 }
 0x217   : > { %7086 = vst [vmem:[#allocation21_spill] sm:$0xff] %v4881_v2  ;;  %v1471_v4 = vmul.f32 1.442695, %v1418_v52  ;;  %3319 = vrcp.f32 %v4905_v33 }
 0x218   : > { %7091 = vst [vmem:[#allocation45_spill] sm:$0xff] %v4908_v7  ;;  %3321 = vrcp.f32 %v4910_v62 }
 0x219   : > { %3323 = vpow2.f32 %v1471_v4 }
 0x21a   : > { %v1382_v12 = vpop.f32.mrf.mxu3 }
 0x21b   : > { %v4887_v55 = vadd.f32 %v1382_v12, %v4745_v58  ;;  %v1415_v12 = vsub.f32 0.0, %v4881_v2 }
 0x21c   : > { %v1314_v23 = vpop.f32.mrf.mxu2 }
 0x21d   : > { %v4901_v11 = vadd.f32 %v1314_v23, %v4743_v8  ;;  %v1420_v25 = vsub.f32 0.0, %v4887_v55  ;;  %v1465_v14 = vmul.f32 1.442695, %v1415_v12 }
 0x21f   : > { %v1417_v10 = vsub.f32 0.0, %v4901_v11  ;;  %v1475_v34 = vmul.f32 1.442695, %v1420_v25  ;;  %3325 = vpow2.f32 %v1465_v14 }
 0x221   : > { %3327 = vpow2.f32 %v1475_v34 }
 0x222   : > { %v1385_v53 = vpop.f32.mrf.mxu3 }
 0x223   : > { %v4895_v3 = vadd.f32 %v1385_v53, %v4735_v57  ;;  %v4912_v53 = vpop.eup %3305 }
 0x224   : > { %v1317_v49 = vpop.f32.mrf.mxu2  ;;  %7092 = vst [vmem:[#allocation46_spill] sm:$0xff] %v4912_v53  ;;  %v4916_v44 = vpop.eup %3307 }
 0x225   : > { %v1422_v8 = vsub.f32 0.0, %v4895_v3  ;;  %v4920_v37 = vadd.f32 %v1317_v49, %v4745_v58  ;;  %v4925_v43 = vpop.eup %3309 }
 0x226   : > { %7093 = vst [vmem:[#allocation47_spill] sm:$0xff] %v4925_v43  ;;  %v3312_v29 = vpop.eup %3311 }
 0x227   : > { %v3314_v26 = vpop.eup %3313  ;;  %v1479_v58 = vmul.f32 1.442695, %v1422_v8  ;;  %v1419_v5 = vsub.f32 0.0, %v4920_v37  ;;  %v4936_v25 = vadd.f32 1.0, %v3312_v29 }
 0x228   : > { %v3316_v49 = vpop.eup %3315 }
 0x229   : > { %v4934_v42 = vpop.eup %3317  ;;  %7094 = vst [vmem:[#allocation48_spill] sm:$0xff] %v4936_v25  ;;  %v4943_v4 = vadd.f32 1.0, %v3316_v49 }
 0x22a   : > { %v1388_v23 = vpop.f32.mrf.mxu3 }
 0x22b   : > { %v4923_v36 = vadd.f32 %v1388_v23, %v4737_v18  ;;  %v1469_v23 = vmul.f32 1.442695, %v1417_v10  ;;  %7096 = vst [vmem:[#allocation50_spill] sm:$0xff] %v4943_v4  ;;  %v1473_v10 = vmul.f32 1.442695, %v1419_v5 }
 0x22c   : > { %v1320_v52 = vpop.f32.mrf.mxu2 }
 0x22d   : > { %v4930_v61 = vadd.f32 %v1320_v52, %v4735_v57  ;;  %v1424_v12 = vsub.f32 0.0, %v4923_v36  ;;  %v4939_v57 = vadd.f32 1.0, %v3314_v26  ;;  %v4941_v52 = vpop.eup %3319 }
 0x22e   : > { %7095 = vst [vmem:[#allocation49_spill] sm:$0xff] %v4941_v52  ;;  %v4945_v14 = vpop.eup %3321 }
 0x22f   : > { %v1483_v30 = vmul.f32 1.442695, %v1424_v12  ;;  %v1421_v1 = vsub.f32 0.0, %v4930_v61  ;;  %v3324_v29 = vpop.eup %3323 }
 0x230   : > { %v3326_v21 = vpop.eup %3325  ;;  %v4958_v13 = vadd.f32 1.0, %v3324_v29 }
 0x231   : > { %3329 = vpow2.f32 %v1483_v30  ;;  %v1477_v34 = vmul.f32 1.442695, %v1421_v1  ;;  %v3328_v49 = vpop.eup %3327  ;;  %v4962_v38 = vadd.f32 1.0, %v3326_v21 }
 0x232   : > { %3331 = vpow2.f32 %v1479_v58  ;;  %v1391_v8 = vpop.f32.mrf.mxu3  ;;  %v4966_v0 = vadd.f32 1.0, %v3328_v49 }
 0x233   : > { %3333 = vpow2.f32 %v1469_v23  ;;  %v4948_v12 = vadd.f32 %v1391_v8, %v4739_v41 }
 0x234   : > { %3335 = vrcp.f32 %v4936_v25  ;;  %v1323_v26 = vpop.f32.mrf.mxu2  ;;  %vm1852_vm0 = vweird.f32 %v4966_v0 }
 0x235   : > { %3337 = vrcp.f32 %v4939_v57  ;;  %v4953_v30 = vadd.f32 %v1323_v26, %v4737_v18  ;;  %v1426_v58 = vsub.f32 0.0, %v4948_v12 }
 0x236   : > { %3339 = vrcp.f32 %v4943_v4  ;;  %v1830_v4 = vand.u32 2147483648, %v4958_v13 }
 0x237   : > { %v3330_v5 = vpop.eup %3329  ;;  %3341 = vpow2.f32 %v1473_v10  ;;  %v1423_v23 = vsub.f32 0.0, %v4953_v30  ;;  %v1487_v8 = vmul.f32 1.442695, %v1426_v58 }
 0x238   : > { %v3332_v32 = vpop.eup %3331  ;;  %3343 = vpow2.f32 %v1477_v34  ;;  %v4960_v1 = vadd.f32 1.0, %v3330_v5 }
 0x239   : > { %v3334_v6 = vpop.eup %3333  ;;  %v1481_v18 = vmul.f32 1.442695, %v1423_v23  ;;  %3345 = vpow2.f32 %v1487_v8  ;;  %v4971_v58 = vadd.f32 1.0, %v3332_v32 }
 0x23a   : > { %v4964_v26 = vpop.eup %3335  ;;  %3347 = vrcp.f32 %v4960_v1  ;;  %v1394_v10 = vpop.f32.mrf.mxu3  ;;  %v4979_v21 = vadd.f32 1.0, %v3334_v6  ;;  %v1914_v43 = vand.u32 2147483648, %v4960_v1  ;;  %vm1908_vm2 = vweird.f32 %v4960_v1 }
 0x23b   : > { %7097 = vst [vmem:[#allocation51_spill] sm:$0xff] %v4964_v26  ;;  %v4969_v28 = vpop.eup %3337  ;;  %3349 = vpow2.f32 %v1481_v18  ;;  %v4974_v29 = vadd.f32 %v1394_v10, %v4733_v45  ;;  %v1884_v50 = vand.u32 2147483647, %v4971_v58  ;;  %vm1880_vm8 = vweird.f32 %v4971_v58 }
 0x23c   : > { %v4976_v34 = vpop.eup %3339  ;;  %3351 = vrcp.f32 %v4958_v13  ;;  %v1326_v5 = vpop.f32.mrf.mxu2  ;;  %v1915_v40 = vor.u32 1.1754944e-38, %v1914_v43 }
 0x23d   : > { %7098 = vst [vmem:[#allocation52_spill] sm:$0xff] %v4976_v34  ;;  %v3342_v49 = vpop.eup %3341  ;;  %3353 = vrcp.f32 %v4962_v38  ;;  %v4983_v23 = vadd.f32 %v1326_v5, %v4739_v41  ;;  %v1428_v32 = vsub.f32 0.0, %v4974_v29  ;;  %vm5060_vm11 = vcmp.eq.f32.partialorder %v1884_v50, 8.507059e+37 }
 0x23e   : > { %v3344_v8 = vpop.eup %3343  ;;  %3355 = vrcp.f32 %v4966_v0  ;;  %v4990_v53 = vadd.f32 1.0, %v3342_v49 }
 0x23f   : > { %v3346_v18 = vpop.eup %3345  ;;  %3357 = vrcp.f32 %v4971_v58  ;;  %v1425_v10 = vsub.f32 0.0, %v4983_v23  ;;  %v1491_v22 = vmul.f32 1.442695, %v1428_v32  ;;  %v4997_v63 = vadd.f32 1.0, %v3344_v8 }
 0x240   : > { %v3348_v6 = vpop.eup %3347  ;;  %3359 = vrcp.f32 %v4979_v21  ;;  %v4992_v17 = vadd.f32 1.0, %v3346_v18 }
 0x241   : > { %v3350_v41 = vpop.eup %3349  ;;  %v1485_v5 = vmul.f32 1.442695, %v1425_v10  ;;  %3361 = vpow2.f32 %v1491_v22  ;;  %v1904_v48 = vmul.f32 %v3348_v6, %v4960_v1  ;;  %vm1909_vm1 = vweird.f32 %v3348_v6 }
 0x242   : > { %v4995_v54 = vpop.eup %3351  ;;  %3363 = vrcp.f32 %v4992_v17  ;;  %v5005_v49 = vadd.f32 1.0, %v3350_v41  ;;  %vm1936_vm3 = vweird.f32 %v4992_v17  ;;  %v1942_v27 = vand.u32 2147483648, %v4992_v17  ;;  %vm5026_vm4 = vmor %vm1908_vm2, %vm1909_vm1 }
 0x243   : > { %v5000_v24 = vpop.eup %3353  ;;  %3365 = vpow2.f32 %v1485_v5  ;;  %v1905_v32 = vsub.f32 1.0, %v1904_v48  ;;  %v1912_v48 = vand.u32 2147483647, %v4960_v1 }
 0x244   : > { %v5002_v47 = vpop.eup %3355  ;;  %3367 = vrcp.f32 %v4990_v53  ;;  %v1329_v18 = vpop.f32.mrf.mxu2 }
 0x245   : > { %v5007_v22 = vpop.eup %3357  ;;  %v5010_v10 = vadd.f32 %v1329_v18, %v4733_v45  ;;  %v1906_v8 = vmul.f32 %v3348_v6, %v1905_v32  ;;  %3369 = vrcp.f32 %v4997_v63  ;;  %v1940_v45 = vand.u32 2147483647, %v4992_v17 }
 0x246   : > { %v5013_v59 = vpop.eup %3359  ;;  %3371 = vrcp.f32 %v5005_v49  ;;  %v1876_v1 = vmul.f32 %v5007_v22, %v4971_v58  ;;  %vm1913_vm5 = vcmp.eq.f32.partialorder %v1912_v48, 8.507059e+37  ;;  %vm1881_vm9 = vweird.f32 %v5007_v22 }
 0x247   : > { %v3362_v41 = vpop.eup %3361  ;;  %v1427_v5 = vsub.f32 0.0, %v5010_v10  ;;  %v1907_v18 = vadd.f32 %v3348_v6, %v1906_v8  ;;  %vm5045_vm6 = vcmp.eq.f32.partialorder %v1940_v45, 8.507059e+37  ;;  %vm5086_vm14 = vmor %vm1880_vm8, %vm1881_vm9  ;;  %vm1853_vm1 = vweird.f32 %v5002_v47 }
 0x248   : > { %v3364_v32 = vpop.eup %3363  ;;  %v5022_v46 = vadd.f32 1.0, %v3362_v41  ;;  %v1877_v43 = vsub.f32 1.0, %v1876_v1  ;;  %vm5131_vm8 = vmor %vm1852_vm0, %vm1853_vm1  ;;  %vm1894_vm9 = vweird.f32 %v5005_v49  ;;  %vm1824_vm1 = vweird.f32 %v4958_v13 }
 0x249   : > { %v3366_v52 = vpop.eup %3365  ;;  %v1489_v33 = vmul.f32 1.442695, %v1427_v5  ;;  %v1932_v60 = vmul.f32 %v3364_v32, %v4992_v17  ;;  %v1911_v8 = vsel %vm5026_vm4, %v3348_v6, %v1907_v18  ;;  %vm1937_vm7 = vweird.f32 %v3364_v32 }
 0x24a   : > { %v5035_v41 = vpop.eup %3367  ;;  %v5037_v56 = vadd.f32 1.0, %v3366_v52  ;;  %3373 = vrcp.f32 %v5022_v46  ;;  %v1970_v35 = vand.u32 2147483648, %v5022_v46  ;;  %v1916_v5 = vsel %vm1913_vm5, %v1915_v40, %v1911_v8  ;;  %vm5068_vm12 = vmor %vm1936_vm3, %vm1937_vm7 }
 0x24b   : > { %3375 = vpow2.f32 %v1489_v33  ;;  %v1933_v26 = vsub.f32 1.0, %v1932_v60  ;;  %v5042_v25 = vpop.eup %3369  ;;  %v1886_v52 = vand.u32 2147483648, %v4971_v58  ;;  %v1968_v6 = vand.u32 2147483647, %v5022_v46 }
 0x24c   : > { %3377 = vrcp.f32 %v5037_v56  ;;  %v1943_v33 = vor.u32 1.1754944e-38, %v1942_v27  ;;  %v5051_v18 = vpop.eup %3371  ;;  %v5054_v60 = vmul.f32 %v1916_v5, %v4923_v36  ;;  %v1878_v40 = vmul.f32 %v5007_v22, %v1877_v43 }
 0x24d   : > { %v1934_v48 = vmul.f32 %v3364_v32, %v1933_v26  ;;  %vm1964_vm10 = vweird.f32 %v5022_v46  ;;  %v1971_v45 = vor.u32 1.1754944e-38, %v1970_v35  ;;  %v1848_v27 = vmul.f32 %v5002_v47, %v4966_v0 }
 0x24e   : > { %v1879_v5 = vadd.f32 %v5007_v22, %v1878_v40  ;;  %v1887_v43 = vor.u32 1.1754944e-38, %v1886_v52  ;;  %v1926_v35 = vand.u32 2147483647, %v5037_v56  ;;  %v1928_v50 = vand.u32 2147483648, %v5037_v56 }
 0x24f   : > { %v1935_v1 = vadd.f32 %v3364_v32, %v1934_v48  ;;  %vm5076_vm13 = vcmp.eq.f32.partialorder %v1968_v6, 8.507059e+37  ;;  %vm1922_vm15 = vweird.f32 %v5037_v56  ;;  %v1856_v40 = vand.u32 2147483647, %v4966_v0 }
 0x250   : > { %v3374_v26 = vpop.eup %3373  ;;  %v1883_v36 = vsel %vm5086_vm14, %v5007_v22, %v1879_v5  ;;  %vm5104_vm3 = vcmp.eq.f32.partialorder %v1926_v35, 8.507059e+37  ;;  %v1929_v22 = vor.u32 1.1754944e-38, %v1928_v50  ;;  %v1858_v50 = vand.u32 2147483648, %v4966_v0 }
 0x251   : > { %v3376_v48 = vpop.eup %3375  ;;  %v1960_v7 = vmul.f32 %v3374_v26, %v5022_v46  ;;  %v1939_v17 = vsel %vm5068_vm12, %v3364_v32, %v1935_v1  ;;  %v1849_v32 = vsub.f32 1.0, %v1848_v27  ;;  %vm1965_vm2 = vweird.f32 %v3374_v26 }
 0x252   : > { %v3378_v2 = vpop.eup %3377  ;;  %v5092_v6 = vadd.f32 1.0, %v3376_v48  ;;  %v1944_v58 = vsel %vm5045_vm6, %v1943_v33, %v1939_v17  ;;  %vm5110_vm4 = vcmp.eq.f32.partialorder %v1856_v40, 8.507059e+37  ;;  %v1890_v8 = vmul.f32 %v5051_v18, %v5005_v49  ;;  %vm1966_vm6 = vmor %vm1964_vm10, %vm1965_vm2 }
 0x253   : > { %v1961_v1 = vsub.f32 1.0, %v1960_v7  ;;  %v1918_v34 = vmul.f32 %v3378_v2, %v5037_v56  ;;  %v1888_v7 = vsel %vm5060_vm11, %v1887_v43, %v1883_v36  ;;  %v2002_v5 = vmul.f32 %v1944_v58, %v4948_v12 }
 0x254   : > { %3379 = vrcp.f32 %v5092_v6  ;;  %v1956_v48 = vand.u32 2147483648, %v5092_v6  ;;  %v1954_v17 = vand.u32 2147483647, %v5092_v6  ;;  %vm1923_vm5 = vweird.f32 %v3378_v2 }
 0x255   : > { %v1962_v27 = vmul.f32 %v3374_v26, %v1961_v1  ;;  %v1919_v15 = vsub.f32 1.0, %v1918_v34  ;;  %v1850_v35 = vmul.f32 %v5002_v47, %v1849_v32  ;;  %vm1950_vm7 = vweird.f32 %v5092_v6  ;;  %vm5141_vm10 = vmor %vm1922_vm15, %vm1923_vm5 }
 0x256   : > { %v1957_v34 = vor.u32 1.1754944e-38, %v1956_v48  ;;  %v1998_v12 = vmul.f32 %v1888_v7, %v4895_v3  ;;  %v1898_v40 = vand.u32 2147483647, %v5005_v49  ;;  %v1891_v46 = vsub.f32 1.0, %v1890_v8 }
 0x257   : > { %v1963_v52 = vadd.f32 %v3374_v26, %v1962_v27  ;;  %v1920_v39 = vmul.f32 %v3378_v2, %v1919_v15  ;;  %v1851_v43 = vadd.f32 %v5002_v47, %v1850_v35  ;;  %v1820_v48 = vmul.f32 %v4995_v54, %v4958_v13 }
 0x258   : > { %vm5153_vm11 = vcmp.eq.f32.partialorder %v1954_v17, 8.507059e+37  ;;  %v1859_v7 = vor.u32 1.1754944e-38, %v1858_v50  ;;  %vm5161_vm14 = vcmp.eq.f32.partialorder %v1898_v40, 8.507059e+37  ;;  %vm1825_vm15 = vweird.f32 %v4995_v54 }
 0x259   : > { %v1967_v36 = vsel %vm1966_vm6, %v3374_v26, %v1963_v52  ;;  %v1921_v32 = vadd.f32 %v3378_v2, %v1920_v39  ;;  %v1855_v0 = vsel %vm5131_vm8, %v5002_v47, %v1851_v43  ;;  %v1900_v26 = vand.u32 2147483648, %v5005_v49  ;;  %vm1826_vm5 = vmor %vm1824_vm1, %vm1825_vm15 }
 0x25a   : > { %v3380_v58 = vpop.eup %3379  ;;  %v1972_v3 = vsel %vm5076_vm13, %v1971_v45, %v1967_v36  ;;  %v1892_v47 = vmul.f32 %v5051_v18, %v1891_v46  ;;  %vm1895_vm13 = vweird.f32 %v5051_v18  ;;  %v1860_v35 = vsel %vm5110_vm4, %v1859_v7, %v1855_v0 }
 0x25b   : > { %v2004_v27 = vmul.f32 %v1972_v3, %v4974_v29  ;;  %v1946_v31 = vmul.f32 %v3380_v58, %v5092_v6  ;;  %v1925_v56 = vsel %vm5141_vm10, %v3378_v2, %v1921_v32  ;;  %vm1951_vm12 = vweird.f32 %v3380_v58  ;;  %vm1896_vm0 = vmor %vm1894_vm9, %vm1895_vm13 }
 0x25c   : > { %v1930_v17 = vsel %vm5104_vm3, %v1929_v22, %v1925_v56  ;;  %v1821_v52 = vsub.f32 1.0, %v1820_v48  ;;  %v1893_v2 = vadd.f32 %v5051_v18, %v1892_v47  ;;  %v1901_v50 = vor.u32 1.1754944e-38, %v1900_v26  ;;  %vm1952_vm2 = vmor %vm1950_vm7, %vm1951_vm12 }
 0x25d   : > { %2184 = vmatpush.msrb.mxu1 %v2004_v27  ;;  %v1947_v29 = vsub.f32 1.0, %v1946_v31  ;;  %v1828_v8 = vand.u32 2147483647, %v4958_v13  ;;  %v1862_v22 = vmul.f32 %v5042_v25, %v4997_v63  ;;  %v2001_v33 = vmul.f32 %v1930_v17, %v4983_v23 }
 0x25e   : > { %v1822_v40 = vmul.f32 %v4995_v54, %v1821_v52  ;;  %v1996_v36 = vmul.f32 %v1860_v35, %v4887_v55  ;;  %v1897_v32 = vsel %vm1896_vm0, %v5051_v18, %v1893_v2  ;;  %vm1866_vm4 = vweird.f32 %v4997_v63 }
 0x25f   : > { %2185 = vmatpush.msrb.mxu1 %v2002_v5  ;;  %v1948_v43 = vmul.f32 %v3380_v58, %v1947_v29  ;;  %vm1829_vm3 = vcmp.eq.f32.partialorder %v1828_v8, 8.507059e+37  ;;  %v1902_v23 = vsel %vm5161_vm14, %v1901_v50, %v1897_v32  ;;  %v1831_v55 = vor.u32 1.1754944e-38, %v1830_v4 }
 0x260   : > { %v1823_v49 = vadd.f32 %v4995_v54, %v1822_v40  ;;  %v1863_v13 = vsub.f32 1.0, %v1862_v22  ;;  %vm1867_vm6 = vweird.f32 %v5042_v25  ;;  %v1872_v6 = vand.u32 2147483648, %v4997_v63  ;;  %v7136_v22 = vld [vmem:[#allocation51_spill] sm:$0xff] }
 0x261   : > { %2186 = vmatpush.msrb.mxu1 %v5054_v60  ;;  %v1949_v5 = vadd.f32 %v3380_v58, %v1948_v43  ;;  %v1792_v1 = vmul.f32 %v4969_v28, %v4939_v57  ;;  %v1870_v0 = vand.u32 2147483647, %v4997_v63  ;;  %vm1796_vm7 = vweird.f32 %v4939_v57  ;;  %vm1868_vm8 = vmor %vm1866_vm4, %vm1867_vm6 }
 0x262   : > { %v1827_v60 = vsel %vm1826_vm5, %v4995_v54, %v1823_v49  ;;  %v1864_v39 = vmul.f32 %v5042_v25, %v1863_v13  ;;  %v1800_v27 = vand.u32 2147483647, %v4939_v57  ;;  %vm1797_vm9 = vweird.f32 %v4969_v28 }
 0x263   : > { %v1953_v18 = vsel %vm1952_vm2, %v3380_v58, %v1949_v5  ;;  %2187 = vmatpush.msrb.mxu1 %v1998_v12  ;;  %v1832_v3 = vsel %vm1829_vm3, %v1831_v55, %v1827_v60  ;;  %v1999_v12 = vmul.f32 %v1902_v23, %v4953_v30  ;;  %v1793_v58 = vsub.f32 1.0, %v1792_v1  ;;  %vm1798_vm13 = vmor %vm1796_vm7, %vm1797_vm9 }
 0x264   : > { %v1958_v46 = vsel %vm5153_vm11, %v1957_v34, %v1953_v18  ;;  %v1994_v54 = vmul.f32 %v1832_v3, %v4877_v51  ;;  %v1865_v48 = vadd.f32 %v5042_v25, %v1864_v39  ;;  %v1802_v34 = vand.u32 2147483648, %v4939_v57 }
 0x265   : > { %v2003_v26 = vmul.f32 %v1958_v46, %v5010_v10  ;;  %2188 = vmatpush.msrb.mxu1 %v1996_v36  ;;  %v1873_v10 = vor.u32 1.1754944e-38, %v1872_v6  ;;  %v1794_v30 = vmul.f32 %v4969_v28, %v1793_v58  ;;  %v1834_v51 = vmul.f32 %v5035_v41, %v4990_v53 }
 0x266   : > { %v1869_v31 = vsel %vm1868_vm8, %v5042_v25, %v1865_v48  ;;  %vm1871_vm10 = vcmp.eq.f32.partialorder %v1870_v0, 8.507059e+37  ;;  %vm1838_vm11 = vweird.f32 %v4990_v53  ;;  %v1842_v45 = vand.u32 2147483647, %v4990_v53 }
 0x267   : > { %2119 = vmatpush.msrb.mxu0 %v2003_v26  ;;  %2189 = vmatpush.msrb.mxu1 %v1994_v54  ;;  %v1874_v56 = vsel %vm1871_vm10, %v1873_v10, %v1869_v31  ;;  %v1795_v63 = vadd.f32 %v4969_v28, %v1794_v30  ;;  %v1835_v7 = vsub.f32 1.0, %v1834_v51  ;;  %vm1839_vm12 = vweird.f32 %v5035_v41  ;;  %v7127_v30 = vld [vmem:[#allocation34_spill] sm:$0xff] }
 0x268   : > { %vm1801_vm14 = vcmp.eq.f32.partialorder %v1800_v27, 8.507059e+37  ;;  %v1803_v47 = vor.u32 1.1754944e-38, %v1802_v34  ;;  %v1844_v15 = vand.u32 2147483648, %v4990_v53  ;;  %v1764_v25 = vmul.f32 %v4945_v14, %v4910_v62  ;;  %vm1840_vm1 = vmor %vm1838_vm11, %vm1839_vm12 }
 0x269   : > { %2120 = vmatpush.msrb.mxu0 %v2001_v33  ;;  %v1997_v29 = vmul.f32 %v1874_v56, %v4930_v61  ;;  %v1799_v17 = vsel %vm1798_vm13, %v4969_v28, %v1795_v63  ;;  %v1836_v35 = vmul.f32 %v5035_v41, %v1835_v7  ;;  %vm5229_vm15 = vcmp.eq.f32.partialorder %v1842_v45, 8.507059e+37  ;;  %v7128_v45 = vld [vmem:[#allocation50_spill] sm:$0xff]  ;;  %v7129_v56 = vld [vmem:[#allocation52_spill] sm:$0xff] }
 0x26a   : > { %v1804_v57 = vsel %vm1801_vm14, %v1803_v47, %v1799_v17  ;;  %v1765_v2 = vsub.f32 1.0, %v1764_v25  ;;  %v1772_v50 = vand.u32 2147483647, %v4910_v62  ;;  %v1774_v8 = vand.u32 2147483648, %v4910_v62 }
 0x26b   : > { %2121 = vmatpush.msrb.mxu0 %v1999_v12  ;;  %v1992_v43 = vmul.f32 %v1804_v57, %v4845_v16  ;;  %v1837_v40 = vadd.f32 %v5035_v41, %v1836_v35  ;;  %vm1768_vm0 = vweird.f32 %v4910_v62  ;;  %v1806_v28 = vmul.f32 %v5013_v59, %v4979_v21  ;;  %v7131_v57 = vld [vmem:[#allocation23_spill] sm:$0xff] }
 0x26c   : > { %v1845_v61 = vor.u32 1.1754944e-38, %v1844_v15  ;;  %v1766_v4 = vmul.f32 %v4945_v14, %v1765_v2  ;;  %vm1769_vm2 = vweird.f32 %v4945_v14  ;;  %vm1810_vm3 = vweird.f32 %v4979_v21 }
 0x26d   : > { %2122 = vmatpush.msrb.mxu0 %v1997_v29  ;;  %2190 = vmatpush.msrb.mxu1 %v1992_v43  ;;  %v1841_v16 = vsel %vm1840_vm1, %v5035_v41, %v1837_v40  ;;  %vm5248_vm4 = vcmp.eq.f32.partialorder %v1772_v50, 8.507059e+37  ;;  %v1807_v33 = vsub.f32 1.0, %v1806_v28  ;;  %v1816_v36 = vand.u32 2147483648, %v4979_v21  ;;  %vm1770_vm5 = vmor %vm1768_vm0, %vm1769_vm2  ;;  %v7130_v29 = vld [vmem:[#allocation21_spill] sm:$0xff] }
 0x26e   : > { %v1846_v53 = vsel %vm5229_vm15, %v1845_v61, %v1841_v16  ;;  %v1767_v32 = vadd.f32 %v4945_v14, %v1766_v4  ;;  %v1775_v5 = vor.u32 1.1754944e-38, %v1774_v8  ;;  %v1736_v49 = vmul.f32 %v4934_v42, %v4891_v19  ;;  %v7135_v16 = vld [vmem:[#allocation48_spill] sm:$0xff] }
 0x26f   : > { %v1995_v23 = vmul.f32 %v1846_v53, %v4920_v37  ;;  %v1808_v41 = vmul.f32 %v5013_v59, %v1807_v33  ;;  %vm1811_vm6 = vweird.f32 %v5013_v59  ;;  %v1814_v55 = vand.u32 2147483647, %v4979_v21 }
 0x270   : > { %v1771_v13 = vsel %vm1770_vm5, %v4945_v14, %v1767_v32  ;;  %v1817_v18 = vor.u32 1.1754944e-38, %v1816_v36  ;;  %v1737_v60 = vsub.f32 1.0, %v1736_v49  ;;  %vm1740_vm7 = vweird.f32 %v4891_v19  ;;  %vm1812_vm8 = vmor %vm1810_vm3, %vm1811_vm6  ;;  %v7137_v36 = vld [vmem:[#allocation43_spill] sm:$0xff] }
 0x271   : > { %2123 = vmatpush.msrb.mxu0 %v1995_v23  ;;  %v1776_v6 = vsel %vm5248_vm4, %v1775_v5, %v1771_v13  ;;  %v1809_v37 = vadd.f32 %v5013_v59, %v1808_v41  ;;  %v1746_v62 = vand.u32 2147483648, %v4891_v19  ;;  %v1778_v1 = vmul.f32 %v5000_v24, %v4962_v38 }
 0x272   : > { %v1990_v46 = vmul.f32 %v1776_v6, %v4817_v20  ;;  %v1738_v14 = vmul.f32 %v4934_v42, %v1737_v60  ;;  %vm1741_vm9 = vweird.f32 %v4934_v42  ;;  %v1744_v3 = vand.u32 2147483647, %v4891_v19  ;;  %v7138_v60 = vld [vmem:[#allocation30_spill] sm:$0xff] }
 0x273   : > { %v1813_v39 = vsel %vm1812_vm8, %v5013_v59, %v1809_v37  ;;  %vm1815_vm10 = vcmp.eq.f32.partialorder %v1814_v55, 8.507059e+37  ;;  %v1747_v0 = vor.u32 1.1754944e-38, %v1746_v62  ;;  %v1779_v26 = vsub.f32 1.0, %v1778_v1  ;;  %vm1742_vm12 = vmor %vm1740_vm7, %vm1741_vm9  ;;  %v7139_v1 = vld [vmem:[#allocation22_spill] sm:$0xff] }
 0x274   : > { %2191 = vmatpush.msrb.mxu1 %v1990_v46  ;;  %v1818_v12 = vsel %vm1815_vm10, %v1817_v18, %v1813_v39  ;;  %v1739_v54 = vadd.f32 %v4934_v42, %v1738_v14  ;;  %vm1783_vm11 = vweird.f32 %v5000_v24  ;;  %v1788_v20 = vand.u32 2147483648, %v4962_v38  ;;  %v7140_v46 = vld [vmem:[#allocation7_spill] sm:$0xff] }
 0x275   : > { %v1993_v21 = vmul.f32 %v1818_v12, %v4901_v11  ;;  %v1780_v58 = vmul.f32 %v5000_v24, %v1779_v26  ;;  %v1786_v59 = vand.u32 2147483647, %v4962_v38  ;;  %v1708_v48 = vmul.f32 %v4916_v44, %v4867_v9 }
 0x276   : > { %v1743_v27 = vsel %vm1742_vm12, %v4934_v42, %v1739_v54  ;;  %vm1745_vm13 = vcmp.eq.f32.partialorder %v1744_v3, 8.507059e+37  ;;  %vm1782_vm14 = vweird.f32 %v4962_v38  ;;  %vm1712_vm15 = vweird.f32 %v4867_v9  ;;  %v7141_v54 = vld [vmem:[#allocation35_spill] sm:$0xff] }
 0x277   : > { %2124 = vmatpush.msrb.mxu0 %v1993_v21  ;;  %v1748_v34 = vsel %vm1745_vm13, %v1747_v0, %v1743_v27  ;;  %v1781_v11 = vadd.f32 %v5000_v24, %v1780_v58  ;;  %v1789_v19 = vor.u32 1.1754944e-38, %v1788_v20  ;;  %v1709_v10 = vsub.f32 1.0, %v1708_v48  ;;  %vm1784_vm0 = vmor %vm1782_vm14, %vm1783_vm11  ;;  %v7143_v48 = vld [vmem:[#allocation49_spill] sm:$0xff] }
 0x278   : > { %v1988_v51 = vmul.f32 %v1748_v34, %v7127_v30  ;;  %v1716_v31 = vand.u32 2147483647, %v4867_v9  ;;  %v1718_v42 = vand.u32 2147483648, %v4867_v9  ;;  %v1750_v38 = vmul.f32 %v7129_v56, %v7128_v45 }
 0x279   : > { %v1785_v63 = vsel %vm1784_vm0, %v5000_v24, %v1781_v11  ;;  %vm1787_vm1 = vcmp.eq.f32.partialorder %v1786_v59, 8.507059e+37  ;;  %v1710_v7 = vmul.f32 %v4916_v44, %v1709_v10  ;;  %vm1713_vm2 = vweird.f32 %v4916_v44  ;;  %v7132_v24 = vld [vmem:[#allocation45_spill] sm:$0xff]  ;;  %v7142_v59 = vld [vmem:[#allocation11_spill] sm:$0xff] }
 0x27a   : > { %2192 = vmatpush.msrb.mxu1 %v1988_v51  ;;  %v1790_v47 = vsel %vm1787_vm1, %v1789_v19, %v1785_v63  ;;  %v1751_v15 = vsub.f32 1.0, %v1750_v38  ;;  %vm1754_vm3 = vweird.f32 %v7128_v45  ;;  %v1758_v25 = vand.u32 2147483647, %v7128_v45  ;;  %vm1714_vm4 = vmor %vm1712_vm15, %vm1713_vm2  ;;  %v7144_v51 = vld [vmem:[#allocation18_spill] sm:$0xff]  ;;  %v7146_v38 = vld [vmem:[#allocation15_spill] sm:$0xff] }
 0x27b   : > { %v1991_v17 = vmul.f32 %v1790_v47, %v7130_v29  ;;  %v1711_v35 = vadd.f32 %v4916_v44, %v1710_v7  ;;  %v1760_v52 = vand.u32 2147483648, %v7128_v45  ;;  %v1680_v2 = vmul.f32 %v7132_v24, %v7131_v57 }
 0x27c   : > { %vm1717_vm5 = vcmp.eq.f32.partialorder %v1716_v31, 8.507059e+37  ;;  %v1719_v50 = vor.u32 1.1754944e-38, %v1718_v42  ;;  %v1752_v8 = vmul.f32 %v7129_v56, %v1751_v15  ;;  %vm1755_vm6 = vweird.f32 %v7129_v56 }
 0x27d   : > { %2125 = vmatpush.msrb.mxu0 %v1991_v17  ;;  %v1715_v43 = vsel %vm1714_vm4, %v4916_v44, %v1711_v35  ;;  %vm5315_vm7 = vcmp.eq.f32.partialorder %v1758_v25, 8.507059e+37  ;;  %v1681_v28 = vsub.f32 1.0, %v1680_v2  ;;  %vm1685_vm8 = vweird.f32 %v7132_v24  ;;  %vm1756_vm9 = vmor %vm1754_vm3, %vm1755_vm6 }
 0x27e   : > { %v1720_v61 = vsel %vm1717_vm5, %v1719_v50, %v1715_v43  ;;  %v1753_v9 = vadd.f32 %v7129_v56, %v1752_v8  ;;  %v1690_v4 = vand.u32 2147483648, %v7131_v57  ;;  %v1722_v33 = vmul.f32 %v7136_v22, %v7135_v16  ;;  %v7151_v50 = vld [vmem:[#allocation37_spill] sm:$0xff] }
 0x27f   : > { %v1986_v53 = vmul.f32 %v1720_v61, %v7137_v36  ;;  %v1761_v44 = vor.u32 1.1754944e-38, %v1760_v52  ;;  %v1682_v32 = vmul.f32 %v7132_v24, %v1681_v28  ;;  %v1688_v5 = vand.u32 2147483647, %v7131_v57  ;;  %v7152_v36 = vld [vmem:[#allocation40_spill] sm:$0xff] }
 0x280   : > { %v1757_v49 = vsel %vm1756_vm9, %v7129_v56, %v1753_v9  ;;  %vm1684_vm10 = vweird.f32 %v7131_v57  ;;  %v1691_v23 = vor.u32 1.1754944e-38, %v1690_v4  ;;  %v1723_v41 = vsub.f32 1.0, %v1722_v33  ;;  %v7145_v56 = vld [vmem:[#allocation8_spill] sm:$0xff] }
 0x281   : > { %2193 = vmatpush.msrb.mxu1 %v1986_v53  ;;  %v1762_v55 = vsel %vm5315_vm7, %v1761_v44, %v1757_v49  ;;  %v1683_v13 = vadd.f32 %v7132_v24, %v1682_v32  ;;  %vm1727_vm11 = vweird.f32 %v7136_v22  ;;  %v1732_v18 = vand.u32 2147483648, %v7135_v16  ;;  %vm1686_vm12 = vmor %vm1684_vm10, %vm1685_vm8  ;;  %v7149_v57 = vld [vmem:[#allocation12_spill] sm:$0xff]  ;;  %v7154_v49 = vld [vmem:[#allocation6_spill] sm:$0xff] }
 0x282   : > { %v1989_v6 = vmul.f32 %v1762_v55, %v7138_v60  ;;  %v1724_v37 = vmul.f32 %v7136_v22, %v1723_v41  ;;  %v1730_v62 = vand.u32 2147483647, %v7135_v16  ;;  %v1652_v14 = vmul.f32 %v7140_v46, %v7139_v1 }
 0x283   : > { %v1687_v3 = vsel %vm1686_vm12, %v7132_v24, %v1683_v13  ;;  %vm1689_vm13 = vcmp.eq.f32.partialorder %v1688_v5, 8.507059e+37  ;;  %vm1726_vm14 = vweird.f32 %v7135_v16  ;;  %vm1656_vm15 = vweird.f32 %v7139_v1  ;;  %v7150_v24 = vld [vmem:[#allocation47_spill] sm:$0xff]  ;;  %v7153_v5 = vld [vmem:[#allocation25_spill] sm:$0xff] }
 0x284   : > { %2126 = vmatpush.msrb.mxu0 %v1989_v6  ;;  %v1692_v39 = vsel %vm1689_vm13, %v1691_v23, %v1687_v3  ;;  %v1725_v0 = vadd.f32 %v7136_v22, %v1724_v37  ;;  %v1733_v26 = vor.u32 1.1754944e-38, %v1732_v18  ;;  %v1653_v12 = vsub.f32 1.0, %v1652_v14  ;;  %vm1728_vm0 = vmor %vm1726_vm14, %vm1727_vm11  ;;  %v7155_v6 = vld [vmem:[#allocation41_spill] sm:$0xff]  ;;  %v7157_v14 = vld [vmem:[#allocation46_spill] sm:$0xff] }
 0x285   : > { %v1984_v20 = vmul.f32 %v1692_v39, %v7141_v54  ;;  %v1660_v21 = vand.u32 2147483647, %v7139_v1  ;;  %v1662_v58 = vand.u32 2147483648, %v7139_v1  ;;  %v1694_v27 = vmul.f32 %v7143_v48, %v7142_v59 }
 0x286   : > { %v1729_v34 = vsel %vm1728_vm0, %v7136_v22, %v1725_v0  ;;  %vm1731_vm1 = vcmp.eq.f32.partialorder %v1730_v62, 8.507059e+37  ;;  %v1654_v11 = vmul.f32 %v7140_v46, %v1653_v12  ;;  %vm1657_vm2 = vweird.f32 %v7140_v46 }
 0x287   : > { %2194 = vmatpush.msrb.mxu1 %v1984_v20  ;;  %v1734_v19 = vsel %vm1731_vm1, %v1733_v26, %v1729_v34  ;;  %v1695_v10 = vsub.f32 1.0, %v1694_v27  ;;  %vm1698_vm3 = vweird.f32 %v7142_v59  ;;  %v1702_v30 = vand.u32 2147483647, %v7142_v59  ;;  %vm1658_vm4 = vmor %vm1656_vm15, %vm1657_vm2  ;;  %v7158_v20 = vld [vmem:[#allocation32_spill] sm:$0xff] }
 0x288   : > { %v1987_v31 = vmul.f32 %v1734_v19, %v7144_v51  ;;  %v1655_v42 = vadd.f32 %v7140_v46, %v1654_v11  ;;  %v1704_v45 = vand.u32 2147483648, %v7142_v59  ;;  %v1624_v63 = vmul.f32 %v7146_v38, %v7145_v56  ;;  %v7160_v27 = vld [vmem:[#allocation16_spill] sm:$0xff] }
 0x289   : > { %vm1661_vm5 = vcmp.eq.f32.partialorder %v1660_v21, 8.507059e+37  ;;  %v1663_v7 = vor.u32 1.1754944e-38, %v1662_v58  ;;  %v1696_v47 = vmul.f32 %v7143_v48, %v1695_v10  ;;  %vm1699_vm6 = vweird.f32 %v7143_v48 }
 0x28a   : > { %2127 = vmatpush.msrb.mxu0 %v1987_v31  ;;  %v1659_v15 = vsel %vm1658_vm4, %v7140_v46, %v1655_v42  ;;  %vm5369_vm7 = vcmp.eq.f32.partialorder %v1702_v30, 8.507059e+37  ;;  %v1625_v29 = vsub.f32 1.0, %v1624_v63  ;;  %vm1629_vm8 = vweird.f32 %v7146_v38  ;;  %vm1700_vm9 = vmor %vm1698_vm3, %vm1699_vm6  ;;  %v7156_v46 = vld [vmem:[#allocation13_spill] sm:$0xff] }
 0x28b   : > { %v1664_v17 = vsel %vm1661_vm5, %v1663_v7, %v1659_v15  ;;  %v1697_v35 = vadd.f32 %v7143_v48, %v1696_v47  ;;  %v1634_v52 = vand.u32 2147483648, %v7145_v56  ;;  %v1666_v2 = vmul.f32 %v7150_v24, %v7149_v57  ;;  %v7165_v7 = vld [vmem:[#allocation42_spill] sm:$0xff] }
 0x28c   : > { %v1982_v8 = vmul.f32 %v1664_v17, %v7151_v50  ;;  %v1705_v43 = vor.u32 1.1754944e-38, %v1704_v45  ;;  %v1626_v40 = vmul.f32 %v7146_v38, %v1625_v29  ;;  %v1632_v28 = vand.u32 2147483647, %v7145_v56 }
 0x28d   : > { %v1701_v61 = vsel %vm1700_vm9, %v7143_v48, %v1697_v35  ;;  %vm1628_vm10 = vweird.f32 %v7145_v56  ;;  %v1635_v9 = vor.u32 1.1754944e-38, %v1634_v52  ;;  %v1667_v4 = vsub.f32 1.0, %v1666_v2  ;;  %v7159_v48 = vld [vmem:[#allocation19_spill] sm:$0xff]  ;;  %v7163_v56 = vld [vmem:[#allocation17_spill] sm:$0xff] }
 0x28e   : > { %2195 = vmatpush.msrb.mxu1 %v1982_v8  ;;  %v1706_v16 = vsel %vm5369_vm7, %v1705_v43, %v1701_v61  ;;  %v1627_v22 = vadd.f32 %v7146_v38, %v1626_v40  ;;  %vm1671_vm11 = vweird.f32 %v7150_v24  ;;  %v1676_v33 = vand.u32 2147483648, %v7149_v57  ;;  %vm1630_vm12 = vmor %vm1628_vm10, %vm1629_vm8  ;;  %v7166_v8 = vld [vmem:[#allocation20_spill] sm:$0xff]  ;;  %v7168_v61 = vld [vmem:[#allocation14_spill] sm:$0xff] }
 0x28f   : > { %v1985_v53 = vmul.f32 %v1706_v16, %v7152_v36  ;;  %v1668_v44 = vmul.f32 %v7150_v24, %v1667_v4  ;;  %v1674_v32 = vand.u32 2147483647, %v7149_v57  ;;  %v1596_v23 = vmul.f32 %v7154_v49, %v7153_v5  ;;  %v7169_v36 = vld [vmem:[#allocation44_spill] sm:$0xff] }
 0x290   : > { %v1631_v41 = vsel %vm1630_vm12, %v7146_v38, %v1627_v22  ;;  %vm1633_vm13 = vcmp.eq.f32.partialorder %v1632_v28, 8.507059e+37  ;;  %vm1670_vm14 = vweird.f32 %v7149_v57  ;;  %vm1600_vm15 = vweird.f32 %v7153_v5  ;;  %v7164_v38 = vld [vmem:[#allocation5_spill] sm:$0xff]  ;;  %v7167_v28 = vld [vmem:[#allocation38_spill] sm:$0xff] }
 0x291   : > { %2128 = vmatpush.msrb.mxu0 %v1985_v53  ;;  %v1636_v55 = vsel %vm1633_vm13, %v1635_v9, %v1631_v41  ;;  %v1669_v13 = vadd.f32 %v7150_v24, %v1668_v44  ;;  %v1677_v18 = vor.u32 1.1754944e-38, %v1676_v33  ;;  %v1597_v60 = vsub.f32 1.0, %v1596_v23  ;;  %vm1672_vm0 = vmor %vm1670_vm14, %vm1671_vm11 }
 0x292   : > { %v1980_v37 = vmul.f32 %v1636_v55, %v7155_v6  ;;  %v1604_v62 = vand.u32 2147483647, %v7153_v5  ;;  %v1606_v1 = vand.u32 2147483648, %v7153_v5  ;;  %v1638_v3 = vmul.f32 %v7157_v14, %v7156_v46  ;;  %v7170_v5 = vld [vmem:[#allocation31_spill] sm:$0xff]  ;;  %v7172_v6 = vld [vmem:[#allocation29_spill] sm:$0xff] }
 0x293   : > { %v1673_v39 = vsel %vm1672_vm0, %v7150_v24, %v1669_v13  ;;  %vm1675_vm1 = vcmp.eq.f32.partialorder %v1674_v32, 8.507059e+37  ;;  %v1598_v0 = vmul.f32 %v7154_v49, %v1597_v60  ;;  %vm1601_vm2 = vweird.f32 %v7154_v49 }
 0x294   : > { %2196 = vmatpush.msrb.mxu1 %v1980_v37  ;;  %v1678_v26 = vsel %vm1675_vm1, %v1677_v18, %v1673_v39  ;;  %v1639_v12 = vsub.f32 1.0, %v1638_v3  ;;  %vm1642_vm3 = vweird.f32 %v7156_v46  ;;  %v1646_v54 = vand.u32 2147483647, %v7156_v46  ;;  %vm1602_vm4 = vmor %vm1600_vm15, %vm1601_vm2 }
 0x295   : > { %v1983_v21 = vmul.f32 %v1678_v26, %v7158_v20  ;;  %v1599_v58 = vadd.f32 %v7154_v49, %v1598_v0  ;;  %v1648_v59 = vand.u32 2147483648, %v7156_v46  ;;  %v1568_v34 = vmul.f32 %v7160_v27, %v7159_v48  ;;  %v7173_v46 = vld [vmem:[#allocation10_spill] sm:$0xff] }
 0x296   : > { %vm1605_vm5 = vcmp.eq.f32.partialorder %v1604_v62, 8.507059e+37  ;;  %v1607_v11 = vor.u32 1.1754944e-38, %v1606_v1  ;;  %v1640_v19 = vmul.f32 %v7157_v14, %v1639_v12  ;;  %vm1643_vm6 = vweird.f32 %v7157_v14 }
 0x297   : > { %2129 = vmatpush.msrb.mxu0 %v1983_v21  ;;  %v1603_v10 = vsel %vm1602_vm4, %v7154_v49, %v1599_v58  ;;  %vm5423_vm7 = vcmp.eq.f32.partialorder %v1646_v54, 8.507059e+37  ;;  %v1569_v51 = vsub.f32 1.0, %v1568_v34  ;;  %vm1573_vm8 = vweird.f32 %v7160_v27  ;;  %vm1644_vm9 = vmor %vm1642_vm3, %vm1643_vm6  ;;  %v7171_v49 = vld [vmem:[#allocation28_spill] sm:$0xff]  ;;  %v7177_v34 = vld [vmem:[#allocation39_spill] sm:$0xff] }
 0x298   : > { %v1608_v31 = vsel %vm1605_vm5, %v1607_v11, %v1603_v10  ;;  %v1641_v42 = vadd.f32 %v7157_v14, %v1640_v19  ;;  %v1578_v45 = vand.u32 2147483648, %v7159_v48  ;;  %v1610_v63 = vmul.f32 %v7164_v38, %v7163_v56  ;;  %v3042_v19 = vld [vmem:[%s6758_s2 + $0x80] sm:$0xff] }
 0x299   : > { %v1978_v47 = vmul.f32 %v1608_v31, %v7165_v7  ;;  %v1649_v15 = vor.u32 1.1754944e-38, %v1648_v59  ;;  %v1570_v25 = vmul.f32 %v7160_v27, %v1569_v51  ;;  %v1576_v29 = vand.u32 2147483647, %v7159_v48  ;;  %v7175_v59 = vld [vmem:[#allocation27_spill] sm:$0xff]  ;;  %v7178_v7 = vld [vmem:[#allocation26_spill] sm:$0xff] }
 0x29a   : > { %v1645_v17 = vsel %vm1644_vm9, %v7157_v14, %v1641_v42  ;;  %vm1572_vm10 = vweird.f32 %v7159_v48  ;;  %v1579_v35 = vor.u32 1.1754944e-38, %v1578_v45  ;;  %v1611_v52 = vsub.f32 1.0, %v1610_v63  ;;  %v7174_v14 = vld [vmem:[#allocation9_spill] sm:$0xff]  ;;  %v7176_v48 = vld [vmem:[#allocation24_spill] sm:$0xff] }
 0x29b   : > { %2197 = vmatpush.msrb.mxu1 %v1978_v47  ;;  %v1650_v57 = vsel %vm5423_vm7, %v1649_v15, %v1645_v17  ;;  %v1571_v24 = vadd.f32 %v7160_v27, %v1570_v25  ;;  %v1618_v2 = vand.u32 2147483647, %v7163_v56  ;;  %v1620_v50 = vand.u32 2147483648, %v7163_v56  ;;  %vm1574_vm11 = vmor %vm1572_vm10, %vm1573_vm8 }
 0x29c   : > { %v1981_v43 = vmul.f32 %v1650_v57, %v7166_v8  ;;  %v1612_v40 = vmul.f32 %v7164_v38, %v1611_v52  ;;  %vm1615_vm12 = vweird.f32 %v7164_v38  ;;  %v1540_v9 = vmul.f32 %v7168_v61, %v7167_v28  ;;  %v7179_v52 = vld [vmem:[#allocation36_spill] sm:$0xff] }
 0x29d   : > { %v1575_v4 = vsel %vm1574_vm11, %v7160_v27, %v1571_v24  ;;  %vm1577_vm13 = vcmp.eq.f32.partialorder %v1576_v29, 8.507059e+37  ;;  %vm1614_vm14 = vweird.f32 %v7163_v56  ;;  %vm1619_vm15 = vcmp.eq.f32.partialorder %v1618_v2, 8.507059e+37  ;;  %v3043_v8 = vld [vmem:[%s6758_s2 + $0x88] sm:$0xff] }
 0x29e   : > { %2130 = vmatpush.msrb.mxu0 %v1981_v43  ;;  %v1580_v16 = vsel %vm1577_vm13, %v1579_v35, %v1575_v4  ;;  %v1613_v22 = vadd.f32 %v7164_v38, %v1612_v40  ;;  %v1541_v33 = vsub.f32 1.0, %v1540_v9  ;;  %vm1616_vm0 = vmor %vm1614_vm14, %vm1615_vm12  ;;  %v1621_v44 = vor.u32 1.1754944e-38, %v1620_v50  ;;  %v7180_v43 = vld [vmem:[#allocation33_spill] sm:$0xff]  ;;  %v3046_v9 = vld [vmem:[%s6758_s2 + $0xa0] sm:$0xff] }
 0x29f   : > { %v1976_v53 = vmul.f32 %v1580_v16, %v7169_v36  ;;  %v1550_v32 = vand.u32 2147483648, %v7167_v28  ;;  %v1582_v23 = vmul.f32 %v7171_v49, %v7170_v5  ;;  %vm1545_vm1 = vweird.f32 %v7168_v61  ;;  %v3047_v4 = vld [vmem:[%s6758_s2 + $0xa8] sm:$0xff]  ;;  %v3048_v16 = vld [vmem:[%s6758_s2 + $0xb0] sm:$0xff] }
 0x2a0   : > { %v1617_v41 = vsel %vm1616_vm0, %v7164_v38, %v1613_v22  ;;  %v1542_v55 = vmul.f32 %v7168_v61, %v1541_v33  ;;  %v1548_v13 = vand.u32 2147483647, %v7167_v28  ;;  %vm1544_vm2 = vweird.f32 %v7167_v28  ;;  %v3044_v28 = vld [vmem:[%s6758_s2 + $0x90] sm:$0xff]  ;;  %v3049_v22 = vld [vmem:[%s6758_s2 + $0xb8] sm:$0xff]  ;;  %v3050_v33 = vld [vmem:[%s6758_s2 + $0xc0] sm:$0xff] }
 0x2a1   : > { %2198 = vmatpush.msrb.mxu1 %v1976_v53  ;;  %v1622_v18 = vsel %vm1619_vm15, %v1621_v44, %v1617_v41  ;;  %v1583_v60 = vsub.f32 1.0, %v1582_v23  ;;  %vm1586_vm3 = vweird.f32 %v7170_v5  ;;  %v1592_v1 = vand.u32 2147483648, %v7170_v5  ;;  %vm1546_vm4 = vmor %vm1544_vm2, %vm1545_vm1  ;;  %v3051_v36 = vld [vmem:[%s6758_s2 + $0xc8] sm:$0xff]  ;;  %v3052_v53 = vld [vmem:[%s6758_s2 + $0xd0] sm:$0xff]  ;;  %v5547_v41 = vpop.permute.xlu2 %2116 }
 0x2a2   : > { %v1979_v37 = vmul.f32 %v1622_v18, %v7172_v6  ;;  %v1543_v62 = vadd.f32 %v7168_v61, %v1542_v55  ;;  %v1554_v3 = vmul.f32 %v7174_v14, %v7173_v46  ;;  %v1551_v39 = vor.u32 1.1754944e-38, %v1550_v32  ;;  %v3053_v44 = vld [vmem:[%s6758_s2 + $0xd8] sm:$0xff]  ;;  %v3054_v32 = vld [vmem:[%s6758_s2 + $0xe0] sm:$0xff] }
 0x2a3   : > { %v1584_v0 = vmul.f32 %v7171_v49, %v1583_v60  ;;  %vm1587_vm5 = vweird.f32 %v7171_v49  ;;  %v1590_v26 = vand.u32 2147483647, %v7170_v5  ;;  %vm1549_vm6 = vcmp.eq.f32.partialorder %v1548_v13, 8.507059e+37  ;;  %v3055_v5 = vld [vmem:[%s6758_s2 + $0xe8] sm:$0xff]  ;;  %v3057_v23 = vld [vmem:[%s6758_s2 + $0xf8] sm:$0xff] }
 0x2a4   : > { %2131 = vmatpush.msrb.mxu0 %v1979_v37  ;;  %v1547_v12 = vsel %vm1546_vm4, %v7168_v61, %v1543_v62  ;;  %v1555_v54 = vsub.f32 1.0, %v1554_v3  ;;  %vm1559_vm7 = vweird.f32 %v7174_v14  ;;  %v1564_v58 = vand.u32 2147483648, %v7173_v46  ;;  %vm1588_vm8 = vmor %vm1586_vm3, %vm1587_vm5  ;;  %v3045_v61 = vld [vmem:[%s6758_s2 + $0x98] sm:$0xff]  ;;  %v5553_v37 = vpop.permute.xlu1 %2106  ;;  %v5555_v62 = vpop.permute.xlu0 %2111 }
 0x2a5   : > { %v1552_v20 = vsel %vm1549_vm6, %v1551_v39, %v1547_v12  ;;  %v1585_v21 = vadd.f32 %v7171_v49, %v1584_v0  ;;  %v1526_v27 = vmul.f32 %v7176_v48, %v7175_v59  ;;  %v1593_v10 = vor.u32 1.1754944e-38, %v1592_v1 }
 0x2a6   : > { %v1974_v11 = vmul.f32 %v1552_v20, %v7177_v34  ;;  %v1556_v30 = vmul.f32 %v7174_v14, %v1555_v54  ;;  %v1562_v51 = vand.u32 2147483647, %v7173_v46  ;;  %vm1591_vm9 = vcmp.eq.f32.partialorder %v1590_v26, 8.507059e+37 }
 0x2a7   : > { %v1589_v31 = vsel %vm1588_vm8, %v7171_v49, %v1585_v21  ;;  %vm1558_vm10 = vweird.f32 %v7173_v46  ;;  %v1527_v42 = vsub.f32 1.0, %v1526_v27  ;;  %v1565_v38 = vor.u32 1.1754944e-38, %v1564_v58  ;;  %v3056_v49 = vld [vmem:[%s6758_s2 + $0xf0] sm:$0xff] }
 0x2a8   : > { %2199 = vmatpush.msrb.mxu1 %v1974_v11  ;;  %v1594_v45 = vsel %vm1591_vm9, %v1593_v10, %v1589_v31  ;;  %v1557_v56 = vadd.f32 %v7174_v14, %v1556_v30  ;;  %v1536_v63 = vand.u32 2147483648, %v7175_v59  ;;  %vm1560_vm11 = vmor %vm1558_vm10, %vm1559_vm7  ;;  %vm1531_vm12 = vweird.f32 %v7176_v48 }
 0x2a9   : > { %2200 = vmatmul.f32.vlgmr.msrb.gmra.mxu1 %v3042_v19  ;;  %v1977_v47 = vmul.f32 %v1594_v45, %v7178_v7  ;;  %v1528_v15 = vmul.f32 %v7176_v48, %v1527_v42  ;;  %v1534_v25 = vand.u32 2147483647, %v7175_v59  ;;  %vm1563_vm13 = vcmp.eq.f32.partialorder %v1562_v51, 8.507059e+37  ;;  %v5549_v13 = vpop.permute.xlu2 %2101 }
 0x2aa   : > { %v1561_v29 = vsel %vm1560_vm11, %v7174_v14, %v1557_v56  ;;  %vm1530_vm14 = vweird.f32 %v7175_v59  ;;  %v1537_v24 = vor.u32 1.1754944e-38, %v1536_v63 }
 0x2ab   : > { %2132 = vmatpush.msrb.mxu0 %v1977_v47  ;;  %v1566_v17 = vsel %vm1563_vm13, %v1565_v38, %v1561_v29  ;;  %v1529_v35 = vadd.f32 %v7176_v48, %v1528_v15  ;;  %vm1532_vm15 = vmor %vm1530_vm14, %vm1531_vm12  ;;  %vm1535_vm0 = vcmp.eq.f32.partialorder %v1534_v25, 8.507059e+37 }
 0x2ac   : > { %v1975_v57 = vmul.f32 %v1566_v17, %v7179_v52  ;;  %v5559_v3 = vpop.permute.xlu1 %2091  ;;  %v5561_v39 = vpop.permute.xlu0 %2096 }
 0x2ad   : > { %v1533_v2 = vsel %vm1532_vm15, %v7176_v48, %v1529_v35 }
 0x2ae   : > { %2133 = vmatpush.msrb.mxu0 %v1975_v57  ;;  %v1538_v50 = vsel %vm1535_vm0, %v1537_v24, %v1533_v2 }
 0x2af   : > { %v1973_v40 = vmul.f32 %v1538_v50, %v7180_v43 }
 0x2b1   : > { %2134 = vmatpush.msrb.mxu0 %v1973_v40  ;;  %2203 = vmatmul.f32.gmra.mxu1 %v3043_v8  ;;  %v5551_v6 = vpop.permute.xlu2 %2086 }
 0x2b2   : > { %2135 = vmatmul.f32.vlgmr.msrb.gmra.mxu0 %v3042_v19 }
 0x2b4   : > { %v5563_v54 = vpop.permute.xlu1 %2076  ;;  %v5565_v20 = vpop.permute.xlu0 %2081 }
 0x2b9   : > { %2206 = vmatmul.f32.gmra.mxu1 %v3044_v28  ;;  %v5557_v14 = vpop.permute.xlu2 %2071 }
 0x2ba   : > { %2138 = vmatmul.f32.gmra.mxu0 %v3043_v8 }
 0x2bc   : > { %v5567_v48 = vpop.permute.xlu1 %2061  ;;  %v5571_v34 = vpop.permute.xlu0 %2066 }
 0x2c1   : > { %2209 = vmatmul.f32.gmra.mxu1 %v3045_v61  ;;  %v2057_v12 = vpop.permute.xlu2 %2056 }
 0x2c2   : > { %2141 = vmatmul.f32.gmra.mxu0 %v3044_v28 }
 0x2c4   : > { %v2047_v51 = vpop.permute.xlu1 %2046  ;;  %v2052_v45 = vpop.permute.xlu0 %2051 }
 0x2c9   : > { %2212 = vmatmul.f32.gmra.mxu1 %v3046_v9  ;;  %v2042_v59 = vpop.permute.xlu2 %2041 }
 0x2ca   : > { %2144 = vmatmul.f32.gmra.mxu0 %v3045_v61 }
 0x2d1   : > { %2215 = vmatmul.f32.gmra.mxu1 %v3047_v4 }
 0x2d2   : > { %2147 = vmatmul.f32.gmra.mxu0 %v3046_v9 }
 0x2d9   : > { %2218 = vmatmul.f32.gmra.mxu1 %v3048_v16 }
 0x2da   : > { %2150 = vmatmul.f32.gmra.mxu0 %v3047_v4 }
 0x2e1   : > { %2221 = vmatmul.f32.gmra.mxu1 %v3049_v22 }
 0x2e2   : > { %2153 = vmatmul.f32.gmra.mxu0 %v3048_v16 }
 0x2e9   : > { %2224 = vmatmul.f32.gmra.mxu1 %v3050_v33 }
 0x2ea   : > { %2156 = vmatmul.f32.gmra.mxu0 %v3049_v22 }
 0x2f1   : > { %2227 = vmatmul.f32.gmra.mxu1 %v3051_v36 }
 0x2f2   : > { %2159 = vmatmul.f32.gmra.mxu0 %v3050_v33 }
 0x2f9   : > { %2230 = vmatmul.f32.gmra.mxu1 %v3052_v53 }
 0x2fa   : > { %2162 = vmatmul.f32.gmra.mxu0 %v3051_v36 }
 0x301   : > { %2233 = vmatmul.f32.gmra.mxu1 %v3053_v44 }
 0x302   : > { %2165 = vmatmul.f32.gmra.mxu0 %v3052_v53 }
 0x309   : > { %2236 = vmatmul.f32.gmra.mxu1 %v3054_v32 }
 0x30a   : > { %2168 = vmatmul.f32.gmra.mxu0 %v3053_v44 }
 0x311   : > { %2239 = vmatmul.f32.gmra.mxu1 %v3055_v5 }
 0x312   : > { %2171 = vmatmul.f32.gmra.mxu0 %v3054_v32 }
 0x319   : > { %2242 = vmatmul.f32.gmra.mxu1 %v3056_v49 }
 0x31a   : > { %2174 = vmatmul.f32.gmra.mxu0 %v3055_v5 }
 0x321   : > { %2245 = vmatmul.f32.gmra.mxu1 %v3057_v23 }
 0x322   : > { %2177 = vmatmul.f32.gmra.mxu0 %v3056_v49 }
 0x326   : > { %v2201_v55 = vpop.f32.mrf.mxu1 }
 0x327   : > { %v5569_v27 = vadd.f32 %v2201_v55, %v2042_v59 }
 0x329   : > { %7181 = vst [vmem:[#allocation34_spill] sm:$0xff] %v5569_v27  ;;  %v2250_v11 = vsub.f32 0.0, %v5569_v27 }
 0x32a   : > { %2180 = vmatmul.f32.gmra.mxu0 %v3057_v23 }
 0x32b   : > { %v2283_v10 = vmul.f32 1.442695, %v2250_v11 }
 0x32d   : > { %3381 = vpow2.f32 %v2283_v10 }
 0x32e   : > { %v2204_v60 = vpop.f32.mrf.mxu1 }
 0x32f   : > { %v2136_v18 = vpop.f32.mrf.mxu0  ;;  %v5576_v31 = vadd.f32 %v2204_v60, %v2047_v51 }
 0x330   : > { %v5578_v42 = vadd.f32 %v2136_v18, %v2042_v59 }
 0x331   : > { %7182 = vst [vmem:[#allocation50_spill] sm:$0xff] %v5576_v31  ;;  %v2252_v63 = vsub.f32 0.0, %v5576_v31 }
 0x332   : > { %7183 = vst [vmem:[#allocation52_spill] sm:$0xff] %v5578_v42  ;;  %v2249_v7 = vsub.f32 0.0, %v5578_v42 }
 0x333   : > { %v3382_v47 = vpop.eup %3381  ;;  %v2287_v29 = vmul.f32 1.442695, %v2252_v63 }
 0x334   : > { %v2281_v17 = vmul.f32 1.442695, %v2249_v7  ;;  %v5589_v35 = vadd.f32 1.0, %v3382_v47 }
 0x335   : > { %3383 = vpow2.f32 %v2287_v29 }
 0x336   : > { %v2207_v46 = vpop.f32.mrf.mxu1  ;;  %3385 = vpow2.f32 %v2281_v17  ;;  %vm2396_vm1 = vweird.f32 %v5589_v35 }
 0x337   : > { %v2139_v1 = vpop.f32.mrf.mxu0  ;;  %v5580_v56 = vadd.f32 %v2207_v46, %v2052_v45  ;;  %3387 = vrcp.f32 %v5589_v35 }
 0x338   : > { %v5591_v52 = vadd.f32 %v2139_v1, %v2047_v51 }
 0x339   : > { %7184 = vst [vmem:[#allocation21_spill] sm:$0xff] %v5580_v56  ;;  %v2254_v15 = vsub.f32 0.0, %v5580_v56 }
 0x33a   : > { %7185 = vst [vmem:[#allocation23_spill] sm:$0xff] %v5591_v52  ;;  %v2251_v2 = vsub.f32 0.0, %v5591_v52 }
 0x33b   : > { %v2291_v57 = vmul.f32 1.442695, %v2254_v15  ;;  %v3384_v40 = vpop.eup %3383 }
 0x33c   : > { %v2285_v28 = vmul.f32 1.442695, %v2251_v2  ;;  %v3386_v61 = vpop.eup %3385  ;;  %v5606_v22 = vadd.f32 1.0, %v3384_v40  ;;  %v2400_v40 = vand.u32 2147483647, %v5589_v35 }
 0x33d   : > { %3389 = vpow2.f32 %v2291_v57  ;;  %v5604_v4 = vpop.eup %3387  ;;  %v5609_v36 = vadd.f32 1.0, %v3386_v61 }
 0x33e   : > { %v2210_v26 = vpop.f32.mrf.mxu1  ;;  %3391 = vpow2.f32 %v2285_v28  ;;  %v2392_v53 = vmul.f32 %v5604_v4, %v5589_v35  ;;  %vm2397_vm2 = vweird.f32 %v5604_v4  ;;  %v2402_v28 = vand.u32 2147483648, %v5589_v35 }
 0x33f   : > { %v2142_v0 = vpop.f32.mrf.mxu0  ;;  %v5597_v50 = vadd.f32 %v2210_v26, %v2057_v12  ;;  %7188 = vst [vmem:[#allocation51_spill] sm:$0xff] %v5609_v36  ;;  %3393 = vrcp.f32 %v5606_v22  ;;  %vm5679_vm3 = vmor %vm2396_vm1, %vm2397_vm2  ;;  %vm2401_vm4 = vcmp.eq.f32.partialorder %v2400_v40, 8.507059e+37  ;;  %vm2424_vm5 = vweird.f32 %v5606_v22 }
 0x340   : > { %v5599_v8 = vadd.f32 %v2142_v0, %v2052_v45  ;;  %3395 = vrcp.f32 %v5609_v36  ;;  %v2393_v60 = vsub.f32 1.0, %v2392_v53  ;;  %v2430_v53 = vand.u32 2147483648, %v5606_v22 }
 0x341   : > { %7186 = vst [vmem:[#allocation45_spill] sm:$0xff] %v5597_v50  ;;  %v2256_v9 = vsub.f32 0.0, %v5597_v50 }
 0x342   : > { %7187 = vst [vmem:[#allocation48_spill] sm:$0xff] %v5599_v8  ;;  %v2253_v33 = vsub.f32 0.0, %v5599_v8 }
 0x343   : > { %v3390_v16 = vpop.eup %3389  ;;  %v2295_v44 = vmul.f32 1.442695, %v2256_v9 }
 0x344   : > { %v5615_v5 = vadd.f32 1.0, %v3390_v16  ;;  %v2289_v23 = vmul.f32 1.442695, %v2253_v33  ;;  %v3392_v46 = vpop.eup %3391  ;;  %v2428_v33 = vand.u32 2147483647, %v5606_v22 }
 0x345   : > { %3397 = vpow2.f32 %v2295_v44  ;;  %v5636_v59 = vadd.f32 1.0, %v3392_v46 }
 0x346   : > { %v2213_v58 = vpop.f32.mrf.mxu1  ;;  %3399 = vrcp.f32 %v5615_v5  ;;  %vm5704_vm6 = vcmp.eq.f32.partialorder %v2428_v33, 8.507059e+37  ;;  %vm2452_vm8 = vweird.f32 %v5615_v5 }
 0x347   : > { %v2145_v21 = vpop.f32.mrf.mxu0  ;;  %v5618_v49 = vadd.f32 %v2213_v58, %v5567_v48  ;;  %3401 = vpow2.f32 %v2289_v23  ;;  %v2394_v58 = vmul.f32 %v5604_v4, %v2393_v60  ;;  %7192 = vst [vmem:[#allocation7_spill] sm:$0xff] %v5636_v59 }
 0x348   : > { %v5621_v55 = vadd.f32 %v2145_v21, %v2057_v12  ;;  %v5633_v21 = vpop.eup %3393  ;;  %3403 = vrcp.f32 %v5636_v59 }
 0x349   : > { %7189 = vst [vmem:[#allocation43_spill] sm:$0xff] %v5618_v49  ;;  %v2258_v0 = vsub.f32 0.0, %v5618_v49  ;;  %v5638_v11 = vpop.eup %3395  ;;  %v2420_v47 = vmul.f32 %v5633_v21, %v5606_v22  ;;  %v2395_v17 = vadd.f32 %v5604_v4, %v2394_v58  ;;  %vm2425_vm7 = vweird.f32 %v5633_v21 }
 0x34a   : > { %7190 = vst [vmem:[#allocation30_spill] sm:$0xff] %v5621_v55  ;;  %v2255_v26 = vsub.f32 0.0, %v5621_v55  ;;  %vm5741_vm9 = vmor %vm2424_vm5, %vm2425_vm7 }
 0x34b   : > { %7193 = vst [vmem:[#allocation35_spill] sm:$0xff] %v5638_v11  ;;  %v2299_v10 = vmul.f32 1.442695, %v2258_v0  ;;  %v3398_v51 = vpop.eup %3397  ;;  %v2399_v23 = vsel %vm5679_vm3, %v5604_v4, %v2395_v17  ;;  %v2403_v0 = vor.u32 1.1754944e-38, %v2402_v28 }
 0x34c   : > { %v2293_v45 = vmul.f32 1.442695, %v2255_v26  ;;  %v5646_v7 = vpop.eup %3399 }
 0x34d   : > { %v3402_v29 = vpop.eup %3401  ;;  %3405 = vpow2.f32 %v2299_v10  ;;  %v2448_v61 = vmul.f32 %v5646_v7, %v5615_v5  ;;  %vm2453_vm10 = vweird.f32 %v5646_v7 }
 0x34e   : > { %v2216_v30 = vpop.f32.mrf.mxu1  ;;  %3407 = vpow2.f32 %v2293_v45  ;;  %v5673_v16 = vadd.f32 1.0, %v3402_v29  ;;  %v5691_v35 = vpop.eup %3403  ;;  %v5695_v45 = vsel %vm2401_vm4, %v2403_v0, %v2399_v23  ;;  %vm5771_vm11 = vmor %vm2452_vm8, %vm2453_vm10 }
 0x34f   : > { %v5574_v19 = vpop.f32.mrf.mxu0  ;;  %v5625_v18 = vadd.f32 %v2216_v30, %v5571_v34  ;;  %7200 = vst [vmem:[#allocation15_spill] sm:$0xff] %v5691_v35  ;;  %v2449_v26 = vsub.f32 1.0, %v2448_v61  ;;  %v2406_v40 = vmul.f32 %v5691_v35, %v5636_v59 }
 0x350   : > { %v5642_v30 = vadd.f32 %v5574_v19, %v5567_v48  ;;  %v5658_v19 = vadd.f32 1.0, %v3398_v51  ;;  %7197 = vst [vmem:[#allocation8_spill] sm:$0xff] %v5673_v16 }
 0x351   : > { %7191 = vst [vmem:[#allocation22_spill] sm:$0xff] %v5625_v18  ;;  %v2260_v12 = vsub.f32 0.0, %v5625_v18 }
 0x352   : > { %7194 = vst [vmem:[#allocation11_spill] sm:$0xff] %v5642_v30  ;;  %v2257_v57 = vsub.f32 0.0, %v5642_v30  ;;  %vm2480_vm13 = vweird.f32 %v5658_v19 }
 0x353   : > { %v2303_v15 = vmul.f32 1.442695, %v2260_v12  ;;  %v3406_v12 = vpop.eup %3405  ;;  %7201 = vst [vmem:[#allocation12_spill] sm:$0xff] %v5695_v45 }
 0x354   : > { %v2297_v60 = vmul.f32 1.442695, %v2257_v57  ;;  %v3408_v51 = vpop.eup %3407  ;;  %v2431_v57 = vor.u32 1.1754944e-38, %v2430_v53 }
 0x355   : > { %3409 = vpow2.f32 %v2303_v15  ;;  %v5721_v53 = vadd.f32 1.0, %v3408_v51 }
 0x356   : > { %v5587_v25 = vpop.f32.mrf.mxu1  ;;  %3411 = vrcp.f32 %v5658_v19 }
 0x357   : > { %v5582_v38 = vpop.f32.mrf.mxu0  ;;  %v5663_v2 = vadd.f32 %v5587_v25, %v5557_v14  ;;  %3413 = vrcp.f32 %v5673_v16  ;;  %7207 = vst [vmem:[#allocation25_spill] sm:$0xff] %v5721_v53 }
 0x358   : > { %v5656_v48 = vadd.f32 %v5582_v38, %v5571_v34  ;;  %v2378_v34 = vmul.f32 %v5638_v11, %v5609_v36  ;;  %v2421_v38 = vsub.f32 1.0, %v2420_v47  ;;  %3415 = vpow2.f32 %v2297_v60 }
 0x359   : > { %7196 = vst [vmem:[#allocation18_spill] sm:$0xff] %v5663_v2  ;;  %v2262_v46 = vsub.f32 0.0, %v5663_v2 }
 0x35a   : > { %7195 = vst [vmem:[#allocation49_spill] sm:$0xff] %v5656_v48  ;;  %v2259_v44 = vsub.f32 0.0, %v5656_v48  ;;  %v2379_v58 = vsub.f32 1.0, %v2378_v34  ;;  %v2422_v10 = vmul.f32 %v5633_v21, %v2421_v38  ;;  %v5713_v34 = vadd.f32 1.0, %v3406_v12 }
 0x35b   : > { %v3410_v29 = vpop.eup %3409  ;;  %v2307_v28 = vmul.f32 1.442695, %v2262_v46  ;;  %v2456_v12 = vand.u32 2147483647, %v5615_v5  ;;  %v7231_v48 = vmov 0 }
 0x35c   : > { %v2301_v4 = vmul.f32 1.442695, %v2259_v44  ;;  %v5715_v38 = vpop.eup %3411  ;;  %v5718_v25 = vmul.f32 %v5638_v11, %v2379_v58  ;;  %v2423_v33 = vadd.f32 %v5633_v21, %v2422_v10  ;;  %v5728_v23 = vadd.f32 1.0, %v3410_v29 }
 0x35d   : > { %7205 = vst [vmem:[#allocation37_spill] sm:$0xff] %v5715_v38  ;;  %v5733_v0 = vpop.eup %3413  ;;  %v2458_v58 = vand.u32 2147483648, %v5615_v5  ;;  %v2476_v10 = vmul.f32 %v5715_v38, %v5658_v19  ;;  %vm5775_vm12 = vcmp.eq.f32.partialorder %v2456_v12, 8.507059e+37  ;;  %vm2481_vm14 = vweird.f32 %v5715_v38 }
 0x35e   : > { %v5601_v43 = vpop.f32.mrf.mxu1  ;;  %7206 = vst [vmem:[#allocation40_spill] sm:$0xff] %v5718_v25  ;;  %3417 = vpow2.f32 %v2301_v4  ;;  %v3416_v51 = vpop.eup %3415  ;;  %v2427_v4 = vsel %vm5741_vm9, %v5633_v21, %v2423_v33  ;;  %vm5855_vm15 = vmor %vm2480_vm13, %vm2481_vm14  ;;  %vm2508_vm0 = vweird.f32 %v5713_v34  ;;  %vm2536_vm2 = vweird.f32 %v5728_v23 }
 0x35f   : > { %v5593_v24 = vpop.f32.mrf.mxu0  ;;  %v5700_v47 = vadd.f32 %v5601_v43, %v5563_v54  ;;  %v2450_v43 = vmul.f32 %v5646_v7, %v2449_v26  ;;  %7209 = vst [vmem:[#allocation41_spill] sm:$0xff] %v5733_v0  ;;  %v2407_v26 = vsub.f32 1.0, %v2406_v40  ;;  %3419 = vpow2.f32 %v2307_v28 }
 0x360   : > { %v5725_v44 = vadd.f32 %v5593_v24, %v5557_v14  ;;  %3421 = vrcp.f32 %v5713_v34  ;;  %v2434_v40 = vmul.f32 %v5733_v0, %v5673_v16  ;;  %v2459_v14 = vor.u32 1.1754944e-38, %v2458_v58 }
 0x361   : > { %7202 = vst [vmem:[#allocation47_spill] sm:$0xff] %v5700_v47  ;;  %v2264_v60 = vsub.f32 0.0, %v5700_v47  ;;  %v2451_v24 = vadd.f32 %v5646_v7, %v2450_v43  ;;  %3423 = vrcp.f32 %v5721_v53  ;;  %v5767_v21 = vmul.f32 %v5691_v35, %v2407_v26 }
 0x362   : > { %7208 = vst [vmem:[#allocation6_spill] sm:$0xff] %v5725_v44  ;;  %v2261_v22 = vsub.f32 0.0, %v5725_v44  ;;  %3425 = vrcp.f32 %v5728_v23  ;;  %v5785_v26 = vsel %vm5704_vm6, %v2431_v57, %v2427_v4  ;;  %v2477_v61 = vsub.f32 1.0, %v2476_v10 }
 0x363   : > { %v2311_v28 = vmul.f32 1.442695, %v2264_v60  ;;  %7214 = vst [vmem:[#allocation32_spill] sm:$0xff] %v5767_v21  ;;  %v2455_v5 = vsel %vm5771_vm11, %v5646_v7, %v2451_v24  ;;  %v5790_v42 = vadd.f32 1.0, %v3416_v51  ;;  %v2435_v57 = vsub.f32 1.0, %v2434_v40 }
 0x364   : > { %7220 = vst [vmem:[#allocation16_spill] sm:$0xff] %v5785_v26  ;;  %v5805_v10 = vsel %vm5775_vm12, %v2459_v14, %v2455_v5  ;;  %v2478_v40 = vmul.f32 %v5715_v38, %v2477_v61  ;;  %v7232_v48 = vsel %vm5855_vm15, 4294967295, %v7231_v48 }
 0x365   : > { %7221 = vst [vmem:[#allocation17_spill] sm:$0xff] %v5790_v42  ;;  %3427 = vpow2.f32 %v2311_v28  ;;  %v5826_v51 = vmul.f32 %v5733_v0, %v2435_v57 }
 0x366   : > { %v5627_v1 = vpop.f32.mrf.mxu1  ;;  %7224 = vst [vmem:[#allocation20_spill] sm:$0xff] %v5805_v10  ;;  %3429 = vrcp.f32 %v5790_v42 }
 0x367   : > { %v5613_v32 = vpop.f32.mrf.mxu0  ;;  %v5757_v29 = vadd.f32 %v5627_v1, %v5565_v20  ;;  %7228 = vst [vmem:[#allocation31_spill] sm:$0xff] %v5826_v51 }
 0x368   : > { %v5781_v60 = vadd.f32 %v5613_v32, %v5563_v54  ;;  %v2486_v54 = vand.u32 2147483648, %v5658_v19  ;;  %v2305_v32 = vmul.f32 1.442695, %v2261_v22  ;;  %7233 = vst [vmem:[#allocation10_spill] sm:$0xff] %v7232_v48 }
 0x369   : > { %7212 = vst [vmem:[#allocation13_spill] sm:$0xff] %v5757_v29  ;;  %v2266_v8 = vsub.f32 0.0, %v5757_v29 }
 0x36a   : > { %7219 = vst [vmem:[#allocation19_spill] sm:$0xff] %v5781_v60  ;;  %v2263_v22 = vsub.f32 0.0, %v5781_v60  ;;  %v5821_v14 = vor.u32 1.1754944e-38, %v2486_v54  ;;  %3431 = vpow2.f32 %v2305_v32  ;;  %v5839_v32 = vadd.f32 %v5715_v38, %v2478_v40 }
 0x36b   : > { %v2315_v5 = vmul.f32 1.442695, %v2266_v8 }
 0x36c   : > { %7227 = vst [vmem:[#allocation44_spill] sm:$0xff] %v5821_v14 }
 0x36d   : > { %7229 = vst [vmem:[#allocation28_spill] sm:$0xff] %v5839_v32 }
 0x36e   : > { %v5669_v9 = vpop.f32.mrf.mxu1 }
 0x36f   : > { %v5644_v63 = vpop.f32.mrf.mxu0  ;;  %v5764_v43 = vadd.f32 %v5669_v9, %v5551_v6  ;;  %v3418_v9 = vpop.eup %3417 }
 0x370   : > { %v3420_v52 = vpop.eup %3419  ;;  %v5808_v4 = vadd.f32 1.0, %v3418_v9  ;;  %v5819_v58 = vadd.f32 %v5644_v63, %v5565_v20  ;;  %v2309_v63 = vmul.f32 1.442695, %v2263_v22 }
 0x371   : > { %7213 = vst [vmem:[#allocation46_spill] sm:$0xff] %v5764_v43  ;;  %v5797_v17 = vpop.eup %3421  ;;  %v2268_v7 = vsub.f32 0.0, %v5764_v43  ;;  %v5815_v28 = vadd.f32 1.0, %v3420_v52  ;;  %v2514_v52 = vand.u32 2147483648, %v5713_v34 }
 0x372   : > { %7222 = vst [vmem:[#allocation5_spill] sm:$0xff] %v5797_v17  ;;  %v5801_v24 = vpop.eup %3423  ;;  %v2504_v9 = vmul.f32 %v5797_v17, %v5713_v34  ;;  %3433 = vrcp.f32 %v5808_v4  ;;  %v2265_v57 = vsub.f32 0.0, %v5819_v58  ;;  %vm2509_vm1 = vweird.f32 %v5797_v17 }
 0x373   : > { %7223 = vst [vmem:[#allocation42_spill] sm:$0xff] %v5801_v24  ;;  %v5811_v33 = vpop.eup %3425  ;;  %v2462_v61 = vmul.f32 %v5801_v24, %v5721_v53  ;;  %v2319_v55 = vmul.f32 1.442695, %v2268_v7  ;;  %3435 = vrcp.f32 %v5815_v28  ;;  %v5850_v26 = vor.u32 1.1754944e-38, %v2514_v52  ;;  %vm5924_vm5 = vmor %vm2508_vm0, %vm2509_vm1 }
 0x374   : > { %7225 = vst [vmem:[#allocation38_spill] sm:$0xff] %v5808_v4  ;;  %v2532_v20 = vmul.f32 %v5811_v33, %v5728_v23  ;;  %v3428_v8 = vpop.eup %3427  ;;  %v2505_v45 = vsub.f32 1.0, %v2504_v9  ;;  %3437 = vpow2.f32 %v2315_v5  ;;  %v2542_v7 = vand.u32 2147483648, %v5728_v23 }
 0x375   : > { %7226 = vst [vmem:[#allocation14_spill] sm:$0xff] %v5819_v58  ;;  %v2463_v30 = vsub.f32 1.0, %v2462_v61  ;;  %3439 = vpow2.f32 %v2319_v55  ;;  %v5860_v5 = vadd.f32 1.0, %v3428_v8  ;;  %v2313_v40 = vmul.f32 1.442695, %v2265_v57 }
 0x376   : > { %v5731_v46 = vpop.f32.mrf.mxu1  ;;  %7230 = vst [vmem:[#allocation29_spill] sm:$0xff] %v5850_v26  ;;  %v2533_v9 = vsub.f32 1.0, %v2532_v20  ;;  %3441 = vpow2.f32 %v2309_v63  ;;  %v2506_v25 = vmul.f32 %v5797_v17, %v2505_v45  ;;  %v2540_v63 = vand.u32 2147483647, %v5728_v23 }
 0x377   : > { %v5702_v15 = vpop.f32.mrf.mxu0  ;;  %v5836_v54 = vadd.f32 %v5731_v46, %v5559_v3  ;;  %v5848_v46 = vpop.eup %3429  ;;  %v5881_v52 = vmul.f32 %v5801_v24, %v2463_v30  ;;  %3443 = vrcp.f32 %v5860_v5  ;;  %v2543_v50 = vor.u32 1.1754944e-38, %v2542_v7 }
 0x378   : > { %v3432_v31 = vpop.eup %3431  ;;  %v2490_v20 = vmul.f32 %v5848_v46, %v5790_v42  ;;  %v5888_v45 = vadd.f32 %v5702_v15, %v5551_v6  ;;  %v2534_v44 = vmul.f32 %v5811_v33, %v2533_v9  ;;  %3445 = vpow2.f32 %v2313_v40 }
 0x379   : > { %v2270_v61 = vsub.f32 0.0, %v5836_v54  ;;  %v5869_v27 = vpop.eup %3433  ;;  %7235 = vst [vmem:[#allocation27_spill] sm:$0xff] %v5881_v52  ;;  %v5884_v57 = vadd.f32 1.0, %v3432_v31  ;;  %v5900_v15 = vadd.f32 %v5797_v17, %v2506_v25  ;;  %vm2537_vm3 = vweird.f32 %v5811_v33 }
 0x37a   : > { %v5878_v56 = vpop.eup %3435  ;;  %7236 = vst [vmem:[#allocation24_spill] sm:$0xff] %v5888_v45  ;;  %v2518_v30 = vmul.f32 %v5869_v27, %v5808_v4  ;;  %v2491_v9 = vsub.f32 1.0, %v2490_v20  ;;  %vm5903_vm4 = vcmp.eq.f32.partialorder %v2540_v63, 8.507059e+37  ;;  %v2535_v25 = vadd.f32 %v5811_v33, %v2534_v44  ;;  %vm5946_vm6 = vmor %vm2536_vm2, %vm2537_vm3 }
 0x37b   : > { %7234 = vst [vmem:[#allocation9_spill] sm:$0xff] %v5878_v56  ;;  %v3438_v55 = vpop.eup %3437  ;;  %3447 = vrcp.f32 %v5884_v57  ;;  %v2570_v23 = vand.u32 2147483648, %v5815_v28  ;;  %vm2564_vm7 = vweird.f32 %v5815_v28  ;;  %v2598_v48 = vand.u32 2147483648, %v5860_v5 }
 0x37c   : > { %v3440_v21 = vpop.eup %3439  ;;  %7238 = vst [vmem:[#allocation26_spill] sm:$0xff] %v5900_v15  ;;  %v5909_v40 = vadd.f32 1.0, %v3438_v55  ;;  %v7241_v55 = vmov 0  ;;  %v2519_v51 = vsub.f32 1.0, %v2518_v30  ;;  %vm2565_vm8 = vweird.f32 %v5878_v56 }
 0x37d   : > { %v3442_v6 = vpop.eup %3441  ;;  %v5918_v20 = vadd.f32 1.0, %v3440_v21  ;;  %v7242_v55 = vsel %vm5924_vm5, 4294967295, %v7241_v55  ;;  %v5980_v38 = vor.u32 1.1754944e-38, %v2570_v23  ;;  %vm6027_vm9 = vmor %vm2564_vm7, %vm2565_vm8  ;;  %vm2592_vm12 = vweird.f32 %v5860_v5 }
 0x37e   : > { %v2234_v1 = vpop.f32.mrf.mxu1  ;;  %7243 = vst [vmem:[#allocation36_spill] sm:$0xff] %v7242_v55  ;;  %v5929_v49 = vadd.f32 1.0, %v3442_v6  ;;  %v5932_v58 = vpop.eup %3443  ;;  %vm2620_vm11 = vweird.f32 %v5909_v40 }
 0x37f   : > { %v5792_v12 = vpop.f32.mrf.mxu0  ;;  %v5876_v8 = vadd.f32 %v2234_v1, %v5561_v39  ;;  %v2323_v1 = vmul.f32 1.442695, %v2270_v61  ;;  %v2560_v61 = vmul.f32 %v5878_v56, %v5815_v28  ;;  %7244 = vst [vmem:[#allocation33_spill] sm:$0xff] %v5932_v58  ;;  %v3446_v30 = vpop.eup %3445  ;;  %vm2593_vm10 = vweird.f32 %v5932_v58 }
 0x380   : > { %v5897_v31 = vadd.f32 %v5792_v12, %v5559_v3  ;;  %v2267_v3 = vsub.f32 0.0, %v5888_v45  ;;  %7250 = vst [vmem:[#allocation56_spill] sm:$0xff] %v5980_v38  ;;  %vm2648_vm0 = vweird.f32 %v5918_v20  ;;  %vm6121_vm3 = vmor %vm2592_vm12, %vm2593_vm10 }
 0x381   : > { %v2272_v7 = vsub.f32 0.0, %v5876_v8  ;;  %3449 = vpow2.f32 %v2323_v1  ;;  %v5939_v1 = vmul.f32 %v5848_v46, %v2491_v9  ;;  %v2561_v52 = vsub.f32 1.0, %v2560_v61  ;;  %v5961_v14 = vpop.eup %3447 }
 0x382   : > { %7237 = vst [vmem:[#allocation39_spill] sm:$0xff] %v5897_v31  ;;  %v2269_v44 = vsub.f32 0.0, %v5897_v31  ;;  %3451 = vrcp.f32 %v5909_v40  ;;  %v5972_v61 = vadd.f32 1.0, %v3446_v30 }
 0x383   : > { %7245 = vst [vmem:[#allocation53_spill] sm:$0xff] %v5939_v1  ;;  %v2327_v36 = vmul.f32 1.442695, %v2272_v7  ;;  %v2539_v7 = vsel %vm5946_vm6, %v5811_v33, %v2535_v25  ;;  %3453 = vrcp.f32 %v5918_v20  ;;  %v2588_v25 = vmul.f32 %v5932_v58, %v5860_v5 }
 0x384   : > { %3455 = vrcp.f32 %v5929_v49  ;;  %v2562_v6 = vmul.f32 %v5878_v56, %v2561_v52  ;;  %v2546_v33 = vmul.f32 %v5961_v14, %v5884_v57  ;;  %v6006_v1 = vor.u32 1.1754944e-38, %v2598_v48 }
 0x385   : > { %3457 = vpow2.f32 %v2327_v36  ;;  %v2589_v52 = vsub.f32 1.0, %v2588_v25 }
 0x386   : > { %v2237_v10 = vpop.f32.mrf.mxu1  ;;  %v2547_v45 = vsub.f32 1.0, %v2546_v33  ;;  %7254 = vst [vmem:[#allocation60_spill] sm:$0xff] %v6006_v1  ;;  %v2626_v33 = vand.u32 2147483648, %v5909_v40 }
 0x387   : > { %v5846_v22 = vpop.f32.mrf.mxu0  ;;  %v5913_v12 = vadd.f32 %v2237_v10, %v5549_v13  ;;  %v2317_v10 = vmul.f32 1.442695, %v2267_v3  ;;  %v2520_v3 = vmul.f32 %v5869_v27, %v2519_v51  ;;  %v3450_v32 = vpop.eup %3449  ;;  %v5976_v51 = vsel %vm5903_vm4, %v2543_v50, %v2539_v7 }
 0x388   : > { %v5953_v21 = vadd.f32 %v5846_v22, %v5561_v39  ;;  %v2321_v39 = vmul.f32 1.442695, %v2269_v44  ;;  %7249 = vst [vmem:[#allocation55_spill] sm:$0xff] %v5976_v51  ;;  %v5985_v30 = vpop.eup %3451  ;;  %v5990_v50 = vadd.f32 1.0, %v3450_v32  ;;  %v6042_v48 = vmul.f32 %v5961_v14, %v2547_v45 }
 0x389   : > { %v2274_v9 = vsub.f32 0.0, %v5913_v12  ;;  %3459 = vpow2.f32 %v2317_v10  ;;  %v5988_v36 = vadd.f32 %v5869_v27, %v2520_v3  ;;  %v5993_v10 = vpop.eup %3453  ;;  %v2616_v25 = vmul.f32 %v5985_v30, %v5909_v40 }
 0x38a   : > { %7248 = vst [vmem:[#allocation54_spill] sm:$0xff] %v5953_v21  ;;  %v2271_v44 = vsub.f32 0.0, %v5953_v21  ;;  %3461 = vpow2.f32 %v2321_v39  ;;  %v5998_v23 = vpop.eup %3455  ;;  %vm2621_vm13 = vweird.f32 %v5985_v30  ;;  %vm2649_vm1 = vweird.f32 %v5993_v10 }
 0x38b   : > { %7251 = vst [vmem:[#allocation57_spill] sm:$0xff] %v5988_v36  ;;  %3463 = vrcp.f32 %v5972_v61  ;;  %v3458_v39 = vpop.eup %3457  ;;  %v6004_v36 = vadd.f32 %v5878_v56, %v2562_v6  ;;  %v7256_v6 = vmov 0  ;;  %v2617_v11 = vsub.f32 1.0, %v2616_v25  ;;  %vm6110_vm2 = vmor %vm2620_vm11, %vm2621_vm13 }
 0x38c   : > { %v2325_v51 = vmul.f32 1.442695, %v2271_v44  ;;  %v2644_v44 = vmul.f32 %v5993_v10, %v5918_v20  ;;  %v7257_v6 = vsel %vm6027_vm9, 4294967295, %v7256_v6  ;;  %7259 = vst [vmem:[#allocation63_spill] sm:$0xff] %v6042_v48  ;;  %vm6136_vm4 = vmor %vm2648_vm0, %vm2649_vm1  ;;  %v2680_v56 = vand.u32 2147483647, %v5990_v50 }
 0x38d   : > { %7253 = vst [vmem:[#allocation59_spill] sm:$0xff] %v6004_v36  ;;  %vm2676_vm7 = vweird.f32 %v5990_v50 }
 0x38e   : > { %v2240_v18 = vpop.f32.mrf.mxu1  ;;  %7258 = vst [vmem:[#allocation62_spill] sm:$0xff] %v7257_v6  ;;  %vm6186_vm10 = vcmp.eq.f32.partialorder %v2680_v56, 8.507059e+37 }
 0x38f   : > { %v2172_v63 = vpop.f32.mrf.mxu0  ;;  %v5966_v22 = vadd.f32 %v2240_v18, %v5553_v37  ;;  %v2331_v18 = vmul.f32 1.442695, %v2274_v9  ;;  %v3460_v9 = vpop.eup %3459 }
 0x390   : > { %v6001_v32 = vadd.f32 %v2172_v63, %v5549_v13  ;;  %v6019_v63 = vmul.f32 %v5998_v23, %v5929_v49  ;;  %v6044_v2 = vadd.f32 1.0, %v3460_v9 }
 0x391   : > { %v2276_v60 = vsub.f32 0.0, %v5966_v22  ;;  %3465 = vpow2.f32 %v2331_v18  ;;  %v3462_v18 = vpop.eup %3461 }
 0x392   : > { %7252 = vst [vmem:[#allocation58_spill] sm:$0xff] %v6001_v32  ;;  %3467 = vrcp.f32 %v5990_v50  ;;  %v6035_v59 = vpop.eup %3463  ;;  %v6053_v45 = vadd.f32 1.0, %v3462_v18 }
 0x393   : > { %v2335_v3 = vmul.f32 1.442695, %v2276_v60  ;;  %v6032_v60 = vadd.f32 1.0, %v3458_v39  ;;  %v2645_v39 = vsub.f32 1.0, %v2644_v44  ;;  %v2602_v18 = vmul.f32 %v6035_v59, %v5972_v61 }
 0x395   : > { %3469 = vpow2.f32 %v2335_v3  ;;  %v6051_v3 = vor.u32 1.1754944e-38, %v2626_v33  ;;  %v2618_v33 = vmul.f32 %v5985_v30, %v2617_v11  ;;  %v2646_v44 = vmul.f32 %v5993_v10, %v2645_v39 }
 0x396   : > { %3471 = vpow2.f32 %v2325_v51  ;;  %v2243_v26 = vpop.f32.mrf.mxu1  ;;  %v2624_v51 = vand.u32 2147483647, %v5909_v40  ;;  %v2603_v39 = vsub.f32 1.0, %v2602_v18  ;;  %vm2704_vm12 = vweird.f32 %v6032_v60 }
 0x397   : > { %v2175_v7 = vpop.f32.mrf.mxu0  ;;  %v6056_v9 = vadd.f32 %v2243_v26, %v5555_v62  ;;  %3473 = vrcp.f32 %v6032_v60 }
 0x398   : > { %v6015_v13 = vadd.f32 %v2175_v7, %v5553_v37  ;;  %v2590_v37 = vmul.f32 %v5932_v58, %v2589_v52  ;;  %v2273_v7 = vsub.f32 0.0, %v6001_v32  ;;  %v3466_v52 = vpop.eup %3465  ;;  %3475 = vrcp.f32 %v6044_v2 }
 0x399   : > { %v6058_v25 = vpop.eup %3467  ;;  %v6070_v26 = vadd.f32 1.0, %v3466_v52  ;;  %vm6075_vm14 = vcmp.eq.f32.partialorder %v2624_v51, 8.507059e+37  ;;  %3477 = vrcp.f32 %v6053_v45  ;;  %v2278_v52 = vsub.f32 0.0, %v6056_v9 }
 0x39a   : > { %7255 = vst [vmem:[#allocation61_spill] sm:$0xff] %v6015_v13  ;;  %v2275_v15 = vsub.f32 0.0, %v6015_v13  ;;  %v6061_v55 = vadd.f32 %v5932_v58, %v2590_v37  ;;  %v2329_v17 = vmul.f32 1.442695, %v2273_v7  ;;  %v2652_v37 = vand.u32 2147483647, %v5918_v20 }
 0x39b   : > { %v3470_v31 = vpop.eup %3469  ;;  %v2619_v51 = vadd.f32 %v5985_v30, %v2618_v33  ;;  %vm2677_vm8 = vweird.f32 %v6058_v25  ;;  %vm2732_vm1 = vweird.f32 %v6070_v26 }
 0x39c   : > { %7260 = vst [vmem:[#allocation64_spill] sm:$0xff] %v6061_v55  ;;  %v3472_v16 = vpop.eup %3471  ;;  %v2333_v35 = vmul.f32 1.442695, %v2275_v15  ;;  %v6080_v11 = vadd.f32 1.0, %v3470_v31  ;;  %v2672_v15 = vmul.f32 %v6058_v25, %v5990_v50  ;;  %3479 = vpow2.f32 %v2329_v17  ;;  %vm6213_vm11 = vmor %vm2676_vm7, %vm2677_vm8 }
 0x39d   : > { %v6091_v48 = vadd.f32 1.0, %v3472_v16  ;;  %3481 = vrcp.f32 %v6070_v26  ;;  %v6094_v53 = vpop.eup %3473  ;;  %v2647_v17 = vadd.f32 %v5993_v10, %v2646_v44  ;;  %v2654_v16 = vand.u32 2147483648, %v5918_v20 }
 0x39e   : > { %v2246_v31 = vpop.f32.mrf.mxu1  ;;  %3483 = vpow2.f32 %v2333_v35  ;;  %v6100_v29 = vpop.eup %3475  ;;  %v2673_v33 = vsub.f32 1.0, %v2672_v15  ;;  %v2623_v40 = vsel %vm6110_vm2, %v5985_v30, %v2619_v51  ;;  %v2604_v15 = vmul.f32 %v6035_v59, %v2603_v39 }
 0x39f   : > { %v2178_v47 = vpop.f32.mrf.mxu0  ;;  %v6098_v0 = vadd.f32 %v2246_v31, %v5547_v41  ;;  %3485 = vrcp.f32 %v6080_v11  ;;  %v6115_v44 = vpop.eup %3477  ;;  %v7265_v31 = vmov 0  ;;  %v2630_v35 = vmul.f32 %v6100_v29, %v6044_v2 }
 0x3a0   : > { %v6084_v21 = vadd.f32 %v2178_v47, %v5555_v62  ;;  %v2339_v62 = vmul.f32 1.442695, %v2278_v52  ;;  %v7266_v31 = vsel %vm6121_vm3, 4294967295, %v7265_v31  ;;  %v2682_v30 = vand.u32 2147483648, %v5990_v50 }
 0x3a1   : > { %v2280_v52 = vsub.f32 0.0, %v6098_v0  ;;  %7267 = vst [vmem:[#allocation65_spill] sm:$0xff] %v7266_v31  ;;  %v7270_v20 = vsub.f32 1.0, %v6019_v63  ;;  %v2651_v32 = vsel %vm6136_vm4, %v5993_v10, %v2647_v17  ;;  %vm2653_vm6 = vcmp.eq.f32.partialorder %v2652_v37, 8.507059e+37 }
 0x3a2   : > { %v2277_v47 = vsub.f32 0.0, %v6084_v21  ;;  %3487 = vpow2.f32 %v2339_v62  ;;  %v2700_v62 = vmul.f32 %v6094_v53, %v6032_v60  ;;  %v2655_v42 = vor.u32 1.1754944e-38, %v2654_v16 }
 0x3a3   : > { %3489 = vrcp.f32 %v6091_v48  ;;  %v2343_v51 = vmul.f32 1.442695, %v2280_v52  ;;  %v6152_v6 = vmul.f32 %v5998_v23, %v7270_v20  ;;  %v6160_v52 = vsel %vm6075_vm14, %v6051_v3, %v2623_v40 }
 0x3a4   : > { %v2337_v18 = vmul.f32 1.442695, %v2277_v47  ;;  %v3480_v47 = vpop.eup %3479  ;;  %7272 = vst [vmem:[#allocation67_spill] sm:$0xff] %v6160_v52  ;;  %v2674_v24 = vmul.f32 %v6058_v25, %v2673_v33  ;;  %v6167_v20 = vadd.f32 %v6035_v59, %v2604_v15  ;;  %v6172_v37 = vsel %vm2653_vm6, %v2655_v42, %v2651_v32 }
 0x3a5   : > { %v6143_v36 = vpop.eup %3481  ;;  %7271 = vst [vmem:[#allocation66_spill] sm:$0xff] %v6152_v6  ;;  %v2701_v6 = vsub.f32 1.0, %v2700_v62  ;;  %v2631_v3 = vsub.f32 1.0, %v2630_v35  ;;  %v2683_v7 = vor.u32 1.1754944e-38, %v2682_v30  ;;  %v6179_v33 = vadd.f32 1.0, %v3480_v47 }
 0x3a6   : > { %3491 = vpow2.f32 %v2337_v18  ;;  %v3484_v18 = vpop.eup %3483  ;;  %7273 = vst [vmem:[#allocation68_spill] sm:$0xff] %v6167_v20  ;;  %v2728_v16 = vmul.f32 %v6143_v36, %v6070_v26  ;;  %v2675_v62 = vadd.f32 %v6058_v25, %v2674_v24  ;;  %v2658_v32 = vmul.f32 %v6115_v44, %v6053_v45 }
 0x3a7   : > { %v2181_v39 = vpop.f32.mrf.mxu0  ;;  %v6164_v63 = vpop.eup %3485  ;;  %3493 = vpow2.f32 %v2343_v51  ;;  %7274 = vst [vmem:[#allocation69_spill] sm:$0xff] %v6172_v37  ;;  %v2702_v47 = vmul.f32 %v6094_v53, %v2701_v6  ;;  %v6196_v51 = vadd.f32 1.0, %v3484_v18  ;;  %v6200_v24 = vmul.f32 %v6100_v29, %v2631_v3 }
 0x3a8   : > { %v6170_v38 = vadd.f32 %v2181_v39, %v5547_v41  ;;  %v3488_v10 = vpop.eup %3487  ;;  %v2756_v30 = vmul.f32 %v6164_v63, %v6080_v11  ;;  %v2708_v35 = vand.u32 2147483647, %v6032_v60  ;;  %v2710_v6 = vand.u32 2147483648, %v6032_v60 }
 0x3a9   : > { %v6175_v17 = vpop.eup %3489  ;;  %v6181_v40 = vadd.f32 1.0, %v3488_v10  ;;  %v2729_v52 = vsub.f32 1.0, %v2728_v16  ;;  %v2659_v3 = vsub.f32 1.0, %v2658_v32  ;;  %vm2705_vm13 = vweird.f32 %v6094_v53 }
 0x3aa   : > { %v2279_v15 = vsub.f32 0.0, %v6170_v38  ;;  %v2686_v56 = vmul.f32 %v6175_v17, %v6091_v48  ;;  %v2679_v16 = vsel %vm6213_vm11, %v6058_v25, %v2675_v62  ;;  %v2736_v37 = vand.u32 2147483647, %v6070_v26  ;;  %vm6240_vm0 = vmor %vm2704_vm12, %vm2705_vm13 }
 0x3ab   : > { %3495 = vrcp.f32 %v6181_v40  ;;  %vm6230_vm14 = vcmp.eq.f32.partialorder %v2708_v35, 8.507059e+37  ;;  %v2711_v55 = vor.u32 1.1754944e-38, %v2710_v6  ;;  %v2730_v25 = vmul.f32 %v6143_v36, %v2729_v52 }
 0x3ac   : > { %v3492_v41 = vpop.eup %3491  ;;  %v2341_v10 = vmul.f32 1.442695, %v2279_v15  ;;  %3497 = vrcp.f32 %v6179_v33  ;;  %v2703_v15 = vadd.f32 %v6094_v53, %v2702_v47  ;;  %v2687_v50 = vsub.f32 1.0, %v2686_v56 }
 0x3ad   : > { %v6204_v39 = vadd.f32 1.0, %v3492_v41  ;;  %v3494_v20 = vpop.eup %3493  ;;  %v2757_v41 = vsub.f32 1.0, %v2756_v30  ;;  %v2738_v62 = vand.u32 2147483648, %v6070_v26  ;;  %v6253_v56 = vsel %vm6186_vm10, %v2683_v7, %v2679_v16 }
 0x3ae   : > { %v6226_v43 = vadd.f32 1.0, %v3494_v20  ;;  %v6256_v60 = vmul.f32 %v6115_v44, %v2659_v3  ;;  %v2688_v20 = vmul.f32 %v6175_v17, %v2687_v50  ;;  %vm6266_vm2 = vcmp.eq.f32.partialorder %v2736_v37, 8.507059e+37 }
 0x3af   : > { %3499 = vrcp.f32 %v6204_v39  ;;  %v2758_v6 = vmul.f32 %v6164_v63, %v2757_v41  ;;  %v2731_v3 = vadd.f32 %v6143_v36, %v2730_v25  ;;  %vm2733_vm4 = vweird.f32 %v6143_v36 }
 0x3b0   : > { %3501 = vrcp.f32 %v6196_v51  ;;  %v2764_v16 = vand.u32 2147483647, %v6080_v11  ;;  %v2766_v50 = vand.u32 2147483648, %v6080_v11  ;;  %vm2761_vm6 = vweird.f32 %v6164_v63  ;;  %vm6294_vm7 = vmor %vm2732_vm1, %vm2733_vm4 }
 0x3b1   : > { %3503 = vpow2.f32 %v2341_v10  ;;  %v6228_v32 = vpop.eup %3495  ;;  %v2707_v10 = vsel %vm6240_vm0, %v6094_v53, %v2703_v15  ;;  %v2739_v53 = vor.u32 1.1754944e-38, %v2738_v62  ;;  %v2759_v25 = vadd.f32 %v6164_v63, %v2758_v6 }
 0x3b2   : > { %v2784_v30 = vmul.f32 %v6228_v32, %v6181_v40  ;;  %3505 = vrcp.f32 %v6226_v43  ;;  %v6249_v52 = vpop.eup %3497  ;;  %v6277_v41 = vsel %vm6230_vm14, %v2711_v55, %v2707_v10  ;;  %v6290_v55 = vadd.f32 %v6175_v17, %v2688_v20 }
 0x3b3   : > { %v2714_v37 = vmul.f32 %v6249_v52, %v6179_v33  ;;  %vm2760_vm8 = vweird.f32 %v6080_v11  ;;  %vm6305_vm10 = vcmp.eq.f32.partialorder %v2764_v16, 8.507059e+37  ;;  %v2767_v11 = vor.u32 1.1754944e-38, %v2766_v50 }
 0x3b4   : > { %v2785_v7 = vsub.f32 1.0, %v2784_v30  ;;  %vm6311_vm11 = vmor %vm2760_vm8, %vm2761_vm6  ;;  %v2792_v31 = vand.u32 2147483647, %v6181_v40  ;;  %vm2789_vm12 = vweird.f32 %v6228_v32  ;;  %v2794_v4 = vand.u32 2147483648, %v6181_v40 }
 0x3b5   : > { %v6262_v18 = vpop.eup %3499  ;;  %v2822_v50 = vand.u32 2147483648, %v6226_v43  ;;  %vm2788_vm13 = vweird.f32 %v6181_v40  ;;  %vm2719_vm0 = vweird.f32 %v6249_v52  ;;  %vm2816_vm6 = vweird.f32 %v6226_v43 }
 0x3b6   : > { %v6270_v42 = vpop.eup %3501  ;;  %v2770_v47 = vmul.f32 %v6262_v18, %v6204_v39  ;;  %v2786_v62 = vmul.f32 %v6228_v32, %v2785_v7  ;;  %v2735_v7 = vsel %vm6294_vm7, %v6143_v36, %v2731_v3  ;;  %v2763_v36 = vsel %vm6311_vm11, %v6164_v63, %v2759_v25 }
 0x3b7   : > { %v3504_v15 = vpop.eup %3503  ;;  %v2742_v6 = vmul.f32 %v6270_v42, %v6196_v51  ;;  %v2820_v63 = vand.u32 2147483647, %v6226_v43  ;;  %v2768_v35 = vsel %vm6305_vm10, %v2767_v11, %v2763_v36  ;;  %vm2747_vm1 = vweird.f32 %v6270_v42 }
 0x3b8   : > { %v6287_v30 = vadd.f32 1.0, %v3504_v15  ;;  %v3506_v58 = vpop.eup %3505  ;;  %v2715_v15 = vsub.f32 1.0, %v2714_v37  ;;  %v2771_v13 = vsub.f32 1.0, %v2770_v47  ;;  %v2787_v3 = vadd.f32 %v6228_v32, %v2786_v62 }
 0x3b9   : > { %v2812_v26 = vmul.f32 %v3506_v58, %v6226_v43  ;;  %v6323_v37 = vsel %vm6266_vm2, %v2739_v53, %v2735_v7  ;;  %v2743_v1 = vsub.f32 1.0, %v2742_v6  ;;  %vm2817_vm14 = vweird.f32 %v3506_v58  ;;  %vm6334_vm2 = vmor %vm2788_vm13, %vm2789_vm12  ;;  %v7338_v6 = vld [vmem:[#allocation66_spill] sm:$0xff] }
 0x3ba   : > { %3507 = vrcp.f32 %v6287_v30  ;;  %v2716_v25 = vmul.f32 %v6249_v52, %v2715_v15  ;;  %v2772_v62 = vmul.f32 %v6262_v18, %v2771_v13  ;;  %v2791_v10 = vsel %vm6334_vm2, %v6228_v32, %v2787_v3  ;;  %vm2818_vm10 = vmor %vm2816_vm6, %vm2817_vm14 }
 0x3bb   : > { %v2813_v16 = vsub.f32 1.0, %v2812_v26  ;;  %vm6344_vm4 = vcmp.eq.f32.partialorder %v2792_v31, 8.507059e+37  ;;  %vm2718_vm8 = vweird.f32 %v6179_v33  ;;  %v2744_v20 = vmul.f32 %v6270_v42, %v2743_v1 }
 0x3bc   : > { %v2795_v13 = vor.u32 1.1754944e-38, %v2794_v4  ;;  %v2823_v26 = vor.u32 1.1754944e-38, %v2822_v50  ;;  %vm2774_vm11 = vweird.f32 %v6204_v39  ;;  %vm2775_vm12 = vweird.f32 %v6262_v18 }
 0x3bd   : > { %v2814_v47 = vmul.f32 %v3506_v58, %v2813_v16  ;;  %vm2821_vm13 = vcmp.eq.f32.partialorder %v2820_v63, 8.507059e+37  ;;  %v2773_v4 = vadd.f32 %v6262_v18, %v2772_v62  ;;  %v2778_v36 = vand.u32 2147483647, %v6204_v39 }
 0x3be   : > { %v2796_v43 = vsel %vm6344_vm4, %v2795_v13, %v2791_v10  ;;  %v2780_v3 = vand.u32 2147483648, %v6204_v39  ;;  %v2745_v1 = vadd.f32 %v6270_v42, %v2744_v20  ;;  %v2750_v63 = vand.u32 2147483647, %v6196_v51 }
 0x3bf   : > { %v2815_v7 = vadd.f32 %v3506_v58, %v2814_v47  ;;  %v2806_v47 = vand.u32 2147483647, %v6287_v30  ;;  %v2854_v53 = vmul.f32 %v2796_v43, %v6056_v9  ;;  %v7297_v10 = vand.u32 2147483647, %v5860_v5 }
 0x3c0   : > { %v6339_v40 = vpop.eup %3507  ;;  %vm2634_vm2 = vweird.f32 %v6044_v2  ;;  %v2717_v9 = vadd.f32 %v6249_v52, %v2716_v25  ;;  %v2852_v20 = vmul.f32 %v2768_v35, %v5966_v22  ;;  %v2781_v13 = vor.u32 1.1754944e-38, %v2780_v3 }
 0x3c1   : > { %v2798_v32 = vmul.f32 %v6339_v40, %v6287_v30  ;;  %v2819_v31 = vsel %vm2818_vm10, %v3506_v58, %v2815_v7  ;;  %v2808_v58 = vand.u32 2147483648, %v6287_v30  ;;  %vm2803_vm4 = vweird.f32 %v6339_v40 }
 0x3c2   : > { %v2824_v15 = vsel %vm2821_vm13, %v2823_v26, %v2819_v31  ;;  %vm2746_vm10 = vweird.f32 %v6196_v51  ;;  %vm6380_vm13 = vmor %vm2774_vm11, %vm2775_vm12  ;;  %vm6386_vm14 = vcmp.eq.f32.partialorder %v7297_v10, 8.507059e+37  ;;  %vm2802_vm11 = vweird.f32 %v6287_v30  ;;  %v7330_v10 = vld [vmem:[#allocation60_spill] sm:$0xff] }
 0x3c3   : > { %v2799_v11 = vsub.f32 1.0, %v2798_v32  ;;  %v2856_v16 = vmul.f32 %v2824_v15, %v6098_v0  ;;  %v2752_v0 = vand.u32 2147483648, %v6196_v51  ;;  %vm6395_vm7 = vmor %vm2746_vm10, %vm2747_vm1  ;;  %v2777_v5 = vsel %vm6380_vm13, %v6262_v18, %v2773_v4  ;;  %v7331_v51 = vld [vmem:[#allocation46_spill] sm:$0xff]  ;;  %v7351_v15 = vld [vmem:[#allocation41_spill] sm:$0xff] }
 0x3c4   : > { %v2724_v7 = vand.u32 2147483648, %v6179_v33  ;;  %vm2804_vm12 = vmor %vm2802_vm11, %vm2803_vm4  ;;  %v2809_v25 = vor.u32 1.1754944e-38, %v2808_v58  ;;  %v7302_v26 = vand.u32 2147483647, %v5815_v28  ;;  %vm2606_vm13 = vweird.f32 %v5972_v61  ;;  %v7342_v28 = vld [vmem:[#allocation9_spill] sm:$0xff]  ;;  %v7353_v32 = vld [vmem:[#allocation63_spill] sm:$0xff] }
 0x3c5   : > { %v2800_v50 = vmul.f32 %v6339_v40, %v2799_v11  ;;  %2884 = vmatpush.msra.mxu3 %v2856_v16  ;;  %v2749_v22 = vsel %vm6395_vm7, %v6270_v42, %v2745_v1  ;;  %vm2779_vm6 = vcmp.eq.f32.partialorder %v2778_v36, 8.507059e+37  ;;  %vm2807_vm4 = vcmp.eq.f32.partialorder %v2806_v47, 8.507059e+37  ;;  %vm6426_vm11 = vmor %vm2718_vm8, %vm2719_vm0  ;;  %v7325_v47 = vld [vmem:[#allocation61_spill] sm:$0xff] }
 0x3c6   : > { %vm6410_vm1 = vcmp.eq.f32.partialorder %v7302_v26, 8.507059e+37  ;;  %v2850_v30 = vmul.f32 %v6323_v37, %v5913_v12  ;;  %v2753_v35 = vor.u32 1.1754944e-38, %v2752_v0  ;;  %v2782_v31 = vsel %vm2779_vm6, %v2781_v13, %v2777_v5  ;;  %v7327_v0 = vld [vmem:[#allocation33_spill] sm:$0xff] }
 0x3c7   : > { %v2801_v39 = vadd.f32 %v6339_v40, %v2800_v50  ;;  %2885 = vmatpush.msra.mxu3 %v2854_v53  ;;  %v2661_v42 = vadd.f32 %v6115_v44, %v6256_v60  ;;  %v2721_v12 = vsel %vm6426_vm11, %v6249_v52, %v2717_v9  ;;  %vm2751_vm10 = vcmp.eq.f32.partialorder %v2750_v63, 8.507059e+37  ;;  %v7328_v53 = vld [vmem:[#allocation64_spill] sm:$0xff]  ;;  %v7332_v5 = vld [vmem:[#allocation69_spill] sm:$0xff] }
 0x3c8   : > { %v2848_v4 = vmul.f32 %v6277_v41, %v5876_v8  ;;  %vm7307_vm0 = vweird.f32 %v6175_v17  ;;  %vm7308_vm8 = vweird.f32 %v6091_v48  ;;  %v2725_v60 = vor.u32 1.1754944e-38, %v2724_v7  ;;  %v7337_v13 = vld [vmem:[#allocation17_spill] sm:$0xff] }
 0x3c9   : > { %v2805_v18 = vsel %vm2804_vm12, %v6339_v40, %v2801_v39  ;;  %2886 = vmatpush.msra.mxu3 %v2852_v20  ;;  %v2668_v40 = vand.u32 2147483648, %v6053_v45  ;;  %vm6445_vm6 = vmor %vm7308_vm8, %vm7307_vm0  ;;  %v2754_v11 = vsel %vm2751_vm10, %v2753_v35, %v2749_v22  ;;  %v7311_v52 = vand.u32 2147483647, %v5713_v34  ;;  %v7336_v20 = vld [vmem:[#allocation42_spill] sm:$0xff]  ;;  %v7343_v35 = vld [vmem:[#allocation59_spill] sm:$0xff] }
 0x3ca   : > { %v2810_v43 = vsel %vm2807_vm4, %v2809_v25, %v2805_v18  ;;  %v2633_v8 = vadd.f32 %v6100_v29, %v6200_v24  ;;  %v2693_v41 = vsel %vm6445_vm6, %v6175_v17, %v6290_v55  ;;  %v7314_v36 = vand.u32 2147483647, %v6179_v33  ;;  %v7340_v22 = vld [vmem:[#allocation58_spill] sm:$0xff] }
 0x3cb   : > { %v2855_v37 = vmul.f32 %v2810_v43, %v6170_v38  ;;  %2887 = vmatpush.msra.mxu3 %v2850_v30  ;;  %vm6451_vm4 = vcmp.eq.f32.partialorder %v7311_v52, 8.507059e+37  ;;  %v2853_v34 = vmul.f32 %v2782_v31, %v6084_v21  ;;  %v2640_v3 = vand.u32 2147483648, %v6044_v2  ;;  %v7345_v43 = vld [vmem:[#allocation56_spill] sm:$0xff]  ;;  %v7379_v38 = vld [vmem:[#allocation53_spill] sm:$0xff] }
 0x3cc   : > { %vm2723_vm10 = vcmp.eq.f32.partialorder %v7314_v36, 8.507059e+37  ;;  %v2846_v16 = vmul.f32 %v6253_v56, %v5836_v54  ;;  %vm7315_vm0 = vweird.f32 %v6115_v44  ;;  %vm7316_vm8 = vweird.f32 %v6053_v45  ;;  %v7323_v54 = vld [vmem:[#allocation38_spill] sm:$0xff]  ;;  %v7354_v52 = vld [vmem:[#allocation68_spill] sm:$0xff] }
 0x3cd   : > { %2864 = vmatpush.msra.mxu2 %v2855_v37  ;;  %vm6473_vm11 = vmor %vm7316_vm8, %vm7315_vm0  ;;  %v7319_v17 = vand.u32 2147483648, %v6091_v48  ;;  %v2726_v55 = vsel %vm2723_vm10, %v2725_v60, %v2721_v12  ;;  %2888 = vmatpush.msra.mxu3 %v2848_v4  ;;  %v7320_v21 = vand.u32 2147483647, %v5658_v19  ;;  %vm2495_vm7 = vweird.f32 %v5848_v46  ;;  %v7346_v12 = vld [vmem:[#allocation13_spill] sm:$0xff]  ;;  %v7347_v37 = vld [vmem:[#allocation67_spill] sm:$0xff] }
 0x3ce   : > { %vm2522_vm12 = vweird.f32 %v7323_v54  ;;  %v2638_v56 = vand.u32 2147483647, %v6044_v2  ;;  %v2665_v1 = vsel %vm6473_vm11, %v6115_v44, %v2661_v42  ;;  %v7324_v50 = vand.u32 2147483647, %v6091_v48  ;;  %v7352_v60 = vld [vmem:[#allocation25_spill] sm:$0xff]  ;;  %v7384_v30 = vld [vmem:[#allocation28_spill] sm:$0xff] }
 0x3cf   : > { %v2697_v33 = vor.u32 1.1754944e-38, %v7319_v17  ;;  %vm6481_vm6 = vcmp.eq.f32.partialorder %v7320_v21, 8.507059e+37  ;;  %v2851_v63 = vmul.f32 %v2754_v11, %v7325_v47  ;;  %2865 = vmatpush.msra.mxu2 %v2853_v34  ;;  %v7329_v62 = vsel %vm6121_vm3, %v7327_v0, %v7328_v53  ;;  %2889 = vmatpush.msra.mxu3 %v2846_v16  ;;  %v7363_v21 = vld [vmem:[#allocation8_spill] sm:$0xff]  ;;  %v7365_v47 = vld [vmem:[#allocation39_spill] sm:$0xff]  ;;  %v7367_v0 = vld [vmem:[#allocation5_spill] sm:$0xff] }
 0x3d0   : > { %vm2695_vm10 = vcmp.eq.f32.partialorder %v7324_v50, 8.507059e+37  ;;  %v2600_v9 = vsel %vm6386_vm14, %v7330_v10, %v7329_v62  ;;  %v2844_v39 = vmul.f32 %v7332_v5, %v7331_v51  ;;  %vm7333_vm11 = vweird.f32 %v6100_v29  ;;  %v7368_v53 = vld [vmem:[#allocation26_spill] sm:$0xff]  ;;  %v7370_v10 = vld [vmem:[#allocation29_spill] sm:$0xff] }
 0x3d1   : > { %vm6508_vm0 = vmor %vm2634_vm2, %vm7333_vm11  ;;  %v2669_v44 = vor.u32 1.1754944e-38, %v2668_v40  ;;  %v2698_v7 = vsel %vm2695_vm10, %v2697_v33, %v2693_v41  ;;  %vm2467_vm3 = vweird.f32 %v7336_v20  ;;  %vm2494_vm8 = vweird.f32 %v7337_v13  ;;  %2866 = vmatpush.msra.mxu2 %v2851_v63  ;;  %v7355_v41 = vld [vmem:[#allocation54_spill] sm:$0xff] }
 0x3d2   : > { %v2577_v25 = vadd.f32 %v5998_v23, %v7338_v6  ;;  %v2637_v26 = vsel %vm6508_vm0, %v6100_v29, %v2633_v8  ;;  %v7339_v2 = vand.u32 2147483647, %v6053_v45  ;;  %v2849_v18 = vmul.f32 %v2726_v55, %v7340_v22  ;;  %2890 = vmatpush.msra.mxu3 %v2844_v39  ;;  %v7362_v55 = vld [vmem:[#allocation15_spill] sm:$0xff]  ;;  %v7371_v51 = vld [vmem:[#allocation18_spill] sm:$0xff] }
 0x3d3   : > { %v7344_v31 = vsel %vm6027_vm9, %v7342_v28, %v7343_v35  ;;  %v2842_v40 = vmul.f32 %v7347_v37, %v7346_v12  ;;  %vm7348_vm14 = vweird.f32 %v6035_v59  ;;  %v2641_v45 = vor.u32 1.1754944e-38, %v2640_v3  ;;  %v7356_v3 = vld [vmem:[#allocation47_spill] sm:$0xff]  ;;  %v7386_v35 = vld [vmem:[#allocation44_spill] sm:$0xff] }
 0x3d4   : > { %vm2667_vm2 = vcmp.eq.f32.partialorder %v7339_v2, 8.507059e+37  ;;  %v2572_v42 = vsel %vm6410_vm1, %v7345_v43, %v7344_v31  ;;  %vm6536_vm10 = vmor %vm2606_vm13, %vm7348_vm14  ;;  %vm2439_vm9 = vweird.f32 %v7351_v15  ;;  %vm2466_vm11 = vweird.f32 %v7352_v60  ;;  %2867 = vmatpush.msra.mxu2 %v2849_v18  ;;  %v7383_v18 = vld [vmem:[#allocation37_spill] sm:$0xff]  ;;  %v7387_v43 = vld [vmem:[#allocation22_spill] sm:$0xff] }
 0x3d5   : > { %v2670_v4 = vsel %vm2667_vm2, %v2669_v44, %v2665_v1  ;;  %v2549_v11 = vadd.f32 %v5961_v14, %v7353_v32  ;;  %v2609_v8 = vsel %vm6536_vm10, %v6035_v59, %v7354_v52  ;;  %vm2639_vm1 = vcmp.eq.f32.partialorder %v2638_v56, 8.507059e+37  ;;  %2891 = vmatpush.msra.mxu3 %v2842_v40  ;;  %v7377_v44 = vld [vmem:[#allocation35_spill] sm:$0xff]  ;;  %v7395_v32 = vld [vmem:[#allocation14_spill] sm:$0xff] }
 0x3d6   : > { %v2847_v36 = vmul.f32 %v2698_v7, %v7355_v41  ;;  %v2556_v34 = vand.u32 2147483648, %v5884_v57  ;;  %v2840_v16 = vmul.f32 %v2600_v9, %v7356_v3  ;;  %vm7357_vm13 = vweird.f32 %v5998_v23  ;;  %v7378_v7 = vld [vmem:[#allocation7_spill] sm:$0xff] }
 0x3d7   : > { %vm7358_vm0 = vweird.f32 %v5929_v49  ;;  %v7361_v17 = vand.u32 2147483648, %v5972_v61  ;;  %v2642_v59 = vsel %vm2639_vm1, %v2641_v45, %v2637_v26  ;;  %vm2438_vm10 = vweird.f32 %v7363_v21  ;;  %v7381_v26 = vld [vmem:[#allocation24_spill] sm:$0xff]  ;;  %v7392_v40 = vld [vmem:[#allocation51_spill] sm:$0xff]  ;;  %v7394_v45 = vld [vmem:[#allocation57_spill] sm:$0xff] }
 0x3d8   : > { %vm6555_vm2 = vmor %vm7358_vm0, %vm7357_vm13  ;;  %v2554_v56 = vand.u32 2147483647, %v5884_v57  ;;  %v7364_v50 = vand.u32 2147483647, %v5972_v61  ;;  %v2845_v63 = vmul.f32 %v2670_v4, %v7365_v47  ;;  %2868 = vmatpush.msra.mxu2 %v2847_v36  ;;  %v7369_v62 = vsel %vm5924_vm5, %v7367_v0, %v7368_v53  ;;  %2892 = vmatpush.msra.mxu3 %v2840_v16  ;;  %v7393_v29 = vld [vmem:[#allocation27_spill] sm:$0xff]  ;;  %v7407_v0 = vld [vmem:[#allocation32_spill] sm:$0xff] }
 0x3d9   : > { %v2613_v33 = vor.u32 1.1754944e-38, %v7361_v17  ;;  %v2581_v1 = vsel %vm6555_vm2, %v5998_v23, %v2577_v25  ;;  %v2516_v9 = vsel %vm6451_vm4, %v7370_v10, %v7369_v62  ;;  %v2838_v5 = vmul.f32 %v2572_v42, %v7371_v51  ;;  %v7388_v42 = vld [vmem:[#allocation55_spill] sm:$0xff]  ;;  %v7410_v61 = vld [vmem:[#allocation21_spill] sm:$0xff] }
 0x3da   : > { %vm2611_vm13 = vcmp.eq.f32.partialorder %v7364_v50, 8.507059e+37  ;;  %vm7372_vm1 = vweird.f32 %v5961_v14  ;;  %vm7373_vm0 = vweird.f32 %v5884_v57  ;;  %v7376_v23 = vand.u32 2147483648, %v5929_v49  ;;  %2869 = vmatpush.msra.mxu2 %v2845_v63  ;;  %v7400_v16 = vld [vmem:[#allocation31_spill] sm:$0xff]  ;;  %v7403_v50 = vld [vmem:[#allocation45_spill] sm:$0xff] }
 0x3db   : > { %vm6583_vm2 = vmor %vm7373_vm0, %vm7372_vm1  ;;  %v2614_v48 = vsel %vm2611_vm13, %v2613_v33, %v2609_v8  ;;  %vm2383_vm5 = vweird.f32 %v7377_v44  ;;  %vm2410_vm14 = vweird.f32 %v7378_v7  ;;  %v2493_v6 = vadd.f32 %v5848_v46, %v7379_v38  ;;  %2893 = vmatpush.msra.mxu3 %v2838_v5  ;;  %v7396_v8 = vld [vmem:[#allocation43_spill] sm:$0xff] }
 0x3dc   : > { %v2585_v39 = vor.u32 1.1754944e-38, %v7376_v23  ;;  %v2553_v57 = vsel %vm6583_vm2, %v5961_v14, %v2549_v11  ;;  %v7380_v25 = vand.u32 2147483647, %v5929_v49  ;;  %v2843_v2 = vmul.f32 %v2642_v59, %v7381_v26  ;;  %v7402_v59 = vld [vmem:[#allocation19_spill] sm:$0xff]  ;;  %v7411_v23 = vld [vmem:[#allocation20_spill] sm:$0xff]  ;;  %v7416_v26 = vld [vmem:[#allocation49_spill] sm:$0xff] }
 0x3dd   : > { %v7385_v28 = vsel %vm5855_vm15, %v7383_v18, %v7384_v30  ;;  %v2836_v12 = vmul.f32 %v7388_v42, %v7387_v43  ;;  %vm7389_vm13 = vweird.f32 %v5869_v27  ;;  %v2557_v14 = vor.u32 1.1754944e-38, %v2556_v34  ;;  %v7417_v18 = vld [vmem:[#allocation50_spill] sm:$0xff]  ;;  %v7418_v30 = vld [vmem:[#allocation16_spill] sm:$0xff] }
 0x3de   : > { %vm2583_vm4 = vcmp.eq.f32.partialorder %v7380_v25, 8.507059e+37  ;;  %v2488_v31 = vsel %vm6481_vm6, %v7386_v35, %v7385_v28  ;;  %vm6613_vm1 = vmor %vm2522_vm12, %vm7389_vm13  ;;  %vm2382_vm15 = vweird.f32 %v7392_v40  ;;  %v2465_v58 = vadd.f32 %v7336_v20, %v7393_v29  ;;  %2870 = vmatpush.msra.mxu2 %v2843_v2 }
 0x3df   : > { %v2586_v37 = vsel %vm2583_vm4, %v2585_v39, %v2581_v1  ;;  %v2525_v4 = vsel %vm6613_vm1, %v5869_v27, %v7394_v45  ;;  %vm2555_vm6 = vcmp.eq.f32.partialorder %v2554_v56, 8.507059e+37  ;;  %v2841_v11 = vmul.f32 %v2614_v48, %v7395_v32  ;;  %vm6631_vm12 = vmor %vm2494_vm8, %vm2495_vm7  ;;  %2894 = vmatpush.msra.mxu3 %v2836_v12  ;;  %v7423_v12 = vld [vmem:[#allocation11_spill] sm:$0xff] }
 0x3e0   : > { %v2472_v52 = vand.u32 2147483648, %v7352_v60  ;;  %v2834_v41 = vmul.f32 %v2516_v9, %v7396_v8  ;;  %v7399_v34 = vand.u32 2147483648, %v7323_v54  ;;  %v2558_v27 = vsel %vm2555_vm6, %v2557_v14, %v2553_v57  ;;  %vm6651_vm7 = vmor %vm2466_vm11, %vm2467_vm3  ;;  %v7409_v9 = vld [vmem:[#allocation6_spill] sm:$0xff] }
 0x3e1   : > { %v2437_v24 = vadd.f32 %v7351_v15, %v7400_v16  ;;  %v2497_v17 = vsel %vm6631_vm12, %v5848_v46, %v2493_v6  ;;  %v7401_v33 = vand.u32 2147483647, %v7323_v54  ;;  %v2839_v56 = vmul.f32 %v2586_v37, %v7402_v59  ;;  %2871 = vmatpush.msra.mxu2 %v2841_v11  ;;  %vm6672_vm3 = vmor %vm2438_vm10, %vm2439_vm9  ;;  %v7424_v14 = vld [vmem:[#allocation34_spill] sm:$0xff]  ;;  %v7425_v37 = vld [vmem:[#allocation12_spill] sm:$0xff] }
 0x3e2   : > { %v2529_v3 = vor.u32 1.1754944e-38, %v7399_v34  ;;  %v2444_v1 = vand.u32 2147483648, %v7363_v21  ;;  %v2832_v47 = vmul.f32 %v2488_v31, %v7403_v50  ;;  %v7406_v46 = vand.u32 2147483648, %v7337_v13  ;;  %2895 = vmatpush.msra.mxu3 %v2834_v41  ;;  %v7429_v11 = vld [vmem:[#allocation30_spill] sm:$0xff]  ;;  %v7430_v41 = vld [vmem:[#allocation48_spill] sm:$0xff] }
 0x3e3   : > { %vm2527_vm0 = vcmp.eq.f32.partialorder %v7401_v33, 8.507059e+37  ;;  %v2409_v53 = vadd.f32 %v7362_v55, %v7407_v0  ;;  %v2469_v62 = vsel %vm6651_vm7, %v7336_v20, %v2465_v58  ;;  %v7408_v10 = vand.u32 2147483647, %v7337_v13  ;;  %2872 = vmatpush.msra.mxu2 %v2839_v56  ;;  %v7414_v13 = vld [vmem:[#allocation40_spill] sm:$0xff] }
 0x3e4   : > { %v2501_v19 = vor.u32 1.1754944e-38, %v7406_v46  ;;  %v2530_v54 = vsel %vm2527_vm0, %v2529_v3, %v2525_v4  ;;  %v2837_v51 = vmul.f32 %v2558_v27, %v7409_v9  ;;  %v2416_v5 = vand.u32 2147483648, %v7378_v7  ;;  %2896 = vmatpush.msra.mxu3 %v2832_v47  ;;  %v7431_v3 = vld [vmem:[#allocation23_spill] sm:$0xff] }
 0x3e5   : > { %vm2499_vm8 = vcmp.eq.f32.partialorder %v7408_v10, 8.507059e+37  ;;  %v2830_v39 = vmul.f32 %v7411_v23, %v7410_v61  ;;  %v2473_v20 = vor.u32 1.1754944e-38, %v2472_v52  ;;  %v2381_v6 = vadd.f32 %v7377_v44, %v7414_v13 }
 0x3e6   : > { %v2502_v38 = vsel %vm2499_vm8, %v2501_v19, %v2497_v17  ;;  %v2441_v57 = vsel %vm6672_vm3, %v7351_v15, %v2437_v24  ;;  %v7415_v25 = vand.u32 2147483647, %v7352_v60  ;;  %v2835_v2 = vmul.f32 %v2530_v54, %v7416_v26  ;;  %2873 = vmatpush.msra.mxu2 %v2837_v51  ;;  %v2862_v24 = vpop.permute.xlu0 %2861 }
 0x3e7   : > { %v2388_v22 = vand.u32 2147483648, %v7392_v40  ;;  %v2828_v28 = vmul.f32 %v7418_v30, %v7417_v18  ;;  %vm7419_vm9 = vweird.f32 %v7362_v55  ;;  %v2445_v15 = vor.u32 1.1754944e-38, %v2444_v1  ;;  %2897 = vmatpush.msra.mxu3 %v2830_v39 }
 0x3e8   : > { %vm2471_vm11 = vcmp.eq.f32.partialorder %v7415_v25, 8.507059e+37  ;;  %vm6691_vm10 = vmor %vm2410_vm14, %vm7419_vm9  ;;  %v2386_v60 = vand.u32 2147483647, %v7392_v40  ;;  %v7422_v42 = vand.u32 2147483647, %v7363_v21  ;;  %v2833_v49 = vmul.f32 %v2502_v38, %v7423_v12  ;;  %2874 = vmatpush.msra.mxu2 %v2835_v2 }
 0x3e9   : > { %v2474_v31 = vsel %vm2471_vm11, %v2473_v20, %v2469_v62  ;;  %v2413_v43 = vsel %vm6691_vm10, %v7362_v55, %v2409_v53  ;;  %v2826_v29 = vmul.f32 %v7425_v37, %v7424_v14  ;;  %vm6708_vm14 = vmor %vm2382_vm15, %vm2383_vm5  ;;  %v2417_v45 = vor.u32 1.1754944e-38, %v2416_v5  ;;  %2898 = vmatpush.msra.mxu3 %v2828_v28  ;;  %v2857_v55 = vld [vmem:[%s6759_s3] sm:$0xf] }
 0x3ea   : > { %vm2443_vm2 = vcmp.eq.f32.partialorder %v7422_v42, 8.507059e+37  ;;  %v2385_v21 = vsel %vm6708_vm14, %v7377_v44, %v2381_v6  ;;  %v7428_v32 = vand.u32 2147483647, %v7378_v7  ;;  %v2831_v40 = vmul.f32 %v2474_v31, %v7429_v11  ;;  %2875 = vmatpush.msra.mxu2 %v2833_v49  ;;  %v7432_v44 = vld [vmem:[#allocation52_spill] sm:$0xff] }
 0x3eb   : > { %v2446_v4 = vsel %vm2443_vm2, %v2445_v15, %v2441_v57  ;;  %v2389_v52 = vor.u32 1.1754944e-38, %v2388_v22  ;;  %2899 = vmatpush.msra.mxu3 %v2826_v29  ;;  %vm2387_vm5 = vcmp.eq.f32.partialorder %v2386_v60, 8.507059e+37  ;;  %vm2907_vm13 = vcmask 1043456  }
 0x3ec   : > { %vm2415_vm4 = vcmp.eq.f32.partialorder %v7428_v32, 8.507059e+37  ;;  %v2829_v36 = vmul.f32 %v2446_v4, %v7430_v41  ;;  %2876 = vmatpush.msra.mxu2 %v2831_v40  ;;  %2900 = vmatmul.f32.vlgmr.msra.gmra.mxu3 %v2857_v55 }
 0x3ed   : > { %v2418_v8 = vsel %vm2415_vm4, %v2417_v45, %v2413_v43  ;;  %v2390_v34 = vsel %vm2387_vm5, %v2389_v52, %v2385_v21 }
 0x3ee   : > { %v2827_v27 = vmul.f32 %v2418_v8, %v7431_v3  ;;  %2877 = vmatpush.msra.mxu2 %v2829_v36  ;;  %v2825_v7 = vmul.f32 %v2390_v34, %v7432_v44 }
 0x3f0   : > { %2878 = vmatpush.msra.mxu2 %v2827_v27 }
 0x3f2   : > { %2879 = vmatpush.msra.mxu2 %v2825_v7 }
 0x3f3   : > { %2880 = vmatmul.f32.vlgmr.msra.gmra.mxu2 %v2857_v55 }
 0x46f   : > { %v2901_v16 = vpop.f32.mrf.mxu3 }
 0x470   : > { %v2902_v17 = vadd.f32 %v2901_v16, %v2862_v24 }
 0x472   : > { %v2906_v59 = vrot.slane %v2902_v17, 4 }
 0x476   : > { %v2881_v33 = vpop.f32.mrf.mxu2 }
 0x477   : > { %v2882_v56 = vadd.f32 %v2881_v33, %v2862_v24 }
 0x479   : > { %v2908_v1 = vsel %vm2907_vm13, %v2882_v56, %v2906_v59 }
 0x47a   : > { %2910 = vst [vmem:[%s245_s26] sm:$0xff] %v2908_v1 }
 0x47b   : > { %3536 = shalt.err (!%p3533_p3)
}
 0x47c   : > { %3082 = dma.vmem_to_hbm [thread:$0]  (%p3647_p5), %s2926_s28, 128, %s2928_s29, %s2912_s25  }
 0x47d PF: > { %p3088_p4 = scmp.ge.s32.totalorder %s3571_s24, 2  ;;  %s2939_s15 = sand.u32 1, %s3559_s21  }
 0x47e   : > { %s2940_s17 = scalar_lea.sflag [#allocation3], %s2939_s15 }
 0x47f   : > { %p3085_p7 = pnand %p3088_p4, %p3651_p6 }
 0x481   : > { %p3086_p8 = pneg %p3085_p7 }
 0x483   : > { %3554 = dma.done.wait (%p3086_p8), %s2940_s17, 128  }
 0x484   : > { %3556 = vsyncadd (%p3086_p8), %s2940_s17, 4294967168  ;;  %p16_p9 = scmp.ge.s32.totalorder %s3634_s27, 4   ;;  %s7433_s21 = smov %s3563_s22 }
 0x485   : > { %s7434_s22 = smov %s3567_s23  ;;  %s7435_s23 = smov %s3645_s30 }
 0x486   : > { %s7436_s24 = smov %s3634_s27  ;;  %18 = sbr.rel (!%p16_p9) target bundleno = 3 (0x3), region = 82 }
 0x48b   :  { %2946 = vsyncpa [#allocation3], 1 }
 0x48c   :  { %2948 = vsyncpa [#allocation3 + $0x1], 1 }

</bundles_post_ra>
